<compile_context>
chip_gen: v7x
topology: tpu7x:2x2x1
jax: 0.10.0
libtpu: 0.0.40
codegen_flags: <defaults>
</compile_context>

<pallas_src>
import jax
import jax.numpy as jnp
import numpy as np
from jax.experimental import pallas as pl
from jax.experimental.pallas import tpu as pltpu


# --------------------------------------------------------------------------
# Pallas kernel: one GCGRU layer.  Grid = (batch, time-blocks); each grid step
# runs T_BLOCK GRU steps for one batch element, entirely in VMEM.
# --------------------------------------------------------------------------
def gcgru_layer_kernel(x_ref, h0_ref, s_ref, wx_ref, wgh_ref, wuh_ref,
                       e_ref, bg_ref, bu_ref, out_ref, h_scr):
    TB, N, Din = x_ref.shape           # time-block, nodes, input channels
    H = h0_ref.shape[-1]               # hidden
    D = e_ref.shape[-1]                # embed dim
    Km1 = s_ref.shape[0] // N          # cheb_k - 1 (identity support implicit)

    @pl.when(pl.program_id(1) == 0)    # new batch element -> reload init state
    def _():
        h_scr[...] = h0_ref[...]

    # Invariant operands: load once per grid step (stay resident over the loop).
    s = s_ref[...]                     # [(K-1)*N, N]   supports (no identity)
    wx = wx_ref[...]                   # [K*Din, D*3H]  x part: gate(2H) | update(H)
    wgh = wgh_ref[...]                 # [K*H,  D*2H]   h part, gate
    wuh = wuh_ref[...]                 # [K*H,  D*H ]   h part, update
    e = e_ref[...]                     # [N, D]
    bg = bg_ref[...]                   # [N, 2H]
    bu = bu_ref[...]                   # [N, H]
    ecols = [e[:, d:d + 1] for d in range(D)]   # hoisted out of the time loop

    def embed_contract(y, width):
        # y: [N, D*width] with d-major columns -> sum_d E[:, d] * y[:, d, :]
        acc = ecols[0] * y[:, :width]
        for d in range(1, D):
            acc = acc + ecols[d] * y[:, d * width:(d + 1) * width]
        return acc

    def cheb_feats(v):
        # v: [N, C] -> [N, K*C]  (k-major columns; k=0 block is v itself).
        # One batched support matmul over all Chebyshev orders k >= 1.
        vg = jnp.dot(s, v, preferred_element_type=jnp.float32)   # [(K-1)*N, C]
        return jnp.concatenate(
            [v] + [vg[i * N:(i + 1) * N] for i in range(Km1)], axis=1)

    def step(t, h):
        x_t = x_ref[t]                                            # [N, Din]
        # x path: one support conv + one fused MXU matmul, reused by both gates.
        yx = jnp.dot(cheb_feats(x_t), wx,
                     preferred_element_type=jnp.float32)          # [N, D*3H]
        x_gate = yx[:, :D * 2 * H]                                # [N, D*2H]
        x_upd = yx[:, D * 2 * H:]                                 # [N, D*H]

        # gate: z, r
        g = x_gate + jnp.dot(cheb_feats(h), wgh,
                             preferred_element_type=jnp.float32)  # [N, D*2H]
        zr = jax.nn.sigmoid(embed_contract(g, 2 * H) + bg)        # [N, 2H]
        z = zr[:, :H]
        r = zr[:, H:]

        # candidate
        rh = r * h
        u = x_upd + jnp.dot(cheb_feats(rh), wuh,
                            preferred_element_type=jnp.float32)   # [N, D*H]
        hh = jnp.tanh(embed_contract(u, H) + bu)                  # [N, H]

        h_new = z * h + (1.0 - z) * hh
        out_ref[t] = h_new
        return h_new

    h_last = jax.lax.fori_loop(0, TB, step, h_scr[...], unroll=True)
    h_scr[...] = h_last


def _pick_t_block(T, t_block):
    tb = max(1, min(t_block, T))
    while T % tb:
        tb -= 1
    return tb


def run_gcgru_layer(x_seq, h0, s_noid, wx, wgh, wuh, e, bg, bu, t_block=8):
    """x_seq [B,T,N,Din], h0 [B,N,H] -> all hidden states [B,T,N,H]."""
    B, T, N, Din = x_seq.shape
    H = h0.shape[-1]
    TB = _pick_t_block(T, t_block)
    return pl.pallas_call(
        gcgru_layer_kernel,
        out_shape=jax.ShapeDtypeStruct((B, T, N, H), jnp.float32),
        grid_spec=pltpu.PrefetchScalarGridSpec(
            num_scalar_prefetch=0,
            grid=(B, T // TB),
            in_specs=[
                pl.BlockSpec((None, TB, N, Din), lambda b, t: (b, t, 0, 0)),  # x
                pl.BlockSpec((None, N, H), lambda b, t: (b, 0, 0)),           # h0
                pl.BlockSpec(s_noid.shape, lambda b, t: (0, 0)),              # supports
                pl.BlockSpec(wx.shape, lambda b, t: (0, 0)),                  # x-part weights
                pl.BlockSpec(wgh.shape, lambda b, t: (0, 0)),                 # h-part gate w
                pl.BlockSpec(wuh.shape, lambda b, t: (0, 0)),                 # h-part update w
                pl.BlockSpec(e.shape, lambda b, t: (0, 0)),                   # node embeddings
                pl.BlockSpec(bg.shape, lambda b, t: (0, 0)),                  # gate bias
                pl.BlockSpec(bu.shape, lambda b, t: (0, 0)),                  # update bias
            ],
            out_specs=pl.BlockSpec((None, TB, N, H), lambda b, t: (b, t, 0, 0)),
            scratch_shapes=[pltpu.VMEM((N, H), jnp.float32)],
        ),
        compiler_params=pltpu.CompilerParams(
            dimension_semantics=("parallel", "arbitrary")),  # batch || , time seq
    )(x_seq, h0, s_noid, wx, wgh, wuh, e, bg, bu)


# --------------------------------------------------------------------------
# Glue (plain JAX): quantities constant across the time loop — Chebyshev
# supports from node embeddings, and the factored / split / flattened weights.
# --------------------------------------------------------------------------
def encoder_forward(x, init_state, node_embeddings, params, cheb_k, t_block=8):
    assert cheb_k >= 2
    E = node_embeddings
    N, D = E.shape
    A = jax.nn.softmax(
        jax.nn.relu(jnp.matmul(E, E.T, precision='highest')), axis=1)
    supports = [jnp.eye(N, dtype=jnp.float32), A]
    for _ in range(2, cheb_k):
        supports.append(2.0 * jnp.matmul(A, supports[-1], precision='highest')
                        - supports[-2])
    K = len(supports)
    s_noid = jnp.concatenate(supports[1:], axis=0)           # [(K-1)*N, N]

    current = x
    hiddens = []
    for layer, (gwp, gbp, uwp, ubp) in enumerate(params):
        Din = current.shape[-1]
        H = init_state[layer].shape[-1]
        # Split each weight pool into its x part and h part and flatten so the
        # kernel does [N, K*C] @ [K*C, D*O] on the MXU (rows k-major over (k,c),
        # columns d-major over (d,o)).
        wgx = jnp.transpose(gwp[:, :, :Din, :], (1, 2, 0, 3)).reshape(K * Din, D * 2 * H)
        wux = jnp.transpose(uwp[:, :, :Din, :], (1, 2, 0, 3)).reshape(K * Din, D * H)
        wx = jnp.concatenate([wgx, wux], axis=1)              # [K*Din, D*3H]
        wgh = jnp.transpose(gwp[:, :, Din:, :], (1, 2, 0, 3)).reshape(K * H, D * 2 * H)
        wuh = jnp.transpose(uwp[:, :, Din:, :], (1, 2, 0, 3)).reshape(K * H, D * H)
        bg = jnp.matmul(E, gbp, precision='highest')          # [N, 2H]
        bu = jnp.matmul(E, ubp, precision='highest')          # [N, H]
        out = run_gcgru_layer(current, init_state[layer], s_noid,
                              wx, wgh, wuh, E, bg, bu, t_block=t_block)
        hiddens.append(out[:, -1])
        current = out
    return current, hiddens


# --------------------------------------------------------------------------
# Pure-JAX reference (mirrors the PyTorch module exactly) for verification.
# --------------------------------------------------------------------------
def _cheb_gcn_ref(x, E, wp, bp, cheb_k):
    N = E.shape[0]
    A = jax.nn.softmax(
        jax.nn.relu(jnp.matmul(E, E.T, precision='highest')), axis=1)
    sup = [jnp.eye(N, dtype=jnp.float32), A]
    for _ in range(2, cheb_k):
        sup.append(2.0 * jnp.matmul(A, sup[-1], precision='highest') - sup[-2])
    S = jnp.stack(sup, axis=0)
    weights = jnp.einsum('nd,dkio->nkio', E, wp, precision='highest')
    bias = jnp.matmul(E, bp, precision='highest')
    x_g = jnp.einsum('knm,bmc->bknc', S, x, precision='highest')
    x_g = jnp.transpose(x_g, (0, 2, 1, 3))
    return jnp.einsum('bnki,nkio->bno', x_g, weights, precision='highest') + bias


def _gcgru_ref(x, h, E, gwp, gbp, uwp, ubp, cheb_k):
    H = h.shape[-1]
    z_r = jax.nn.sigmoid(
        _cheb_gcn_ref(jnp.concatenate([x, h], -1), E, gwp, gbp, cheb_k))
    z, r = z_r[..., :H], z_r[..., H:]
    cand = jnp.concatenate([x, r * h], -1)
    hh = jnp.tanh(_cheb_gcn_ref(cand, E, uwp, ubp, cheb_k))
    return z * h + (1.0 - z) * hh


def encoder_ref(x, init_state, E, params, cheb_k):
    current = x
    hiddens = []
    for layer, (gwp, gbp, uwp, ubp) in enumerate(params):
        state = init_state[layer]
        inner = []
        for t in range(x.shape[1]):
            state = _gcgru_ref(current[:, t], state, E, gwp, gbp, uwp, ubp, cheb_k)
            inner.append(state)
        current = jnp.stack(inner, axis=1)
        hiddens.append(state)
    return current, hiddens


# --------------------------------------------------------------------------
if __name__ == "__main__":
    B, T, N = 2, 8, 16
    in_dim, out_dim, cheb_k, embed_dim, num_layers = 4, 32, 3, 8, 2

    key = jax.random.PRNGKey(0)
    keys = jax.random.split(key, 2 + 4 * num_layers)

    x = jax.random.normal(keys[0], (B, T, N, in_dim), dtype=jnp.float32)
    node_embeddings = jax.random.normal(keys[1], (N, embed_dim), dtype=jnp.float32)
    init_state = jnp.zeros((num_layers, B, N, out_dim), dtype=jnp.float32)

    # Deterministic synthetic parameters (shapes follow ChebGCN.__init__).
    params = []
    ki = 2
    for layer in range(num_layers):
        Din = in_dim if layer == 0 else out_dim
        C = Din + out_dim
        gwp = 0.1 * jax.random.normal(keys[ki], (embed_dim, cheb_k, C, 2 * out_dim), jnp.float32); ki += 1
        gbp = 0.1 * jax.random.normal(keys[ki], (embed_dim, 2 * out_dim), jnp.float32); ki += 1
        uwp = 0.1 * jax.random.normal(keys[ki], (embed_dim, cheb_k, C, out_dim), jnp.float32); ki += 1
        ubp = 0.1 * jax.random.normal(keys[ki], (embed_dim, out_dim), jnp.float32); ki += 1
        params.append((gwp, gbp, uwp, ubp))

    outputs, hiddens = encoder_forward(x, init_state, node_embeddings, params,
                                       cheb_k, t_block=4)
    outputs = jax.block_until_ready(outputs)

    ref_out, ref_hid = encoder_ref(x, init_state, node_embeddings, params, cheb_k)
    assert np.allclose(np.asarray(outputs), np.asarray(ref_out), rtol=2e-2, atol=2e-2)
    for h, hr in zip(hiddens, ref_hid):
        assert np.allclose(np.asarray(h), np.asarray(hr), rtol=2e-2, atol=2e-2)

    print("KERNEL_OK")
</pallas_src>

<mosaic_0001>
module attributes {stable_mosaic.version = 11 : i64} {
  func.func @gcgru_layer_kernel(%arg0: i32, %arg1: i32, %arg2: memref<1x4x16x4xf32, #tpu.memory_space<vmem>>, %arg3: memref<1x16x32xf32, #tpu.memory_space<vmem>>, %arg4: memref<32x16xf32, #tpu.memory_space<vmem>>, %arg5: memref<12x768xf32, #tpu.memory_space<vmem>>, %arg6: memref<96x512xf32, #tpu.memory_space<vmem>>, %arg7: memref<96x256xf32, #tpu.memory_space<vmem>>, %arg8: memref<16x8xf32, #tpu.memory_space<vmem>>, %arg9: memref<16x64xf32, #tpu.memory_space<vmem>>, %arg10: memref<16x32xf32, #tpu.memory_space<vmem>>, %arg11: memref<1x4x16x32xf32, #tpu.memory_space<vmem>>, %arg12: memref<16x32xf32, #tpu.memory_space<vmem>>) attributes {dimension_semantics = [#tpu.dimension_semantics<parallel>, #tpu.dimension_semantics<arbitrary>], iteration_bounds = array<i64: 2, 2>, scalar_prefetch = 0 : i64, scratch_operands = 1 : i64, tpu.core_type = #tpu.core_type<tc>, window_params = [{transform_indices = @transform_0, window_bounds = array<i64: 1, 4, 16, 4>}, {transform_indices = @transform_1, window_bounds = array<i64: 1, 16, 32>}, {pipeline_mode = #tpu.pipeline_mode<synchronous>, transform_indices = @transform_2, window_bounds = array<i64: 32, 16>}, {pipeline_mode = #tpu.pipeline_mode<synchronous>, transform_indices = @transform_3, window_bounds = array<i64: 12, 768>}, {pipeline_mode = #tpu.pipeline_mode<synchronous>, transform_indices = @transform_4, window_bounds = array<i64: 96, 512>}, {pipeline_mode = #tpu.pipeline_mode<synchronous>, transform_indices = @transform_5, window_bounds = array<i64: 96, 256>}, {pipeline_mode = #tpu.pipeline_mode<synchronous>, transform_indices = @transform_6, window_bounds = array<i64: 16, 8>}, {pipeline_mode = #tpu.pipeline_mode<synchronous>, transform_indices = @transform_7, window_bounds = array<i64: 16, 64>}, {pipeline_mode = #tpu.pipeline_mode<synchronous>, transform_indices = @transform_8, window_bounds = array<i64: 16, 32>}, {transform_indices = @transform_9, window_bounds = array<i64: 1, 4, 16, 32>}]} {
    %c0_i32 = arith.constant 0 : i32
    %0 = arith.cmpi eq, %arg1, %c0_i32 : i32
    %1 = arith.extui %0 : i1 to i32
    %c0_i32_0 = arith.constant 0 : i32
    %2 = arith.cmpi ne, %1, %c0_i32_0 : i32
    scf.if %2 {
      %c0_74 = arith.constant 0 : index
      %c0_75 = arith.constant 0 : index
      %c0_76 = arith.constant 0 : index
      %436 = vector.load %arg3[%c0_74, %c0_75, %c0_76] : memref<1x16x32xf32, #tpu.memory_space<vmem>>, vector<1x16x32xf32>
      %437 = vector.shape_cast %436 : vector<1x16x32xf32> to vector<16x32xf32>
      %c0_77 = arith.constant 0 : index
      %c0_78 = arith.constant 0 : index
      %438 = vector.load %arg12[%c0_77, %c0_78] : memref<16x32xf32, #tpu.memory_space<vmem>>, vector<16x32xf32>
      tpu.vector_store %arg12[%c0_77, %c0_78], %437 {strides = array<i32>} : memref<16x32xf32, #tpu.memory_space<vmem>>, vector<16x32xf32>,
    } else {
    }
    %c0 = arith.constant 0 : index
    %c0_1 = arith.constant 0 : index
    %3 = vector.load %arg4[%c0, %c0_1] : memref<32x16xf32, #tpu.memory_space<vmem>>, vector<32x16xf32>
    %c0_2 = arith.constant 0 : index
    %c0_3 = arith.constant 0 : index
    %4 = vector.load %arg5[%c0_2, %c0_3] : memref<12x768xf32, #tpu.memory_space<vmem>>, vector<12x768xf32>
    %c0_4 = arith.constant 0 : index
    %c0_5 = arith.constant 0 : index
    %5 = vector.load %arg6[%c0_4, %c0_5] : memref<96x512xf32, #tpu.memory_space<vmem>>, vector<96x512xf32>
    %c0_6 = arith.constant 0 : index
    %c0_7 = arith.constant 0 : index
    %6 = vector.load %arg7[%c0_6, %c0_7] : memref<96x256xf32, #tpu.memory_space<vmem>>, vector<96x256xf32>
    %c0_8 = arith.constant 0 : index
    %c0_9 = arith.constant 0 : index
    %7 = vector.load %arg8[%c0_8, %c0_9] : memref<16x8xf32, #tpu.memory_space<vmem>>, vector<16x8xf32>
    %c0_10 = arith.constant 0 : index
    %c0_11 = arith.constant 0 : index
    %8 = vector.load %arg9[%c0_10, %c0_11] : memref<16x64xf32, #tpu.memory_space<vmem>>, vector<16x64xf32>
    %c0_12 = arith.constant 0 : index
    %c0_13 = arith.constant 0 : index
    %9 = vector.load %arg10[%c0_12, %c0_13] : memref<16x32xf32, #tpu.memory_space<vmem>>, vector<16x32xf32>
    %10 = vector.extract_strided_slice %7 {offsets = [0, 0], sizes = [16, 1], strides = [1, 1]} : vector<16x8xf32> to vector<16x1xf32>
    %11 = vector.extract_strided_slice %7 {offsets = [0, 1], sizes = [16, 1], strides = [1, 1]} : vector<16x8xf32> to vector<16x1xf32>
    %12 = vector.extract_strided_slice %7 {offsets = [0, 2], sizes = [16, 1], strides = [1, 1]} : vector<16x8xf32> to vector<16x1xf32>
    %13 = vector.extract_strided_slice %7 {offsets = [0, 3], sizes = [16, 1], strides = [1, 1]} : vector<16x8xf32> to vector<16x1xf32>
    %14 = vector.extract_strided_slice %7 {offsets = [0, 4], sizes = [16, 1], strides = [1, 1]} : vector<16x8xf32> to vector<16x1xf32>
    %15 = vector.extract_strided_slice %7 {offsets = [0, 5], sizes = [16, 1], strides = [1, 1]} : vector<16x8xf32> to vector<16x1xf32>
    %16 = vector.extract_strided_slice %7 {offsets = [0, 6], sizes = [16, 1], strides = [1, 1]} : vector<16x8xf32> to vector<16x1xf32>
    %17 = vector.extract_strided_slice %7 {offsets = [0, 7], sizes = [16, 1], strides = [1, 1]} : vector<16x8xf32> to vector<16x1xf32>
    %c0_14 = arith.constant 0 : index
    %c0_15 = arith.constant 0 : index
    %18 = vector.load %arg12[%c0_14, %c0_15] : memref<16x32xf32, #tpu.memory_space<vmem>>, vector<16x32xf32>
    %c0_i32_16 = arith.constant 0 : i32
    %c0_17 = arith.constant 0 : index
    %19 = arith.index_cast %c0_i32_16 : i32 to index
    %c0_18 = arith.constant 0 : index
    %c0_19 = arith.constant 0 : index
    %20 = vector.load %arg2[%c0_17, %19, %c0_18, %c0_19] : memref<1x4x16x4xf32, #tpu.memory_space<vmem>>, vector<1x1x16x4xf32>
    %21 = vector.shape_cast %20 : vector<1x1x16x4xf32> to vector<16x4xf32>
    %cst = arith.constant dense<0.000000e+00> : vector<32x4xf32>
    %22 = tpu.matmul %3, %21, %cst {dimension_numbers = #tpu.dot_dimension_numbers<[1], [0], [0], [1], [0, 0, 1, 1], [], []>} : vector<32x16xf32>, vector<16x4xf32>, vector<32x4xf32> -> vector<32x4xf32>
    %23 = vector.extract_strided_slice %22 {offsets = [0, 0], sizes = [16, 4], strides = [1, 1]} : vector<32x4xf32> to vector<16x4xf32>
    %24 = vector.extract_strided_slice %22 {offsets = [16, 0], sizes = [16, 4], strides = [1, 1]} : vector<32x4xf32> to vector<16x4xf32>
    %25 = tpu.concatenate %21, %23, %24 in 1 : vector<16x4xf32>, vector<16x4xf32>, vector<16x4xf32> -> vector<16x12xf32>
    %cst_20 = arith.constant dense<0.000000e+00> : vector<16x768xf32>
    %26 = tpu.matmul %25, %4, %cst_20 {dimension_numbers = #tpu.dot_dimension_numbers<[1], [0], [0], [1], [0, 0, 1, 1], [], []>} : vector<16x12xf32>, vector<12x768xf32>, vector<16x768xf32> -> vector<16x768xf32>
    %27 = vector.extract_strided_slice %26 {offsets = [0, 0], sizes = [16, 512], strides = [1, 1]} : vector<16x768xf32> to vector<16x512xf32>
    %28 = vector.extract_strided_slice %26 {offsets = [0, 512], sizes = [16, 256], strides = [1, 1]} : vector<16x768xf32> to vector<16x256xf32>
    %cst_21 = arith.constant dense<0.000000e+00> : vector<32x32xf32>
    %29 = tpu.matmul %3, %18, %cst_21 {dimension_numbers = #tpu.dot_dimension_numbers<[1], [0], [0], [1], [0, 0, 1, 1], [], []>} : vector<32x16xf32>, vector<16x32xf32>, vector<32x32xf32> -> vector<32x32xf32>
    %30 = vector.extract_strided_slice %29 {offsets = [0, 0], sizes = [16, 32], strides = [1, 1]} : vector<32x32xf32> to vector<16x32xf32>
    %31 = vector.extract_strided_slice %29 {offsets = [16, 0], sizes = [16, 32], strides = [1, 1]} : vector<32x32xf32> to vector<16x32xf32>
    %32 = tpu.concatenate %18, %30, %31 in 1 : vector<16x32xf32>, vector<16x32xf32>, vector<16x32xf32> -> vector<16x96xf32>
    %cst_22 = arith.constant dense<0.000000e+00> : vector<16x512xf32>
    %33 = tpu.matmul %32, %5, %cst_22 {dimension_numbers = #tpu.dot_dimension_numbers<[1], [0], [0], [1], [0, 0, 1, 1], [], []>} : vector<16x96xf32>, vector<96x512xf32>, vector<16x512xf32> -> vector<16x512xf32>
    %34 = arith.addf %27, %33 : vector<16x512xf32>
    %35 = vector.extract_strided_slice %34 {offsets = [0, 0], sizes = [16, 64], strides = [1, 1]} : vector<16x512xf32> to vector<16x64xf32>
    %36 = vector.broadcast %10 : vector<16x1xf32> to vector<16x64xf32>
    %37 = arith.mulf %36, %35 : vector<16x64xf32>
    %38 = vector.extract_strided_slice %34 {offsets = [0, 64], sizes = [16, 64], strides = [1, 1]} : vector<16x512xf32> to vector<16x64xf32>
    %39 = vector.broadcast %11 : vector<16x1xf32> to vector<16x64xf32>
    %40 = arith.mulf %39, %38 : vector<16x64xf32>
    %41 = arith.addf %37, %40 : vector<16x64xf32>
    %42 = vector.extract_strided_slice %34 {offsets = [0, 128], sizes = [16, 64], strides = [1, 1]} : vector<16x512xf32> to vector<16x64xf32>
    %43 = vector.broadcast %12 : vector<16x1xf32> to vector<16x64xf32>
    %44 = arith.mulf %43, %42 : vector<16x64xf32>
    %45 = arith.addf %41, %44 : vector<16x64xf32>
    %46 = vector.extract_strided_slice %34 {offsets = [0, 192], sizes = [16, 64], strides = [1, 1]} : vector<16x512xf32> to vector<16x64xf32>
    %47 = vector.broadcast %13 : vector<16x1xf32> to vector<16x64xf32>
    %48 = arith.mulf %47, %46 : vector<16x64xf32>
    %49 = arith.addf %45, %48 : vector<16x64xf32>
    %50 = vector.extract_strided_slice %34 {offsets = [0, 256], sizes = [16, 64], strides = [1, 1]} : vector<16x512xf32> to vector<16x64xf32>
    %51 = vector.broadcast %14 : vector<16x1xf32> to vector<16x64xf32>
    %52 = arith.mulf %51, %50 : vector<16x64xf32>
    %53 = arith.addf %49, %52 : vector<16x64xf32>
    %54 = vector.extract_strided_slice %34 {offsets = [0, 320], sizes = [16, 64], strides = [1, 1]} : vector<16x512xf32> to vector<16x64xf32>
    %55 = vector.broadcast %15 : vector<16x1xf32> to vector<16x64xf32>
    %56 = arith.mulf %55, %54 : vector<16x64xf32>
    %57 = arith.addf %53, %56 : vector<16x64xf32>
    %58 = vector.extract_strided_slice %34 {offsets = [0, 384], sizes = [16, 64], strides = [1, 1]} : vector<16x512xf32> to vector<16x64xf32>
    %59 = vector.broadcast %16 : vector<16x1xf32> to vector<16x64xf32>
    %60 = arith.mulf %59, %58 : vector<16x64xf32>
    %61 = arith.addf %57, %60 : vector<16x64xf32>
    %62 = vector.extract_strided_slice %34 {offsets = [0, 448], sizes = [16, 64], strides = [1, 1]} : vector<16x512xf32> to vector<16x64xf32>
    %63 = vector.broadcast %17 : vector<16x1xf32> to vector<16x64xf32>
    %64 = arith.mulf %63, %62 : vector<16x64xf32>
    %65 = arith.addf %61, %64 : vector<16x64xf32>
    %66 = arith.addf %65, %8 : vector<16x64xf32>
    %67 = arith.negf %66 : vector<16x64xf32>
    %68 = math.exp %67 : vector<16x64xf32>
    %cst_23 = arith.constant 1.000000e+00 : f32
    %69 = vector.broadcast %cst_23 : f32 to vector<16x64xf32>
    %70 = arith.addf %69, %68 : vector<16x64xf32>
    %71 = arith.divf %69, %70 : vector<16x64xf32>
    %72 = vector.extract_strided_slice %71 {offsets = [0, 0], sizes = [16, 32], strides = [1, 1]} : vector<16x64xf32> to vector<16x32xf32>
    %73 = vector.extract_strided_slice %71 {offsets = [0, 32], sizes = [16, 32], strides = [1, 1]} : vector<16x64xf32> to vector<16x32xf32>
    %74 = arith.mulf %73, %18 : vector<16x32xf32>
    %cst_24 = arith.constant dense<0.000000e+00> : vector<32x32xf32>
    %75 = tpu.matmul %3, %74, %cst_24 {dimension_numbers = #tpu.dot_dimension_numbers<[1], [0], [0], [1], [0, 0, 1, 1], [], []>} : vector<32x16xf32>, vector<16x32xf32>, vector<32x32xf32> -> vector<32x32xf32>
    %76 = vector.extract_strided_slice %75 {offsets = [0, 0], sizes = [16, 32], strides = [1, 1]} : vector<32x32xf32> to vector<16x32xf32>
    %77 = vector.extract_strided_slice %75 {offsets = [16, 0], sizes = [16, 32], strides = [1, 1]} : vector<32x32xf32> to vector<16x32xf32>
    %78 = tpu.concatenate %74, %76, %77 in 1 : vector<16x32xf32>, vector<16x32xf32>, vector<16x32xf32> -> vector<16x96xf32>
    %cst_25 = arith.constant dense<0.000000e+00> : vector<16x256xf32>
    %79 = tpu.matmul %78, %6, %cst_25 {dimension_numbers = #tpu.dot_dimension_numbers<[1], [0], [0], [1], [0, 0, 1, 1], [], []>} : vector<16x96xf32>, vector<96x256xf32>, vector<16x256xf32> -> vector<16x256xf32>
    %80 = arith.addf %28, %79 : vector<16x256xf32>
    %81 = vector.extract_strided_slice %80 {offsets = [0, 0], sizes = [16, 32], strides = [1, 1]} : vector<16x256xf32> to vector<16x32xf32>
    %82 = vector.broadcast %10 : vector<16x1xf32> to vector<16x32xf32>
    %83 = arith.mulf %82, %81 : vector<16x32xf32>
    %84 = vector.extract_strided_slice %80 {offsets = [0, 32], sizes = [16, 32], strides = [1, 1]} : vector<16x256xf32> to vector<16x32xf32>
    %85 = vector.broadcast %11 : vector<16x1xf32> to vector<16x32xf32>
    %86 = arith.mulf %85, %84 : vector<16x32xf32>
    %87 = arith.addf %83, %86 : vector<16x32xf32>
    %88 = vector.extract_strided_slice %80 {offsets = [0, 64], sizes = [16, 32], strides = [1, 1]} : vector<16x256xf32> to vector<16x32xf32>
    %89 = vector.broadcast %12 : vector<16x1xf32> to vector<16x32xf32>
    %90 = arith.mulf %89, %88 : vector<16x32xf32>
    %91 = arith.addf %87, %90 : vector<16x32xf32>
    %92 = vector.extract_strided_slice %80 {offsets = [0, 96], sizes = [16, 32], strides = [1, 1]} : vector<16x256xf32> to vector<16x32xf32>
    %93 = vector.broadcast %13 : vector<16x1xf32> to vector<16x32xf32>
    %94 = arith.mulf %93, %92 : vector<16x32xf32>
    %95 = arith.addf %91, %94 : vector<16x32xf32>
    %96 = vector.extract_strided_slice %80 {offsets = [0, 128], sizes = [16, 32], strides = [1, 1]} : vector<16x256xf32> to vector<16x32xf32>
    %97 = vector.broadcast %14 : vector<16x1xf32> to vector<16x32xf32>
    %98 = arith.mulf %97, %96 : vector<16x32xf32>
    %99 = arith.addf %95, %98 : vector<16x32xf32>
    %100 = vector.extract_strided_slice %80 {offsets = [0, 160], sizes = [16, 32], strides = [1, 1]} : vector<16x256xf32> to vector<16x32xf32>
    %101 = vector.broadcast %15 : vector<16x1xf32> to vector<16x32xf32>
    %102 = arith.mulf %101, %100 : vector<16x32xf32>
    %103 = arith.addf %99, %102 : vector<16x32xf32>
    %104 = vector.extract_strided_slice %80 {offsets = [0, 192], sizes = [16, 32], strides = [1, 1]} : vector<16x256xf32> to vector<16x32xf32>
    %105 = vector.broadcast %16 : vector<16x1xf32> to vector<16x32xf32>
    %106 = arith.mulf %105, %104 : vector<16x32xf32>
    %107 = arith.addf %103, %106 : vector<16x32xf32>
    %108 = vector.extract_strided_slice %80 {offsets = [0, 224], sizes = [16, 32], strides = [1, 1]} : vector<16x256xf32> to vector<16x32xf32>
    %109 = vector.broadcast %17 : vector<16x1xf32> to vector<16x32xf32>
    %110 = arith.mulf %109, %108 : vector<16x32xf32>
    %111 = arith.addf %107, %110 : vector<16x32xf32>
    %112 = arith.addf %111, %9 : vector<16x32xf32>
    %113 = math.tanh %112 : vector<16x32xf32>
    %114 = arith.mulf %72, %18 : vector<16x32xf32>
    %cst_26 = arith.constant 1.000000e+00 : f32
    %115 = vector.broadcast %cst_26 : f32 to vector<16x32xf32>
    %116 = arith.subf %115, %72 : vector<16x32xf32>
    %117 = arith.mulf %116, %113 : vector<16x32xf32>
    %118 = arith.addf %114, %117 : vector<16x32xf32>
    %c0_27 = arith.constant 0 : index
    %119 = arith.index_cast %c0_i32_16 : i32 to index
    %c0_28 = arith.constant 0 : index
    %c0_29 = arith.constant 0 : index
    %120 = vector.load %arg11[%c0_27, %119, %c0_28, %c0_29] : memref<1x4x16x32xf32, #tpu.memory_space<vmem>>, vector<1x1x16x32xf32>
    %121 = vector.shape_cast %120 : vector<1x1x16x32xf32> to vector<16x32xf32>
    %122 = vector.shape_cast %118 : vector<16x32xf32> to vector<1x1x16x32xf32>
    tpu.vector_store %arg11[%c0_27, %119, %c0_28, %c0_29], %122 {strides = array<i32>} : memref<1x4x16x32xf32, #tpu.memory_space<vmem>>, vector<1x1x16x32xf32>,
    %c1_i32 = arith.constant 1 : i32
    %c0_30 = arith.constant 0 : index
    %123 = arith.index_cast %c1_i32 : i32 to index
    %c0_31 = arith.constant 0 : index
    %c0_32 = arith.constant 0 : index
    %124 = vector.load %arg2[%c0_30, %123, %c0_31, %c0_32] : memref<1x4x16x4xf32, #tpu.memory_space<vmem>>, vector<1x1x16x4xf32>
    %125 = vector.shape_cast %124 : vector<1x1x16x4xf32> to vector<16x4xf32>
    %cst_33 = arith.constant dense<0.000000e+00> : vector<32x4xf32>
    %126 = tpu.matmul %3, %125, %cst_33 {dimension_numbers = #tpu.dot_dimension_numbers<[1], [0], [0], [1], [0, 0, 1, 1], [], []>} : vector<32x16xf32>, vector<16x4xf32>, vector<32x4xf32> -> vector<32x4xf32>
    %127 = vector.extract_strided_slice %126 {offsets = [0, 0], sizes = [16, 4], strides = [1, 1]} : vector<32x4xf32> to vector<16x4xf32>
    %128 = vector.extract_strided_slice %126 {offsets = [16, 0], sizes = [16, 4], strides = [1, 1]} : vector<32x4xf32> to vector<16x4xf32>
    %129 = tpu.concatenate %125, %127, %128 in 1 : vector<16x4xf32>, vector<16x4xf32>, vector<16x4xf32> -> vector<16x12xf32>
    %cst_34 = arith.constant dense<0.000000e+00> : vector<16x768xf32>
    %130 = tpu.matmul %129, %4, %cst_34 {dimension_numbers = #tpu.dot_dimension_numbers<[1], [0], [0], [1], [0, 0, 1, 1], [], []>} : vector<16x12xf32>, vector<12x768xf32>, vector<16x768xf32> -> vector<16x768xf32>
    %131 = vector.extract_strided_slice %130 {offsets = [0, 0], sizes = [16, 512], strides = [1, 1]} : vector<16x768xf32> to vector<16x512xf32>
    %132 = vector.extract_strided_slice %130 {offsets = [0, 512], sizes = [16, 256], strides = [1, 1]} : vector<16x768xf32> to vector<16x256xf32>
    %cst_35 = arith.constant dense<0.000000e+00> : vector<32x32xf32>
    %133 = tpu.matmul %3, %118, %cst_35 {dimension_numbers = #tpu.dot_dimension_numbers<[1], [0], [0], [1], [0, 0, 1, 1], [], []>} : vector<32x16xf32>, vector<16x32xf32>, vector<32x32xf32> -> vector<32x32xf32>
    %134 = vector.extract_strided_slice %133 {offsets = [0, 0], sizes = [16, 32], strides = [1, 1]} : vector<32x32xf32> to vector<16x32xf32>
    %135 = vector.extract_strided_slice %133 {offsets = [16, 0], sizes = [16, 32], strides = [1, 1]} : vector<32x32xf32> to vector<16x32xf32>
    %136 = tpu.concatenate %118, %134, %135 in 1 : vector<16x32xf32>, vector<16x32xf32>, vector<16x32xf32> -> vector<16x96xf32>
    %cst_36 = arith.constant dense<0.000000e+00> : vector<16x512xf32>
    %137 = tpu.matmul %136, %5, %cst_36 {dimension_numbers = #tpu.dot_dimension_numbers<[1], [0], [0], [1], [0, 0, 1, 1], [], []>} : vector<16x96xf32>, vector<96x512xf32>, vector<16x512xf32> -> vector<16x512xf32>
    %138 = arith.addf %131, %137 : vector<16x512xf32>
    %139 = vector.extract_strided_slice %138 {offsets = [0, 0], sizes = [16, 64], strides = [1, 1]} : vector<16x512xf32> to vector<16x64xf32>
    %140 = vector.broadcast %10 : vector<16x1xf32> to vector<16x64xf32>
    %141 = arith.mulf %140, %139 : vector<16x64xf32>
    %142 = vector.extract_strided_slice %138 {offsets = [0, 64], sizes = [16, 64], strides = [1, 1]} : vector<16x512xf32> to vector<16x64xf32>
    %143 = vector.broadcast %11 : vector<16x1xf32> to vector<16x64xf32>
    %144 = arith.mulf %143, %142 : vector<16x64xf32>
    %145 = arith.addf %141, %144 : vector<16x64xf32>
    %146 = vector.extract_strided_slice %138 {offsets = [0, 128], sizes = [16, 64], strides = [1, 1]} : vector<16x512xf32> to vector<16x64xf32>
    %147 = vector.broadcast %12 : vector<16x1xf32> to vector<16x64xf32>
    %148 = arith.mulf %147, %146 : vector<16x64xf32>
    %149 = arith.addf %145, %148 : vector<16x64xf32>
    %150 = vector.extract_strided_slice %138 {offsets = [0, 192], sizes = [16, 64], strides = [1, 1]} : vector<16x512xf32> to vector<16x64xf32>
    %151 = vector.broadcast %13 : vector<16x1xf32> to vector<16x64xf32>
    %152 = arith.mulf %151, %150 : vector<16x64xf32>
    %153 = arith.addf %149, %152 : vector<16x64xf32>
    %154 = vector.extract_strided_slice %138 {offsets = [0, 256], sizes = [16, 64], strides = [1, 1]} : vector<16x512xf32> to vector<16x64xf32>
    %155 = vector.broadcast %14 : vector<16x1xf32> to vector<16x64xf32>
    %156 = arith.mulf %155, %154 : vector<16x64xf32>
    %157 = arith.addf %153, %156 : vector<16x64xf32>
    %158 = vector.extract_strided_slice %138 {offsets = [0, 320], sizes = [16, 64], strides = [1, 1]} : vector<16x512xf32> to vector<16x64xf32>
    %159 = vector.broadcast %15 : vector<16x1xf32> to vector<16x64xf32>
    %160 = arith.mulf %159, %158 : vector<16x64xf32>
    %161 = arith.addf %157, %160 : vector<16x64xf32>
    %162 = vector.extract_strided_slice %138 {offsets = [0, 384], sizes = [16, 64], strides = [1, 1]} : vector<16x512xf32> to vector<16x64xf32>
    %163 = vector.broadcast %16 : vector<16x1xf32> to vector<16x64xf32>
    %164 = arith.mulf %163, %162 : vector<16x64xf32>
    %165 = arith.addf %161, %164 : vector<16x64xf32>
    %166 = vector.extract_strided_slice %138 {offsets = [0, 448], sizes = [16, 64], strides = [1, 1]} : vector<16x512xf32> to vector<16x64xf32>
    %167 = vector.broadcast %17 : vector<16x1xf32> to vector<16x64xf32>
    %168 = arith.mulf %167, %166 : vector<16x64xf32>
    %169 = arith.addf %165, %168 : vector<16x64xf32>
    %170 = arith.addf %169, %8 : vector<16x64xf32>
    %171 = arith.negf %170 : vector<16x64xf32>
    %172 = math.exp %171 : vector<16x64xf32>
    %cst_37 = arith.constant 1.000000e+00 : f32
    %173 = vector.broadcast %cst_37 : f32 to vector<16x64xf32>
    %174 = arith.addf %173, %172 : vector<16x64xf32>
    %175 = arith.divf %173, %174 : vector<16x64xf32>
    %176 = vector.extract_strided_slice %175 {offsets = [0, 0], sizes = [16, 32], strides = [1, 1]} : vector<16x64xf32> to vector<16x32xf32>
    %177 = vector.extract_strided_slice %175 {offsets = [0, 32], sizes = [16, 32], strides = [1, 1]} : vector<16x64xf32> to vector<16x32xf32>
    %178 = arith.mulf %177, %118 : vector<16x32xf32>
    %cst_38 = arith.constant dense<0.000000e+00> : vector<32x32xf32>
    %179 = tpu.matmul %3, %178, %cst_38 {dimension_numbers = #tpu.dot_dimension_numbers<[1], [0], [0], [1], [0, 0, 1, 1], [], []>} : vector<32x16xf32>, vector<16x32xf32>, vector<32x32xf32> -> vector<32x32xf32>
    %180 = vector.extract_strided_slice %179 {offsets = [0, 0], sizes = [16, 32], strides = [1, 1]} : vector<32x32xf32> to vector<16x32xf32>
    %181 = vector.extract_strided_slice %179 {offsets = [16, 0], sizes = [16, 32], strides = [1, 1]} : vector<32x32xf32> to vector<16x32xf32>
    %182 = tpu.concatenate %178, %180, %181 in 1 : vector<16x32xf32>, vector<16x32xf32>, vector<16x32xf32> -> vector<16x96xf32>
    %cst_39 = arith.constant dense<0.000000e+00> : vector<16x256xf32>
    %183 = tpu.matmul %182, %6, %cst_39 {dimension_numbers = #tpu.dot_dimension_numbers<[1], [0], [0], [1], [0, 0, 1, 1], [], []>} : vector<16x96xf32>, vector<96x256xf32>, vector<16x256xf32> -> vector<16x256xf32>
    %184 = arith.addf %132, %183 : vector<16x256xf32>
    %185 = vector.extract_strided_slice %184 {offsets = [0, 0], sizes = [16, 32], strides = [1, 1]} : vector<16x256xf32> to vector<16x32xf32>
    %186 = vector.broadcast %10 : vector<16x1xf32> to vector<16x32xf32>
    %187 = arith.mulf %186, %185 : vector<16x32xf32>
    %188 = vector.extract_strided_slice %184 {offsets = [0, 32], sizes = [16, 32], strides = [1, 1]} : vector<16x256xf32> to vector<16x32xf32>
    %189 = vector.broadcast %11 : vector<16x1xf32> to vector<16x32xf32>
    %190 = arith.mulf %189, %188 : vector<16x32xf32>
    %191 = arith.addf %187, %190 : vector<16x32xf32>
    %192 = vector.extract_strided_slice %184 {offsets = [0, 64], sizes = [16, 32], strides = [1, 1]} : vector<16x256xf32> to vector<16x32xf32>
    %193 = vector.broadcast %12 : vector<16x1xf32> to vector<16x32xf32>
    %194 = arith.mulf %193, %192 : vector<16x32xf32>
    %195 = arith.addf %191, %194 : vector<16x32xf32>
    %196 = vector.extract_strided_slice %184 {offsets = [0, 96], sizes = [16, 32], strides = [1, 1]} : vector<16x256xf32> to vector<16x32xf32>
    %197 = vector.broadcast %13 : vector<16x1xf32> to vector<16x32xf32>
    %198 = arith.mulf %197, %196 : vector<16x32xf32>
    %199 = arith.addf %195, %198 : vector<16x32xf32>
    %200 = vector.extract_strided_slice %184 {offsets = [0, 128], sizes = [16, 32], strides = [1, 1]} : vector<16x256xf32> to vector<16x32xf32>
    %201 = vector.broadcast %14 : vector<16x1xf32> to vector<16x32xf32>
    %202 = arith.mulf %201, %200 : vector<16x32xf32>
    %203 = arith.addf %199, %202 : vector<16x32xf32>
    %204 = vector.extract_strided_slice %184 {offsets = [0, 160], sizes = [16, 32], strides = [1, 1]} : vector<16x256xf32> to vector<16x32xf32>
    %205 = vector.broadcast %15 : vector<16x1xf32> to vector<16x32xf32>
    %206 = arith.mulf %205, %204 : vector<16x32xf32>
    %207 = arith.addf %203, %206 : vector<16x32xf32>
    %208 = vector.extract_strided_slice %184 {offsets = [0, 192], sizes = [16, 32], strides = [1, 1]} : vector<16x256xf32> to vector<16x32xf32>
    %209 = vector.broadcast %16 : vector<16x1xf32> to vector<16x32xf32>
    %210 = arith.mulf %209, %208 : vector<16x32xf32>
    %211 = arith.addf %207, %210 : vector<16x32xf32>
    %212 = vector.extract_strided_slice %184 {offsets = [0, 224], sizes = [16, 32], strides = [1, 1]} : vector<16x256xf32> to vector<16x32xf32>
    %213 = vector.broadcast %17 : vector<16x1xf32> to vector<16x32xf32>
    %214 = arith.mulf %213, %212 : vector<16x32xf32>
    %215 = arith.addf %211, %214 : vector<16x32xf32>
    %216 = arith.addf %215, %9 : vector<16x32xf32>
    %217 = math.tanh %216 : vector<16x32xf32>
    %218 = arith.mulf %176, %118 : vector<16x32xf32>
    %cst_40 = arith.constant 1.000000e+00 : f32
    %219 = vector.broadcast %cst_40 : f32 to vector<16x32xf32>
    %220 = arith.subf %219, %176 : vector<16x32xf32>
    %221 = arith.mulf %220, %217 : vector<16x32xf32>
    %222 = arith.addf %218, %221 : vector<16x32xf32>
    %c0_41 = arith.constant 0 : index
    %223 = arith.index_cast %c1_i32 : i32 to index
    %c0_42 = arith.constant 0 : index
    %c0_43 = arith.constant 0 : index
    %224 = vector.load %arg11[%c0_41, %223, %c0_42, %c0_43] : memref<1x4x16x32xf32, #tpu.memory_space<vmem>>, vector<1x1x16x32xf32>
    %225 = vector.shape_cast %224 : vector<1x1x16x32xf32> to vector<16x32xf32>
    %226 = vector.shape_cast %222 : vector<16x32xf32> to vector<1x1x16x32xf32>
    tpu.vector_store %arg11[%c0_41, %223, %c0_42, %c0_43], %226 {strides = array<i32>} : memref<1x4x16x32xf32, #tpu.memory_space<vmem>>, vector<1x1x16x32xf32>,
    %c2_i32 = arith.constant 2 : i32
    %c0_44 = arith.constant 0 : index
    %227 = arith.index_cast %c2_i32 : i32 to index
    %c0_45 = arith.constant 0 : index
    %c0_46 = arith.constant 0 : index
    %228 = vector.load %arg2[%c0_44, %227, %c0_45, %c0_46] : memref<1x4x16x4xf32, #tpu.memory_space<vmem>>, vector<1x1x16x4xf32>
    %229 = vector.shape_cast %228 : vector<1x1x16x4xf32> to vector<16x4xf32>
    %cst_47 = arith.constant dense<0.000000e+00> : vector<32x4xf32>
    %230 = tpu.matmul %3, %229, %cst_47 {dimension_numbers = #tpu.dot_dimension_numbers<[1], [0], [0], [1], [0, 0, 1, 1], [], []>} : vector<32x16xf32>, vector<16x4xf32>, vector<32x4xf32> -> vector<32x4xf32>
    %231 = vector.extract_strided_slice %230 {offsets = [0, 0], sizes = [16, 4], strides = [1, 1]} : vector<32x4xf32> to vector<16x4xf32>
    %232 = vector.extract_strided_slice %230 {offsets = [16, 0], sizes = [16, 4], strides = [1, 1]} : vector<32x4xf32> to vector<16x4xf32>
    %233 = tpu.concatenate %229, %231, %232 in 1 : vector<16x4xf32>, vector<16x4xf32>, vector<16x4xf32> -> vector<16x12xf32>
    %cst_48 = arith.constant dense<0.000000e+00> : vector<16x768xf32>
    %234 = tpu.matmul %233, %4, %cst_48 {dimension_numbers = #tpu.dot_dimension_numbers<[1], [0], [0], [1], [0, 0, 1, 1], [], []>} : vector<16x12xf32>, vector<12x768xf32>, vector<16x768xf32> -> vector<16x768xf32>
    %235 = vector.extract_strided_slice %234 {offsets = [0, 0], sizes = [16, 512], strides = [1, 1]} : vector<16x768xf32> to vector<16x512xf32>
    %236 = vector.extract_strided_slice %234 {offsets = [0, 512], sizes = [16, 256], strides = [1, 1]} : vector<16x768xf32> to vector<16x256xf32>
    %cst_49 = arith.constant dense<0.000000e+00> : vector<32x32xf32>
    %237 = tpu.matmul %3, %222, %cst_49 {dimension_numbers = #tpu.dot_dimension_numbers<[1], [0], [0], [1], [0, 0, 1, 1], [], []>} : vector<32x16xf32>, vector<16x32xf32>, vector<32x32xf32> -> vector<32x32xf32>
    %238 = vector.extract_strided_slice %237 {offsets = [0, 0], sizes = [16, 32], strides = [1, 1]} : vector<32x32xf32> to vector<16x32xf32>
    %239 = vector.extract_strided_slice %237 {offsets = [16, 0], sizes = [16, 32], strides = [1, 1]} : vector<32x32xf32> to vector<16x32xf32>
    %240 = tpu.concatenate %222, %238, %239 in 1 : vector<16x32xf32>, vector<16x32xf32>, vector<16x32xf32> -> vector<16x96xf32>
    %cst_50 = arith.constant dense<0.000000e+00> : vector<16x512xf32>
    %241 = tpu.matmul %240, %5, %cst_50 {dimension_numbers = #tpu.dot_dimension_numbers<[1], [0], [0], [1], [0, 0, 1, 1], [], []>} : vector<16x96xf32>, vector<96x512xf32>, vector<16x512xf32> -> vector<16x512xf32>
    %242 = arith.addf %235, %241 : vector<16x512xf32>
    %243 = vector.extract_strided_slice %242 {offsets = [0, 0], sizes = [16, 64], strides = [1, 1]} : vector<16x512xf32> to vector<16x64xf32>
    %244 = vector.broadcast %10 : vector<16x1xf32> to vector<16x64xf32>
    %245 = arith.mulf %244, %243 : vector<16x64xf32>
    %246 = vector.extract_strided_slice %242 {offsets = [0, 64], sizes = [16, 64], strides = [1, 1]} : vector<16x512xf32> to vector<16x64xf32>
    %247 = vector.broadcast %11 : vector<16x1xf32> to vector<16x64xf32>
    %248 = arith.mulf %247, %246 : vector<16x64xf32>
    %249 = arith.addf %245, %248 : vector<16x64xf32>
    %250 = vector.extract_strided_slice %242 {offsets = [0, 128], sizes = [16, 64], strides = [1, 1]} : vector<16x512xf32> to vector<16x64xf32>
    %251 = vector.broadcast %12 : vector<16x1xf32> to vector<16x64xf32>
    %252 = arith.mulf %251, %250 : vector<16x64xf32>
    %253 = arith.addf %249, %252 : vector<16x64xf32>
    %254 = vector.extract_strided_slice %242 {offsets = [0, 192], sizes = [16, 64], strides = [1, 1]} : vector<16x512xf32> to vector<16x64xf32>
    %255 = vector.broadcast %13 : vector<16x1xf32> to vector<16x64xf32>
    %256 = arith.mulf %255, %254 : vector<16x64xf32>
    %257 = arith.addf %253, %256 : vector<16x64xf32>
    %258 = vector.extract_strided_slice %242 {offsets = [0, 256], sizes = [16, 64], strides = [1, 1]} : vector<16x512xf32> to vector<16x64xf32>
    %259 = vector.broadcast %14 : vector<16x1xf32> to vector<16x64xf32>
    %260 = arith.mulf %259, %258 : vector<16x64xf32>
    %261 = arith.addf %257, %260 : vector<16x64xf32>
    %262 = vector.extract_strided_slice %242 {offsets = [0, 320], sizes = [16, 64], strides = [1, 1]} : vector<16x512xf32> to vector<16x64xf32>
    %263 = vector.broadcast %15 : vector<16x1xf32> to vector<16x64xf32>
    %264 = arith.mulf %263, %262 : vector<16x64xf32>
    %265 = arith.addf %261, %264 : vector<16x64xf32>
    %266 = vector.extract_strided_slice %242 {offsets = [0, 384], sizes = [16, 64], strides = [1, 1]} : vector<16x512xf32> to vector<16x64xf32>
    %267 = vector.broadcast %16 : vector<16x1xf32> to vector<16x64xf32>
    %268 = arith.mulf %267, %266 : vector<16x64xf32>
    %269 = arith.addf %265, %268 : vector<16x64xf32>
    %270 = vector.extract_strided_slice %242 {offsets = [0, 448], sizes = [16, 64], strides = [1, 1]} : vector<16x512xf32> to vector<16x64xf32>
    %271 = vector.broadcast %17 : vector<16x1xf32> to vector<16x64xf32>
    %272 = arith.mulf %271, %270 : vector<16x64xf32>
    %273 = arith.addf %269, %272 : vector<16x64xf32>
    %274 = arith.addf %273, %8 : vector<16x64xf32>
    %275 = arith.negf %274 : vector<16x64xf32>
    %276 = math.exp %275 : vector<16x64xf32>
    %cst_51 = arith.constant 1.000000e+00 : f32
    %277 = vector.broadcast %cst_51 : f32 to vector<16x64xf32>
    %278 = arith.addf %277, %276 : vector<16x64xf32>
    %279 = arith.divf %277, %278 : vector<16x64xf32>
    %280 = vector.extract_strided_slice %279 {offsets = [0, 0], sizes = [16, 32], strides = [1, 1]} : vector<16x64xf32> to vector<16x32xf32>
    %281 = vector.extract_strided_slice %279 {offsets = [0, 32], sizes = [16, 32], strides = [1, 1]} : vector<16x64xf32> to vector<16x32xf32>
    %282 = arith.mulf %281, %222 : vector<16x32xf32>
    %cst_52 = arith.constant dense<0.000000e+00> : vector<32x32xf32>
    %283 = tpu.matmul %3, %282, %cst_52 {dimension_numbers = #tpu.dot_dimension_numbers<[1], [0], [0], [1], [0, 0, 1, 1], [], []>} : vector<32x16xf32>, vector<16x32xf32>, vector<32x32xf32> -> vector<32x32xf32>
    %284 = vector.extract_strided_slice %283 {offsets = [0, 0], sizes = [16, 32], strides = [1, 1]} : vector<32x32xf32> to vector<16x32xf32>
    %285 = vector.extract_strided_slice %283 {offsets = [16, 0], sizes = [16, 32], strides = [1, 1]} : vector<32x32xf32> to vector<16x32xf32>
    %286 = tpu.concatenate %282, %284, %285 in 1 : vector<16x32xf32>, vector<16x32xf32>, vector<16x32xf32> -> vector<16x96xf32>
    %cst_53 = arith.constant dense<0.000000e+00> : vector<16x256xf32>
    %287 = tpu.matmul %286, %6, %cst_53 {dimension_numbers = #tpu.dot_dimension_numbers<[1], [0], [0], [1], [0, 0, 1, 1], [], []>} : vector<16x96xf32>, vector<96x256xf32>, vector<16x256xf32> -> vector<16x256xf32>
    %288 = arith.addf %236, %287 : vector<16x256xf32>
    %289 = vector.extract_strided_slice %288 {offsets = [0, 0], sizes = [16, 32], strides = [1, 1]} : vector<16x256xf32> to vector<16x32xf32>
    %290 = vector.broadcast %10 : vector<16x1xf32> to vector<16x32xf32>
    %291 = arith.mulf %290, %289 : vector<16x32xf32>
    %292 = vector.extract_strided_slice %288 {offsets = [0, 32], sizes = [16, 32], strides = [1, 1]} : vector<16x256xf32> to vector<16x32xf32>
    %293 = vector.broadcast %11 : vector<16x1xf32> to vector<16x32xf32>
    %294 = arith.mulf %293, %292 : vector<16x32xf32>
    %295 = arith.addf %291, %294 : vector<16x32xf32>
    %296 = vector.extract_strided_slice %288 {offsets = [0, 64], sizes = [16, 32], strides = [1, 1]} : vector<16x256xf32> to vector<16x32xf32>
    %297 = vector.broadcast %12 : vector<16x1xf32> to vector<16x32xf32>
    %298 = arith.mulf %297, %296 : vector<16x32xf32>
    %299 = arith.addf %295, %298 : vector<16x32xf32>
    %300 = vector.extract_strided_slice %288 {offsets = [0, 96], sizes = [16, 32], strides = [1, 1]} : vector<16x256xf32> to vector<16x32xf32>
    %301 = vector.broadcast %13 : vector<16x1xf32> to vector<16x32xf32>
    %302 = arith.mulf %301, %300 : vector<16x32xf32>
    %303 = arith.addf %299, %302 : vector<16x32xf32>
    %304 = vector.extract_strided_slice %288 {offsets = [0, 128], sizes = [16, 32], strides = [1, 1]} : vector<16x256xf32> to vector<16x32xf32>
    %305 = vector.broadcast %14 : vector<16x1xf32> to vector<16x32xf32>
    %306 = arith.mulf %305, %304 : vector<16x32xf32>
    %307 = arith.addf %303, %306 : vector<16x32xf32>
    %308 = vector.extract_strided_slice %288 {offsets = [0, 160], sizes = [16, 32], strides = [1, 1]} : vector<16x256xf32> to vector<16x32xf32>
    %309 = vector.broadcast %15 : vector<16x1xf32> to vector<16x32xf32>
    %310 = arith.mulf %309, %308 : vector<16x32xf32>
    %311 = arith.addf %307, %310 : vector<16x32xf32>
    %312 = vector.extract_strided_slice %288 {offsets = [0, 192], sizes = [16, 32], strides = [1, 1]} : vector<16x256xf32> to vector<16x32xf32>
    %313 = vector.broadcast %16 : vector<16x1xf32> to vector<16x32xf32>
    %314 = arith.mulf %313, %312 : vector<16x32xf32>
    %315 = arith.addf %311, %314 : vector<16x32xf32>
    %316 = vector.extract_strided_slice %288 {offsets = [0, 224], sizes = [16, 32], strides = [1, 1]} : vector<16x256xf32> to vector<16x32xf32>
    %317 = vector.broadcast %17 : vector<16x1xf32> to vector<16x32xf32>
    %318 = arith.mulf %317, %316 : vector<16x32xf32>
    %319 = arith.addf %315, %318 : vector<16x32xf32>
    %320 = arith.addf %319, %9 : vector<16x32xf32>
    %321 = math.tanh %320 : vector<16x32xf32>
    %322 = arith.mulf %280, %222 : vector<16x32xf32>
    %cst_54 = arith.constant 1.000000e+00 : f32
    %323 = vector.broadcast %cst_54 : f32 to vector<16x32xf32>
    %324 = arith.subf %323, %280 : vector<16x32xf32>
    %325 = arith.mulf %324, %321 : vector<16x32xf32>
    %326 = arith.addf %322, %325 : vector<16x32xf32>
    %c0_55 = arith.constant 0 : index
    %327 = arith.index_cast %c2_i32 : i32 to index
    %c0_56 = arith.constant 0 : index
    %c0_57 = arith.constant 0 : index
    %328 = vector.load %arg11[%c0_55, %327, %c0_56, %c0_57] : memref<1x4x16x32xf32, #tpu.memory_space<vmem>>, vector<1x1x16x32xf32>
    %329 = vector.shape_cast %328 : vector<1x1x16x32xf32> to vector<16x32xf32>
    %330 = vector.shape_cast %326 : vector<16x32xf32> to vector<1x1x16x32xf32>
    tpu.vector_store %arg11[%c0_55, %327, %c0_56, %c0_57], %330 {strides = array<i32>} : memref<1x4x16x32xf32, #tpu.memory_space<vmem>>, vector<1x1x16x32xf32>,
    %c3_i32 = arith.constant 3 : i32
    %c0_58 = arith.constant 0 : index
    %331 = arith.index_cast %c3_i32 : i32 to index
    %c0_59 = arith.constant 0 : index
    %c0_60 = arith.constant 0 : index
    %332 = vector.load %arg2[%c0_58, %331, %c0_59, %c0_60] : memref<1x4x16x4xf32, #tpu.memory_space<vmem>>, vector<1x1x16x4xf32>
    %333 = vector.shape_cast %332 : vector<1x1x16x4xf32> to vector<16x4xf32>
    %cst_61 = arith.constant dense<0.000000e+00> : vector<32x4xf32>
    %334 = tpu.matmul %3, %333, %cst_61 {dimension_numbers = #tpu.dot_dimension_numbers<[1], [0], [0], [1], [0, 0, 1, 1], [], []>} : vector<32x16xf32>, vector<16x4xf32>, vector<32x4xf32> -> vector<32x4xf32>
    %335 = vector.extract_strided_slice %334 {offsets = [0, 0], sizes = [16, 4], strides = [1, 1]} : vector<32x4xf32> to vector<16x4xf32>
    %336 = vector.extract_strided_slice %334 {offsets = [16, 0], sizes = [16, 4], strides = [1, 1]} : vector<32x4xf32> to vector<16x4xf32>
    %337 = tpu.concatenate %333, %335, %336 in 1 : vector<16x4xf32>, vector<16x4xf32>, vector<16x4xf32> -> vector<16x12xf32>
    %cst_62 = arith.constant dense<0.000000e+00> : vector<16x768xf32>
    %338 = tpu.matmul %337, %4, %cst_62 {dimension_numbers = #tpu.dot_dimension_numbers<[1], [0], [0], [1], [0, 0, 1, 1], [], []>} : vector<16x12xf32>, vector<12x768xf32>, vector<16x768xf32> -> vector<16x768xf32>
    %339 = vector.extract_strided_slice %338 {offsets = [0, 0], sizes = [16, 512], strides = [1, 1]} : vector<16x768xf32> to vector<16x512xf32>
    %340 = vector.extract_strided_slice %338 {offsets = [0, 512], sizes = [16, 256], strides = [1, 1]} : vector<16x768xf32> to vector<16x256xf32>
    %cst_63 = arith.constant dense<0.000000e+00> : vector<32x32xf32>
    %341 = tpu.matmul %3, %326, %cst_63 {dimension_numbers = #tpu.dot_dimension_numbers<[1], [0], [0], [1], [0, 0, 1, 1], [], []>} : vector<32x16xf32>, vector<16x32xf32>, vector<32x32xf32> -> vector<32x32xf32>
    %342 = vector.extract_strided_slice %341 {offsets = [0, 0], sizes = [16, 32], strides = [1, 1]} : vector<32x32xf32> to vector<16x32xf32>
    %343 = vector.extract_strided_slice %341 {offsets = [16, 0], sizes = [16, 32], strides = [1, 1]} : vector<32x32xf32> to vector<16x32xf32>
    %344 = tpu.concatenate %326, %342, %343 in 1 : vector<16x32xf32>, vector<16x32xf32>, vector<16x32xf32> -> vector<16x96xf32>
    %cst_64 = arith.constant dense<0.000000e+00> : vector<16x512xf32>
    %345 = tpu.matmul %344, %5, %cst_64 {dimension_numbers = #tpu.dot_dimension_numbers<[1], [0], [0], [1], [0, 0, 1, 1], [], []>} : vector<16x96xf32>, vector<96x512xf32>, vector<16x512xf32> -> vector<16x512xf32>
    %346 = arith.addf %339, %345 : vector<16x512xf32>
    %347 = vector.extract_strided_slice %346 {offsets = [0, 0], sizes = [16, 64], strides = [1, 1]} : vector<16x512xf32> to vector<16x64xf32>
    %348 = vector.broadcast %10 : vector<16x1xf32> to vector<16x64xf32>
    %349 = arith.mulf %348, %347 : vector<16x64xf32>
    %350 = vector.extract_strided_slice %346 {offsets = [0, 64], sizes = [16, 64], strides = [1, 1]} : vector<16x512xf32> to vector<16x64xf32>
    %351 = vector.broadcast %11 : vector<16x1xf32> to vector<16x64xf32>
    %352 = arith.mulf %351, %350 : vector<16x64xf32>
    %353 = arith.addf %349, %352 : vector<16x64xf32>
    %354 = vector.extract_strided_slice %346 {offsets = [0, 128], sizes = [16, 64], strides = [1, 1]} : vector<16x512xf32> to vector<16x64xf32>
    %355 = vector.broadcast %12 : vector<16x1xf32> to vector<16x64xf32>
    %356 = arith.mulf %355, %354 : vector<16x64xf32>
    %357 = arith.addf %353, %356 : vector<16x64xf32>
    %358 = vector.extract_strided_slice %346 {offsets = [0, 192], sizes = [16, 64], strides = [1, 1]} : vector<16x512xf32> to vector<16x64xf32>
    %359 = vector.broadcast %13 : vector<16x1xf32> to vector<16x64xf32>
    %360 = arith.mulf %359, %358 : vector<16x64xf32>
    %361 = arith.addf %357, %360 : vector<16x64xf32>
    %362 = vector.extract_strided_slice %346 {offsets = [0, 256], sizes = [16, 64], strides = [1, 1]} : vector<16x512xf32> to vector<16x64xf32>
    %363 = vector.broadcast %14 : vector<16x1xf32> to vector<16x64xf32>
    %364 = arith.mulf %363, %362 : vector<16x64xf32>
    %365 = arith.addf %361, %364 : vector<16x64xf32>
    %366 = vector.extract_strided_slice %346 {offsets = [0, 320], sizes = [16, 64], strides = [1, 1]} : vector<16x512xf32> to vector<16x64xf32>
    %367 = vector.broadcast %15 : vector<16x1xf32> to vector<16x64xf32>
    %368 = arith.mulf %367, %366 : vector<16x64xf32>
    %369 = arith.addf %365, %368 : vector<16x64xf32>
    %370 = vector.extract_strided_slice %346 {offsets = [0, 384], sizes = [16, 64], strides = [1, 1]} : vector<16x512xf32> to vector<16x64xf32>
    %371 = vector.broadcast %16 : vector<16x1xf32> to vector<16x64xf32>
    %372 = arith.mulf %371, %370 : vector<16x64xf32>
    %373 = arith.addf %369, %372 : vector<16x64xf32>
    %374 = vector.extract_strided_slice %346 {offsets = [0, 448], sizes = [16, 64], strides = [1, 1]} : vector<16x512xf32> to vector<16x64xf32>
    %375 = vector.broadcast %17 : vector<16x1xf32> to vector<16x64xf32>
    %376 = arith.mulf %375, %374 : vector<16x64xf32>
    %377 = arith.addf %373, %376 : vector<16x64xf32>
    %378 = arith.addf %377, %8 : vector<16x64xf32>
    %379 = arith.negf %378 : vector<16x64xf32>
    %380 = math.exp %379 : vector<16x64xf32>
    %cst_65 = arith.constant 1.000000e+00 : f32
    %381 = vector.broadcast %cst_65 : f32 to vector<16x64xf32>
    %382 = arith.addf %381, %380 : vector<16x64xf32>
    %383 = arith.divf %381, %382 : vector<16x64xf32>
    %384 = vector.extract_strided_slice %383 {offsets = [0, 0], sizes = [16, 32], strides = [1, 1]} : vector<16x64xf32> to vector<16x32xf32>
    %385 = vector.extract_strided_slice %383 {offsets = [0, 32], sizes = [16, 32], strides = [1, 1]} : vector<16x64xf32> to vector<16x32xf32>
    %386 = arith.mulf %385, %326 : vector<16x32xf32>
    %cst_66 = arith.constant dense<0.000000e+00> : vector<32x32xf32>
    %387 = tpu.matmul %3, %386, %cst_66 {dimension_numbers = #tpu.dot_dimension_numbers<[1], [0], [0], [1], [0, 0, 1, 1], [], []>} : vector<32x16xf32>, vector<16x32xf32>, vector<32x32xf32> -> vector<32x32xf32>
    %388 = vector.extract_strided_slice %387 {offsets = [0, 0], sizes = [16, 32], strides = [1, 1]} : vector<32x32xf32> to vector<16x32xf32>
    %389 = vector.extract_strided_slice %387 {offsets = [16, 0], sizes = [16, 32], strides = [1, 1]} : vector<32x32xf32> to vector<16x32xf32>
    %390 = tpu.concatenate %386, %388, %389 in 1 : vector<16x32xf32>, vector<16x32xf32>, vector<16x32xf32> -> vector<16x96xf32>
    %cst_67 = arith.constant dense<0.000000e+00> : vector<16x256xf32>
    %391 = tpu.matmul %390, %6, %cst_67 {dimension_numbers = #tpu.dot_dimension_numbers<[1], [0], [0], [1], [0, 0, 1, 1], [], []>} : vector<16x96xf32>, vector<96x256xf32>, vector<16x256xf32> -> vector<16x256xf32>
    %392 = arith.addf %340, %391 : vector<16x256xf32>
    %393 = vector.extract_strided_slice %392 {offsets = [0, 0], sizes = [16, 32], strides = [1, 1]} : vector<16x256xf32> to vector<16x32xf32>
    %394 = vector.broadcast %10 : vector<16x1xf32> to vector<16x32xf32>
    %395 = arith.mulf %394, %393 : vector<16x32xf32>
    %396 = vector.extract_strided_slice %392 {offsets = [0, 32], sizes = [16, 32], strides = [1, 1]} : vector<16x256xf32> to vector<16x32xf32>
    %397 = vector.broadcast %11 : vector<16x1xf32> to vector<16x32xf32>
    %398 = arith.mulf %397, %396 : vector<16x32xf32>
    %399 = arith.addf %395, %398 : vector<16x32xf32>
    %400 = vector.extract_strided_slice %392 {offsets = [0, 64], sizes = [16, 32], strides = [1, 1]} : vector<16x256xf32> to vector<16x32xf32>
    %401 = vector.broadcast %12 : vector<16x1xf32> to vector<16x32xf32>
    %402 = arith.mulf %401, %400 : vector<16x32xf32>
    %403 = arith.addf %399, %402 : vector<16x32xf32>
    %404 = vector.extract_strided_slice %392 {offsets = [0, 96], sizes = [16, 32], strides = [1, 1]} : vector<16x256xf32> to vector<16x32xf32>
    %405 = vector.broadcast %13 : vector<16x1xf32> to vector<16x32xf32>
    %406 = arith.mulf %405, %404 : vector<16x32xf32>
    %407 = arith.addf %403, %406 : vector<16x32xf32>
    %408 = vector.extract_strided_slice %392 {offsets = [0, 128], sizes = [16, 32], strides = [1, 1]} : vector<16x256xf32> to vector<16x32xf32>
    %409 = vector.broadcast %14 : vector<16x1xf32> to vector<16x32xf32>
    %410 = arith.mulf %409, %408 : vector<16x32xf32>
    %411 = arith.addf %407, %410 : vector<16x32xf32>
    %412 = vector.extract_strided_slice %392 {offsets = [0, 160], sizes = [16, 32], strides = [1, 1]} : vector<16x256xf32> to vector<16x32xf32>
    %413 = vector.broadcast %15 : vector<16x1xf32> to vector<16x32xf32>
    %414 = arith.mulf %413, %412 : vector<16x32xf32>
    %415 = arith.addf %411, %414 : vector<16x32xf32>
    %416 = vector.extract_strided_slice %392 {offsets = [0, 192], sizes = [16, 32], strides = [1, 1]} : vector<16x256xf32> to vector<16x32xf32>
    %417 = vector.broadcast %16 : vector<16x1xf32> to vector<16x32xf32>
    %418 = arith.mulf %417, %416 : vector<16x32xf32>
    %419 = arith.addf %415, %418 : vector<16x32xf32>
    %420 = vector.extract_strided_slice %392 {offsets = [0, 224], sizes = [16, 32], strides = [1, 1]} : vector<16x256xf32> to vector<16x32xf32>
    %421 = vector.broadcast %17 : vector<16x1xf32> to vector<16x32xf32>
    %422 = arith.mulf %421, %420 : vector<16x32xf32>
    %423 = arith.addf %419, %422 : vector<16x32xf32>
    %424 = arith.addf %423, %9 : vector<16x32xf32>
    %425 = math.tanh %424 : vector<16x32xf32>
    %426 = arith.mulf %384, %326 : vector<16x32xf32>
    %cst_68 = arith.constant 1.000000e+00 : f32
    %427 = vector.broadcast %cst_68 : f32 to vector<16x32xf32>
    %428 = arith.subf %427, %384 : vector<16x32xf32>
    %429 = arith.mulf %428, %425 : vector<16x32xf32>
    %430 = arith.addf %426, %429 : vector<16x32xf32>
    %c0_69 = arith.constant 0 : index
    %431 = arith.index_cast %c3_i32 : i32 to index
    %c0_70 = arith.constant 0 : index
    %c0_71 = arith.constant 0 : index
    %432 = vector.load %arg11[%c0_69, %431, %c0_70, %c0_71] : memref<1x4x16x32xf32, #tpu.memory_space<vmem>>, vector<1x1x16x32xf32>
    %433 = vector.shape_cast %432 : vector<1x1x16x32xf32> to vector<16x32xf32>
    %434 = vector.shape_cast %430 : vector<16x32xf32> to vector<1x1x16x32xf32>
    tpu.vector_store %arg11[%c0_69, %431, %c0_70, %c0_71], %434 {strides = array<i32>} : memref<1x4x16x32xf32, #tpu.memory_space<vmem>>, vector<1x1x16x32xf32>,
    %c4_i32 = arith.constant 4 : i32
    %c0_72 = arith.constant 0 : index
    %c0_73 = arith.constant 0 : index
    %435 = vector.load %arg12[%c0_72, %c0_73] : memref<16x32xf32, #tpu.memory_space<vmem>>, vector<16x32xf32>
    tpu.vector_store %arg12[%c0_72, %c0_73], %430 {strides = array<i32>} : memref<16x32xf32, #tpu.memory_space<vmem>>, vector<16x32xf32>,
    return
  }
  func.func @transform_0(%arg0: i32, %arg1: i32) -> (i32, i32, i32, i32) {
    %c0_i32 = arith.constant 0 : i32
    %c0_i32_0 = arith.constant 0 : i32
    %c0_i32_1 = arith.constant 0 : i32
    return %arg0, %arg1, %c0_i32, %c0_i32_0 : i32, i32, i32, i32
  }
  func.func @transform_1(%arg0: i32, %arg1: i32) -> (i32, i32, i32) {
    %c0_i32 = arith.constant 0 : i32
    %c0_i32_0 = arith.constant 0 : i32
    %c0_i32_1 = arith.constant 0 : i32
    return %arg0, %c0_i32, %c0_i32_0 : i32, i32, i32
  }
  func.func @transform_2(%arg0: i32, %arg1: i32) -> (i32, i32) {
    %c0_i32 = arith.constant 0 : i32
    %c0_i32_0 = arith.constant 0 : i32
    %c0_i32_1 = arith.constant 0 : i32
    return %c0_i32, %c0_i32_0 : i32, i32
  }
  func.func @transform_3(%arg0: i32, %arg1: i32) -> (i32, i32) {
    %c0_i32 = arith.constant 0 : i32
    %c0_i32_0 = arith.constant 0 : i32
    %c0_i32_1 = arith.constant 0 : i32
    return %c0_i32, %c0_i32_0 : i32, i32
  }
  func.func @transform_4(%arg0: i32, %arg1: i32) -> (i32, i32) {
    %c0_i32 = arith.constant 0 : i32
    %c0_i32_0 = arith.constant 0 : i32
    %c0_i32_1 = arith.constant 0 : i32
    return %c0_i32, %c0_i32_0 : i32, i32
  }
  func.func @transform_5(%arg0: i32, %arg1: i32) -> (i32, i32) {
    %c0_i32 = arith.constant 0 : i32
    %c0_i32_0 = arith.constant 0 : i32
    %c0_i32_1 = arith.constant 0 : i32
    return %c0_i32, %c0_i32_0 : i32, i32
  }
  func.func @transform_6(%arg0: i32, %arg1: i32) -> (i32, i32) {
    %c0_i32 = arith.constant 0 : i32
    %c0_i32_0 = arith.constant 0 : i32
    %c0_i32_1 = arith.constant 0 : i32
    return %c0_i32, %c0_i32_0 : i32, i32
  }
  func.func @transform_7(%arg0: i32, %arg1: i32) -> (i32, i32) {
    %c0_i32 = arith.constant 0 : i32
    %c0_i32_0 = arith.constant 0 : i32
    %c0_i32_1 = arith.constant 0 : i32
    return %c0_i32, %c0_i32_0 : i32, i32
  }
  func.func @transform_8(%arg0: i32, %arg1: i32) -> (i32, i32) {
    %c0_i32 = arith.constant 0 : i32
    %c0_i32_0 = arith.constant 0 : i32
    %c0_i32_1 = arith.constant 0 : i32
    return %c0_i32, %c0_i32_0 : i32, i32
  }
  func.func @transform_9(%arg0: i32, %arg1: i32) -> (i32, i32, i32, i32) {
    %c0_i32 = arith.constant 0 : i32
    %c0_i32_0 = arith.constant 0 : i32
    %c0_i32_1 = arith.constant 0 : i32
    return %arg0, %arg1, %c0_i32, %c0_i32_0 : i32, i32, i32, i32
  }
}

</mosaic_0001>

<bundles_post_ra>
// kernel: tpu_custom_call.1
= control target key start
LH: loop header
LB: loop body
LE: loop exit
PB: predicated region body
PF: predicated region fallthrough
CT: control target
= control target key end

     0   :  { %s7707_s0 = inlined_call_operand.vmem [shape: f32[2,8,16,4], index: 0, kind: input, shape index: {}]   ;;  %s7708_s1 = inlined_call_operand.hbm [shape: f32[2,16,32], index: 1, kind: input, shape index: {}]   ;;  %s7709_s2 = inlined_call_operand.vmem [shape: f32[32,16], index: 2, kind: input, shape index: {}]   ;;  %s7710_s3 = inlined_call_operand.hbm [shape: f32[12,768], index: 3, kind: input, shape index: {}]   ;;  %s7711_s4 = inlined_call_operand.vmem [shape: f32[96,512], index: 4, kind: input, shape index: {}]   ;;  %s7712_s5 = inlined_call_operand.hbm [shape: f32[96,256], index: 5, kind: input, shape index: {}]   ;;  %s7713_s6 = inlined_call_operand.vmem [shape: f32[16,8], index: 6, kind: input, shape index: {}]   ;;  %s7714_s7 = inlined_call_operand.vmem [shape: f32[16,64], index: 7, kind: input, shape index: {}]   ;;  %s7715_s8 = inlined_call_operand.vmem [shape: f32[16,32], index: 8, kind: input, shape index: {}]   ;;  %s7716_s9 = inlined_call_operand.hbm [shape: f32[2,8,16,32], index: 9, kind: output, shape index: {}]  }
   0x1   :  { %7816 = sst [smem:[#allocation56_spill]] %s7710_s3 }
   0x2   :  { %7817 = sst [smem:[#allocation57_spill]] %s7711_s4 }
   0x3   :  { %7818 = sst [smem:[#allocation58_spill]] %s7712_s5 }
   0x4   :  { %7819 = sst [smem:[#allocation59_spill]] %s7713_s6 }
   0x5   :  { %7820 = sst [smem:[#allocation60_spill]] %s7714_s7 }
   0x6   :  { %7821 = sst [smem:[#allocation61_spill]] %s7715_s8 }
   0x7   :  { %7822 = sst [smem:[#allocation62_spill]] %s7716_s9 }
   0x8   :  { %14 = vsyncpa [#allocation4], 0 }
   0x9   :  { %16 = vsyncpa [#allocation4 + $0x1], 0 }
   0xa   :  { %17 = vsyncpa [#allocation7], 0 }
   0xb   :  { %18 = vsyncpa [#allocation5], 0 }
   0xc   :  { %20 = vsyncpa [#allocation5 + $0x1], 0  ;;  %s6101_s30 = smov 0   ;;  %s6103_s10 = smov 0  }
   0xd   :  { %s6105_s11 = smov 0   ;;  %s6107_s12 = smov 0  }
   0xe   :  { %s6109_s13 = smov 0   ;;  %s6111_s14 = smov 0  }
   0xf   :  { %s6113_s15 = smov 0   ;;  %s6115_s16 = smov 0  }
  0x10   :  { %s6117_s17 = smov 0   ;;  %s6119_s18 = smov 0  }
  0x11   :  { %s6121_s19 = smov 0  }
  0x12 LB: > { %7823 = sst [smem:[#allocation13_spill]] %s5983_s30  ;;  %s4775_s20 = sadd.s32 4294967295, %s6023_s19   ;;  %s6023_s19 = sphi %s6121_s19, %s26_s19   ;;  %s6019_s18 = sphi %s6119_s18, %s7992_s18   ;;  %s6015_s17 = sphi %s6117_s17, %s7984_s17   ;;  %s6011_s16 = sphi %s6115_s16, %s7991_s16   ;;  %s6007_s15 = sphi %s6113_s15, %s7983_s15   ;;  %s6003_s14 = sphi %s6111_s14, %s7990_s14   ;;  %s5999_s13 = sphi %s6109_s13, %s7989_s13   ;;  %s5995_s12 = sphi %s6107_s12, %s7988_s12   ;;  %s5991_s11 = sphi %s6105_s11, %s7987_s11   ;;  %s5987_s10 = sphi %s6103_s10, %s7986_s10   ;;  %s5983_s30 = sphi %s6101_s30, %s7985_s30  }
  0x13   : > { %7824 = sst [smem:[#allocation14_spill]] %s6015_s17  ;;  %s4776_s21 = sadd.s32 4294967294, %s6023_s19  }
  0x14   : > { %p86_p0 = scmp.ne.s32.totalorder %s5999_s13, %s5995_s12  ;;  %p6157_p1 = scmp.eq.s32.totalorder %s4775_s20, 0 }
  0x15   : > { %p258_p2 = scmp.ne.s32.totalorder %s5991_s11, %s5987_s10  ;;  %p259_p4 = scmp.eq.s32.totalorder %s4775_s20, 3 }
  0x16   : > { %s7825_s22 = scalar_select %p6157_p1, 1, 0 }
  0x17   : > { %p6166_p3 = por %p6157_p1, %p86_p0  ;;  %p264_p5 = scmp.ne.s32.totalorder %s5987_s10, %s5983_s30 }
  0x18   : > { %p265_p6 = scmp.eq.s32.totalorder %s4776_s21, 3  ;;  %p6172_p7 = por %p259_p4, %p258_p2 }
  0x19   : > { %s7826_s24 = scalar_select %p6166_p3, 1, 0 }
  0x1a   : > { %s7827_s25 = scalar_select %p6172_p7, 1, 0 }
  0x1b   : > { %p4777_p8 = scmp.ge.s32.totalorder %s6023_s19, 1  ;;  %p6177_p9 = por %p265_p6, %p264_p5 }
  0x1c   : > { %7828 = sst [smem:[#allocation15_spill]] %s7827_s25  ;;  %p272_p10 = scmp.lt.s32.totalorder %s6023_s19, 5 }
  0x1d   : > { %s7829_s26 = scalar_select %p6177_p9, 1, 0 }
  0x1e   : > { %p6182_p11 = pnand %p4777_p8, %p272_p10  ;;  %s6025_s28 = smov [#allocation6]  }
  0x1f   : > { %7830 = sst [smem:[#allocation16_spill]] %s7829_s26  ;;  %s287_s29 = sshll.u32 %s6025_s28, 4  ;;  %s288_s29 = int_to_ptr.vmem [resolvable:$true] %s287_s29 }
  0x20   : > { %s7831_s27 = scalar_select %p6182_p11, 1, 0 }
  0x21   : > { %p5603_p12 = pneg %p6182_p11  ;;  %s6026_s20 = smov [#allocation8]  }
  0x22   : > { %s303_s21 = sshll.u32 %s6026_s20, 4  ;;  %s7833_s3 = sld [smem:[#allocation56_spill]]  ;;  %s6194_s21 = int_to_ptr.vmem [resolvable:$true] %s303_s21 }
  0x23   : > { %p6190_p13 = pnand %p5603_p12, %p6157_p1 }
  0x25   : > { %p5813_p2 = pneg %p6190_p13 }
  0x28   : > { %s5811_s30 = scalar_lea.hbm %s7833_s3, 1536 }
  0x29   : > { %p5812_p0 = scmp.ne.s32.totalorder %s7833_s3, %s5811_s30  ;;  %p5818_p6 = scmp.lt.u32.totalorder %s5811_s30, %s7833_s3 }
  0x2b   : > { %p5814_p4 = pnand %p5813_p2, %p5812_p0 }
  0x2d   : > { %p5815_p5 = pneg %p5814_p4 }
  0x2f   : > { %p5820_p8 = pnand %p5818_p6, %p5815_p5 }
  0x31   : > { %5823 = shalt.err (!%p5820_p8)
}
  0x32   : > { %s5824_s20 = scalar_lea.vmem %s288_s29, 1536  ;;  %p5832_p7 = scmp.lt.s32.totalorder %s288_s29, %s288_s29 }
  0x33   : > { %p5825_p10 = scmp.ne.s32.totalorder %s288_s29, %s5824_s20  ;;  %p5833_p1 = scmp.lt.s32.totalorder %s5824_s20, %s5824_s20 }
  0x35   : > { %p5827_p12 = pnand %p5825_p10, %p5813_p2  ;;  %p5834_p3 = por %p5833_p1, %p5832_p7 }
  0x37   : > { %p5828_p9 = pneg %p5827_p12 }
  0x39   : > { %p5835_p11 = pnand %p5834_p3, %p5828_p9 }
  0x3b   : > { %5838 = shalt.err (!%p5835_p11)
}
  0x3c   : > { %s6027_s9 = smov 768   ;;  %s6028_s23 = smov 48  }
  0x3d   : > { %5606 = dma.hbm_to_vmem [thread:$0]  (!%p6190_p13), %s7833_s3, 1536, %s288_s29, [#allocation7], %s6027_s9, %s6027_s9, %s6028_s23  }
  0x3e   : > { %s7834_s5 = sld [smem:[#allocation58_spill]] }
  0x44   : > { %s5839_s28 = scalar_lea.hbm %s7834_s5, 3072 }
  0x45   : > { %p5840_p0 = scmp.ne.s32.totalorder %s7834_s5, %s5839_s28  ;;  %p5846_p7 = scmp.lt.u32.totalorder %s5839_s28, %s7834_s5 }
  0x47   : > { %p5842_p1 = pnand %p5840_p0, %p5813_p2 }
  0x49   : > { %p5843_p3 = pneg %p5842_p1 }
  0x4b   : > { %p5848_p9 = pnand %p5846_p7, %p5843_p3 }
  0x4d   : > { %5851 = shalt.err (!%p5848_p9)
}
  0x4e   : > { %s5852_s29 = scalar_lea.vmem %s6194_s21, 3072  ;;  %p5860_p6 = scmp.lt.s32.totalorder %s6194_s21, %s6194_s21 }
  0x4f   : > { %p5853_p11 = scmp.ne.s32.totalorder %s6194_s21, %s5852_s29  ;;  %p5861_p8 = scmp.lt.s32.totalorder %s5852_s29, %s5852_s29 }
  0x51   : > { %p5855_p4 = pnand %p5853_p11, %p5813_p2  ;;  %p5862_p10 = por %p5861_p8, %p5860_p6 }
  0x53   : > { %p5856_p5 = pneg %p5855_p4 }
  0x55   : > { %p5863_p12 = pnand %p5862_p10, %p5856_p5 }
  0x57   : > { %5866 = shalt.err (!%p5863_p12)
}
  0x58   : > { %s6029_s4 = smov 256   ;;  %s6030_s6 = smov 16  }
  0x59   : > { %5609 = dma.hbm_to_vmem [thread:$0]  (!%p6190_p13), %s7834_s5, 3072, %s6194_s21, [#allocation7], %s6029_s4, %s6029_s4, %s6030_s6  }
  0x5a   : > { %s35_s23 = sadd.s32 1, %s6015_s17  ;;  %s38_s8 = sadd.s32 1, %s6019_s18 }
  0x5b   : > { %p36_p2 = scmp.ge.s32.totalorder %s35_s23, 2  ;;  %s73_s30 = sadd.s32 1, %s6003_s14 }
  0x5c   : > { %p80_p0 = scmp.ne.s32.totalorder %s6003_s14, %s5999_s13  ;;  %p81_p1 = scmp.eq.s32.totalorder %s6023_s19, 0 }
  0x5d   : > { %s7994_s23 = smov (%p36_p2, %s35_s23), 0  ;;  %s7996_s8 = smov (!%p36_p2, %s38_s8), %s6019_s18 }
  0x5e   : > { %7835 = sst [smem:[#allocation17_spill]] %s7994_s23  ;;  %p6252_p3 = por %p81_p1, %p80_p0 }
  0x5f   : > { %s244_s25 = ssub.s32 %s6015_s17, %s7994_s23  ;;  %p40_p13 = scmp.ge.s32.totalorder %s7996_s8, 2 }
  0x60   : > { %p5620_p7 = scmp.lt.s32.totalorder %s6023_s19, 4  ;;  %s340_s21 = sand.u32 1, %s6003_s14  }
  0x61   : > { %s4941_s26 = sshll.u32 %s6019_s18, 8  ;;  %s7998_s8 = smov (%p40_p13, %s7996_s8), 0 }
  0x62   : > { %s4781_s28 = sshll.u32 %s340_s21, 4  ;;  %s70_s20 = ssub.s32 %s6019_s18, %s7998_s8 }
  0x63   : > { %p71_p9 = scmp.eq.s32.totalorder %s70_s20, 0  ;;  %s245_s29 = sor.u32 %s244_s25, %s70_s20 }
  0x64   : > { %p246_p11 = scmp.eq.s32.totalorder %s245_s29, 0  ;;  %s6268_s7 = scalar_lea.hbm %s7708_s1, %s4941_s26 }
  0x65   : > { %s6271_s9 = scalar_select %p71_p9, %s6003_s14, %s73_s30  }
  0x66   : > { %s7837_s3 = sadd.s32 1, %s5991_s11  ;;  %s344_s23 = scalar_lea.vmem [#allocation3], %s4781_s28 }
  0x67   : > { %s6276_s5 = scalar_select %p246_p11, %s5991_s11, %s7837_s3  }
  0x68   : > { %s351_s17 = sshll.u32 %s344_s23, 4  ;;  %p6282_p4 = pnand %p5620_p7, %p6252_p3  ;;  %s6286_s17 = int_to_ptr.vmem [resolvable:$true] %s351_s17 }
  0x69   : > { %s6288_s26 = scalar_lea.sflag [#allocation4], %s340_s21  ;;  %s5867_s30 = scalar_lea.hbm %s6268_s7, 256 }
  0x6a   : > { %p5868_p5 = scmp.ne.s32.totalorder %s6268_s7, %s5867_s30  ;;  %p5869_p6 = pneg %p6282_p4 }
  0x6b   : > { %s5872_s12 = scalar_lea.hbm %s7708_s1, 512  ;;  %p5873_p12 = scmp.lt.u32.totalorder %s6268_s7, %s7708_s1 }
  0x6c   : > { %p5870_p8 = pnand %p5869_p6, %p5868_p5  ;;  %p5874_p2 = scmp.lt.u32.totalorder %s5872_s12, %s5867_s30 }
  0x6d   : > { %p5876_p1 = scmp.lt.u32.totalorder %s5867_s30, %s6268_s7 }
  0x6e   : > { %p5871_p10 = pneg %p5870_p8  ;;  %p5875_p0 = por %p5874_p2, %p5873_p12 }
  0x70   : > { %p5877_p3 = por %p5876_p1, %p5875_p0 }
  0x72   : > { %p5878_p13 = pnand %p5877_p3, %p5871_p10 }
  0x74   : > { %5881 = shalt.err (!%p5878_p13)
}
  0x75   : > { %s5882_s21 = scalar_lea.vmem %s6286_s17, 256  ;;  %s6031_s29 = smov [#allocation3]  }
  0x76   : > { %p5883_p7 = scmp.ne.s32.totalorder %s6286_s17, %s5882_s21  ;;  %s5887_s4 = sshll.u32 %s6031_s29, 4  ;;  %s5888_s4 = int_to_ptr.vmem [resolvable:$false] %s5887_s4 }
  0x77   : > { %s5889_s6 = scalar_lea.vmem %s5888_s4, 512  ;;  %p5890_p5 = scmp.lt.s32.totalorder %s6286_s17, %s5888_s4 }
  0x78   : > { %p5885_p9 = pnand %p5883_p7, %p5869_p6  ;;  %p5891_p8 = scmp.lt.s32.totalorder %s5889_s6, %s5882_s21 }
  0x7a   : > { %p5886_p11 = pneg %p5885_p9  ;;  %p5892_p12 = por %p5891_p8, %p5890_p5 }
  0x7c   : > { %p5893_p2 = pnand %p5892_p12, %p5886_p11 }
  0x7e   : > { %5896 = shalt.err (!%p5893_p2)
}
  0x7f   : > { %s6032_s30 = smov 128   ;;  %s6033_s3 = smov 8  }
  0x80   : > { %5613 = dma.hbm_to_vmem [thread:$0]  (!%p6282_p4), %s6268_s7, 256, %s6286_s17, %s6288_s26, %s6032_s30, %s6032_s30, %s6033_s3  }
  0x81   : > { %p7839_p6 = scmp.ne.s32.totalorder %s7831_s27, 0 }
  0x83   : > { %363 = sbr.rel (%p7839_p6) target bundleno = 6751 (0x1a5f), region = 56 }
  0x8a   : > { %s365_s23 = sand.u32 1, %s5999_s13   ;;  %p7840_p10 = scmp.ne.s32.totalorder %s7826_s24, 0 }
  0x8b   : > { %s4785_s12 = sshll.u32 %s365_s23, 4  ;;  %s366_s28 = scalar_lea.sflag [#allocation4], %s365_s23 }
  0x8c   : > { %s369_s20 = scalar_lea.vmem [#allocation3], %s4785_s12 }
  0x8d   : > { %5970 = dma.done.wait (%p7840_p10), %s366_s28, 256  }
  0x8e   : > { %5972 = vsyncadd (%p7840_p10), %s366_s28, 4294967040  ;;  %p7841_p0 = scmp.ne.s32.totalorder %s7825_s22, 0 }
  0x90   : > { %5974 = dma.done.wait (%p7841_p0), [#allocation7], 4608  }
  0x91   : > { %5976 = vsyncadd (%p7841_p0), [#allocation7], 4294962688  ;;  %s7785_s17 = sand.u32 1, %s5987_s10   ;;  %s4789_s27 = sshll.u32 %s6007_s15, 2 }
  0x92   : > { %s4788_s7 = sshll.u32 %s7785_s17, 6  ;;  %p423_p4 = scmp.lt.s32.totalorder %s6011_s16, 1 }
  0x93   : > { %p425_p1 = scmp.lt.s32.totalorder %s4789_s27, 7  ;;  %s6338_s30 = scalar_lea.vmem [#allocation9], %s4788_s7 }
  0x94   : > { %s424_s25 = scalar_select %p423_p4, %s6011_s16, 1 }
  0x95   : > { %s8000_s27 = smov (!%p425_p1, %s4789_s27), 7  ;;  %p4793_p3 = scmp.ne.s32.totalorder %s6007_s15, 0 }
  0x96   : > { %s4791_s24 = sshll.u32 %s424_s25, 4  ;;  %s4790_s26 = sshll.u32 %s8000_s27, 1  ;;  %v438_v0 = vld [vmem:[%s369_s20] sm:$0xff] (!%p4793_p3)  ;;  %vm440_vm0 = vcmask (!%p4793_p3), 261120   ;;  %v439_v1 = vld [vmem:[%s369_s20 + $0x8] sm:$0xff] (!%p4793_p3) }
  0x97   : > { %s429_s21 = sadd.s32 %s4791_s24, %s4790_s26  ;;  %437 = sbr.rel (%p4793_p3) target bundleno = 158 (0x9e), region = 72  ;;  %441 = vst.msk [vmem:[#allocation2] sm:$0xff] (!%p4793_p3), %vm440_vm0, %v438_v0  ;;  %442 = vst.msk [vmem:[#allocation2 + $0x8] sm:$0xff] (!%p4793_p3), %vm440_vm0, %v439_v1 }
  0x98   : > { %s4792_s29 = sshll.u32 %s429_s21, 3 }
  0x99   : > { %s6336_s6 = scalar_lea.vmem %s7707_s0, %s4792_s29 }
  0x9e PF: > { %v539_v2 = vld [vmem:[%s6336_s6] sm:$0xff]  ;;  %v6343_v3 = vld [vmem:[%s6336_s6 + $0x8] sm:$0xff]  ;;  %vm541_vm1 = vcmask 130048   ;;  %v6361_v7 = vld [vmem:[%s7709_s2 + $0x10] sm:$0xff]  ;;  %vm668_vm2 = vcmask 1043456   ;;  %vm6034_vm3 = vmmov 1  }
  0x9f   : > { %v6348_v4 = vld [vmem:[%s7709_s2] sm:$0xff]  ;;  %v5135_v5 = vpack.c.bf16 %v6343_v3, %v539_v2  ;;  %v6356_v6 = vld [vmem:[%s7709_s2 + $0x8] sm:$0xff]  ;;  %v6370_v8 = vld [vmem:[%s7709_s2 + $0x18] sm:$0xff]  ;;  %v7733_v22 = vmov 0.0   ;;  %s6036_s24 = smov 4   ;;  %s6037_s26 = smov 8  }
  0xa0   : > { %5019 = vmatprep.mubr.msk.f32.mxu1 %vm541_vm1, %v6348_v4  ;;  %v448_v9 = vld [vmem:[#allocation6 + $0x8] sm:$0xff]  ;;  %v454_v10 = vld [vmem:[#allocation6 + $0x38] sm:$0xf]  ;;  %v447_v14 = vld [vmem:[#allocation6] sm:$0xff]  ;;  %828 = vmatprep.mubr.f32.mxu0 %v7733_v22  ;;  %vm655_vm5 = vcmask 31744   ;;  %vm658_vm6 = vcmask 64512  }
  0xa1   : > { %5136 = vmatprep.subr.bf16.mxu1 %v5135_v5  ;;  %v450_v11 = vld [vmem:[#allocation6 + $0x18] sm:$0xff]  ;;  %v6374_v12 = vpack.c.bf16 %v454_v10, %v448_v9  ;;  %v456_v13 = vld [vmem:[#allocation6 + $0x48] sm:$0xf]  ;;  %v449_v15 = vld [vmem:[#allocation6 + $0x10] sm:$0xff]  ;;  %vm661_vm7 = vcmask 97280   ;;  %s7847_s4 = sld [smem:[#allocation57_spill]] }
  0xa2   : > { %5138 = vmatpush3.bf16.msra.mxu1 %v5135_v5  ;;  %vm6376_vm4 = vmpackc.low %vm668_vm2, %vm6034_vm3  ;;  %v6380_v17 = vpack.c.bf16 %v456_v13, %v450_v11  ;;  %v453_v18 = vld [vmem:[#allocation6 + $0x30] sm:$0xf]  ;;  %v455_v19 = vld [vmem:[#allocation6 + $0x40] sm:$0xf]  ;;  %s6038_s27 = smov 32   ;;  %s6039_s7 = smov 64  }
  0xa3   : > { %7842 = vst [vmem:[#allocation18_spill] sm:$0xff] %v6374_v12  ;;  %5141 = vmatprep.subr.msk.bf16.mxu1 %vm6376_vm4, %v6374_v12  ;;  %v6385_v20 = vpack.c.bf16 %v453_v18, %v447_v14  ;;  %v6387_v21 = vpack.c.bf16 %v455_v19, %v449_v15  ;;  %v452_v23 = vld [vmem:[#allocation6 + $0x28] sm:$0xff]  ;;  %v458_v24 = vld [vmem:[#allocation6 + $0x58] sm:$0xf]  ;;  %v6400_v25 = vld [vmem:[#allocation2] sm:$0xff]  ;;  %s7852_s29 = sld [smem:[#allocation59_spill]] }
  0xa4   : > { %7845 = vst [vmem:[#allocation19_spill] sm:$0xff] %v6380_v17  ;;  %5147 = vmatprep.subr.msk.bf16.mxu0 %vm6376_vm4, %v6380_v17  ;;  %v6402_v26 = vpack.c.bf16 %v458_v24, %v452_v23  ;;  %v6404_v27 = vld [vmem:[#allocation2 + $0x8] sm:$0xff]  ;;  %v451_v35 = vld [vmem:[#allocation6 + $0x20] sm:$0xff]  ;;  %v457_v36 = vld [vmem:[#allocation6 + $0x50] sm:$0xf]  ;;  %vm1019_vm8 = vcmask 261120  }
  0xa5   : > { %5020 = vmatmul.mubr.msk.f32.vlgmr.msra.gmra.mrb[0].mxu1 %vm541_vm1, %v6356_v6  ;;  %7846 = vst [vmem:[#allocation20_spill] sm:$0xff] %v6385_v20  ;;  %5150 = vmatpush1.bf16.msk.msra.mxu0 %vm6376_vm4, %v6387_v21  ;;  %v5157_v28 = vpack.c.bf16 %v6404_v27, %v6400_v25  ;;  %v6416_v39 = vpack.c.bf16 %v457_v36, %v451_v35  ;;  %vm1022_vm9 = vcmask 523264   ;;  %vm1025_vm10 = vcmask 785408   ;;  %s7870_s22 = sld [smem:[#allocation60_spill]]  ;;  %s6048_s12 = smov 96  }
  0xa6   : > { %5022 = vmatprep.mubr.msk.f32.mxu1 %vm541_vm1, %v6361_v7  ;;  %5144 = vmatpush1.bf16.msk.msra.mxu1 %vm6376_vm4, %v6385_v20  ;;  %s7886_s25 = sld [smem:[#allocation61_spill]]  ;;  %s7976_s17 = sld [smem:[#allocation15_spill]] }
  0xa7   : > { %5153 = vmatprep.subr.msk.bf16.mxu1 %vm6376_vm4, %v6402_v26  ;;  %5158 = vmatprep.subr.bf16.mxu0 %v5157_v28  ;;  %v460_v44 = vld [vmem:[%s7847_s4 + $0x8] sm:$0xff]  ;;  %v459_v46 = vld [vmem:[%s7847_s4] sm:$0xff]  ;;  %s4648_s21 = sshll.u32 %s6338_s30, 4  ;;  %s7977_s3 = sld [smem:[#allocation62_spill]]  ;;  %s7638_s21 = int_to_ptr.vmem [resolvable:$true] %s4648_s21 }
  0xa8   : > { %v464_v45 = vld [vmem:[%s7847_s4 + $0x28] sm:$0xff]  ;;  %v463_v48 = vld [vmem:[%s7847_s4 + $0x20] sm:$0xff]  ;;  %s5897_s28 = scalar_lea.vmem %s7638_s21, 1024 }
  0xa9   : > { %5023 = vmatmul.mubr.msk.f32.gmra.mrb[2].mxu1 %vm541_vm1, %v6370_v8  ;;  %v6455_v47 = vpack.c.bf16 %v464_v45, %v460_v44  ;;  %v468_v49 = vld [vmem:[%s7847_s4 + $0x48] sm:$0xff]  ;;  %v6466_v51 = vpack.c.bf16 %v463_v48, %v459_v46  ;;  %v467_v53 = vld [vmem:[%s7847_s4 + $0x40] sm:$0xff]  ;;  %v6041_v44 = vmov 3   ;;  %v6042_v45 = vmov 5   ;;  %p5898_p13 = scmp.ne.s32.totalorder %s7638_s21, %s5897_s28 }
  0xaa   : > { %751 = vmatprep.mubr.f32.mxu1 %v7733_v22  ;;  %v472_v50 = vld [vmem:[%s7847_s4 + $0x68] sm:$0xff]  ;;  %v471_v54 = vld [vmem:[%s7847_s4 + $0x60] sm:$0xff]  ;;  %v6043_v46 = vmov 7   ;;  %v6044_v48 = vmov 0  }
  0xab   : > { %v6468_v52 = vpack.c.bf16 %v472_v50, %v468_v49  ;;  %v476_v55 = vld [vmem:[%s7847_s4 + $0x88] sm:$0xff]  ;;  %v6484_v57 = vpack.c.bf16 %v471_v54, %v467_v53  ;;  %v475_v59 = vld [vmem:[%s7847_s4 + $0x80] sm:$0xff]  ;;  %v6045_v49 = vmov 4   ;;  %v6046_v50 = vmov 6  }
  0xac   : > { %v480_v56 = vld [vmem:[%s7847_s4 + $0xa8] sm:$0xff]  ;;  %v479_v60 = vld [vmem:[%s7847_s4 + $0xa0] sm:$0xff]  ;;  %v6047_v53 = vmov 2   ;;  %p7979_p7 = scmp.ne.s32.totalorder %s7976_s17, 0 }
  0xad   : > { %v6487_v58 = vpack.c.bf16 %v480_v56, %v476_v55  ;;  %v484_v61 = vld [vmem:[%s7847_s4 + $0xc8] sm:$0xff]  ;;  %v6502_v63 = vpack.c.bf16 %v479_v60, %v475_v59  ;;  %v483_v1 = vld [vmem:[%s7847_s4 + $0xc0] sm:$0xff]  ;;  %v461_v55 = vld [vmem:[%s7847_s4 + $0x10] sm:$0xff] }
  0xae   : > { %v488_v62 = vld [vmem:[%s7847_s4 + $0xe8] sm:$0xff]  ;;  %v491_v11 = vld [vmem:[%s7847_s4 + $0x100] sm:$0xff]  ;;  %v465_v56 = vld [vmem:[%s7847_s4 + $0x30] sm:$0xff]  ;;  %p5899_p9 = pnand %p5898_p13, %p7979_p7 }
  0xaf   : > { %v6505_v0 = vpack.c.bf16 %v488_v62, %v484_v61  ;;  %v496_v5 = vld [vmem:[%s7847_s4 + $0x128] sm:$0xff]  ;;  %v495_v13 = vld [vmem:[%s7847_s4 + $0x120] sm:$0xff]  ;;  %v470_v59 = vld [vmem:[%s7847_s4 + $0x58] sm:$0xff]  ;;  %v6604_v61 = vpack.c.bf16 %v465_v56, %v461_v55 }
  0xb0   : > { %v6532_v14 = vpack.c.bf16 %v495_v13, %v491_v11  ;;  %v500_v15 = vld [vmem:[%s7847_s4 + $0x148] sm:$0xff]  ;;  %v499_v23 = vld [vmem:[%s7847_s4 + $0x140] sm:$0xff]  ;;  %v474_v60 = vld [vmem:[%s7847_s4 + $0x78] sm:$0xff]  ;;  %p5900_p11 = pneg %p5899_p9 }
  0xb1   : > { %v504_v18 = vld [vmem:[%s7847_s4 + $0x168] sm:$0xff]  ;;  %v503_v24 = vld [vmem:[%s7847_s4 + $0x160] sm:$0xff]  ;;  %7853 = vst [vmem:[#allocation25_spill] sm:$0xff] %v6604_v61  ;;  %v493_v55 = vld [vmem:[%s7847_s4 + $0x110] sm:$0xff] }
  0xb2   : > { %7848 = vst [vmem:[#allocation21_spill] sm:$0xff] %v6532_v14  ;;  %v6542_v19 = vpack.c.bf16 %v504_v18, %v500_v15  ;;  %v478_v15 = vld [vmem:[%s7847_s4 + $0x98] sm:$0xff]  ;;  %v497_v56 = vld [vmem:[%s7847_s4 + $0x130] sm:$0xff] }
  0xb3   : > { %v482_v18 = vld [vmem:[%s7847_s4 + $0xb8] sm:$0xff] }
  0xb4   : > { %7849 = vst [vmem:[#allocation22_spill] sm:$0xff] %v6542_v19 }
 0x178   : > { %v5021_v29 = vpop.f32.mrb[0].mxu1 }
 0x179   : > { %643 = vrot.lane.b32.xlu1 %v5021_v29, %s6036_s24  ;;  %v620_v30 = vpop.f32.mrb[1].mxu1  ;;  %v462_v29 = vld [vmem:[%s7847_s4 + $0x18] sm:$0xff] }
 0x17a   : > { %641 = vrot.lane.b32.xlu0 %v620_v30, %s6036_s24  ;;  %v466_v30 = vld [vmem:[%s7847_s4 + $0x38] sm:$0xff] }
 0x17c   : > { %v5024_v31 = vpop.f32.mrb[2].mxu1 }
 0x17d   : > { %651 = vrot.lane.b32.xlu1 %v5024_v31, %s6037_s26  ;;  %v630_v32 = vpop.f32.mrb[3].mxu1  ;;  %v6560_v31 = vpack.c.bf16 %v466_v30, %v462_v29  ;;  %v6631_v30 = vpack.c.bf16 %v482_v18, %v478_v15 }
 0x17e   : > { %649 = vrot.lane.b32.xlu0 %v630_v32, %s6037_s26 }
 0x17f   : > { %7851 = vst [vmem:[#allocation24_spill] sm:$0xff] %v6560_v31  ;;  %7856 = vst [vmem:[#allocation28_spill] sm:$0xff] %v6631_v30 }
 0x1eb   : > { %v644_v33 = vpop.permute.xlu1 %643 }
 0x1ec   : > { %v642_v34 = vpop.permute.xlu0 %641  ;;  %v657_v42 = vsel %vm655_vm5, %v6343_v3, %v644_v33  ;;  %v492_v3 = vld [vmem:[%s7847_s4 + $0x108] sm:$0xff] }
 0x1ed   : > { %v656_v37 = vsel %vm655_vm5, %v539_v2, %v642_v34  ;;  %v487_v2 = vld [vmem:[%s7847_s4 + $0xe0] sm:$0xff]  ;;  %v6523_v10 = vpack.c.bf16 %v496_v5, %v492_v3  ;;  %v469_v3 = vld [vmem:[%s7847_s4 + $0x50] sm:$0xff] }
 0x1ee   : > { %v6520_v9 = vpack.c.bf16 %v487_v2, %v483_v1  ;;  %v6608_v2 = vpack.c.bf16 %v474_v60, %v470_v59  ;;  %v473_v5 = vld [vmem:[%s7847_s4 + $0x70] sm:$0xff]  ;;  %v502_v59 = vld [vmem:[%s7847_s4 + $0x158] sm:$0xff] }
 0x1ef   : > { %v652_v41 = vpop.permute.xlu1 %651  ;;  %v506_v60 = vld [vmem:[%s7847_s4 + $0x178] sm:$0xff] }
 0x1f0   : > { %v650_v38 = vpop.permute.xlu0 %649  ;;  %v660_v43 = vsel %vm658_vm6, %v657_v42, %v652_v41  ;;  %v6578_v41 = vld [vmem:[%s7852_s29 + $0x8] sm:$0xff]  ;;  %v6040_v42 = vmov 1   ;;  %7854 = vst [vmem:[#allocation26_spill] sm:$0xff] %v6608_v2 }
 0x1f1   : > { %v659_v40 = vsel %vm658_vm6, %v656_v37, %v650_v38  ;;  %5737 = vset.pattern.permute.xlu1 %v6040_v42  ;;  %5736 = vset.pattern.permute.xlu0 %v6040_v42  ;;  %v490_v42 = vld [vmem:[%s7847_s4 + $0xf8] sm:$0xff] }
 0x1f2   : > { %4800 = vmatmul.mubr.msk.f32.vlgmr.msra.gmra.mrb[4].mxu1 %vm661_vm7, %v659_v40  ;;  %4804 = vmatmul.mubr.msk.f32.vlgmr.msra.gmra.mrb[0].mxu0 %vm661_vm7, %v659_v40 }
 0x1f3   : > { %757 = vmatprep.mubr.f32.mxu1 %v7733_v22  ;;  %834 = vmatprep.mubr.f32.mxu0 %v7733_v22 }
 0x1f4   : > { %5156 = vmatpush1.bf16.msk.msra.mxu1 %vm6376_vm4, %v6416_v39  ;;  %5160 = vmatpush3.bf16.msra.mxu0 %v5157_v28  ;;  %v6550_v28 = vpack.c.bf16 %v503_v24, %v499_v23  ;;  %v6626_v23 = vpack.c.bf16 %v473_v5, %v469_v3  ;;  %v501_v3 = vld [vmem:[%s7847_s4 + $0x150] sm:$0xff] }
 0x1f5   : > { %5162 = vmatprep.subr.bf16.mxu1 %v6455_v47  ;;  %v505_v5 = vld [vmem:[%s7847_s4 + $0x170] sm:$0xff] }
 0x1f6   : > { %4801 = vmatmul.mubr.msk.f32.gmra.mrb[6].mxu1 %vm661_vm7, %v660_v43  ;;  %4805 = vmatmul.mubr.msk.f32.gmra.mrb[2].mxu0 %vm661_vm7, %v660_v43  ;;  %7850 = vst [vmem:[#allocation23_spill] sm:$0xff] %v6550_v28  ;;  %7855 = vst [vmem:[#allocation27_spill] sm:$0xff] %v6626_v23 }
 0x1f7   : > { %905 = vmatprep.mubr.f32.mxu1 %v7733_v22  ;;  %5029 = vmatprep.mubr.msk.f32.mxu0 %vm541_vm1, %v6348_v4 }
 0x1fa   : > { %4808 = vmatmul.mubr.msk.f32.vlgmr.msra.gmra.mrb[8].mxu1 %vm661_vm7, %v659_v40  ;;  %5030 = vmatmul.mubr.msk.f32.vlgmr.msra.gmra.mrb[4].mxu0 %vm541_vm1, %v6356_v6 }
 0x1fb   : > { %911 = vmatprep.mubr.f32.mxu1 %v7733_v22  ;;  %5032 = vmatprep.mubr.msk.f32.mxu0 %vm541_vm1, %v6361_v7 }
 0x1fc   : > { %5164 = vmatpush1.bf16.msra.mxu1 %v6466_v51 }
 0x1fd   : > { %5166 = vmatprep.subr.bf16.mxu1 %v6468_v52 }
 0x1fe   : > { %4809 = vmatmul.mubr.msk.f32.gmra.mrb[10].mxu1 %vm661_vm7, %v660_v43  ;;  %5033 = vmatmul.mubr.msk.f32.gmra.mrb[6].mxu0 %vm541_vm1, %v6370_v8  ;;  %v531_v43 = vld [vmem:[%s7852_s29] sm:$0xff] }
 0x1ff   : > { %1096 = vmatprep.mubr.f32.mxu1 %v7733_v22  ;;  %5049 = vmatprep.mubr.msk.f32.mxu0 %vm541_vm1, %v6348_v4 }
 0x200   : > { %5168 = vmatpush1.bf16.msra.mxu1 %v6484_v57 }
 0x201   : > { %5170 = vmatprep.subr.bf16.mxu1 %v6487_v58 }
 0x204   : > { %5172 = vmatpush1.bf16.msra.mxu1 %v6502_v63 }
 0x205   : > { %5174 = vmatprep.subr.bf16.mxu1 %v6505_v0 }
 0x208   : > { %5176 = vmatpush1.bf16.msra.mxu1 %v6520_v9 }
 0x209   : > { %5178 = vmatprep.subr.bf16.mxu1 %v6523_v10 }
 0x20c   : > { %5180 = vmatpush1.bf16.msra.mxu1 %v6532_v14 }
 0x20d   : > { %5182 = vmatprep.subr.bf16.mxu1 %v6542_v19 }
 0x210   : > { %5184 = vmatpush1.bf16.msra.mxu1 %v6550_v28 }
 0x211   : > { %5186 = vmatprep.subr.bf16.mxu1 %v6560_v31 }
 0x2c5   : > { %v6562_v32 = vpop.f32.mrb[0].mxu0 }
 0x2c6   : > { %v6564_v33 = vpop.f32.mrb[1].mxu0 }
 0x2c9   : > { %v6567_v34 = vpop.f32.mrb[2].mxu0 }
 0x2ca   : > { %v6569_v35 = vpop.f32.mrb[3].mxu0 }
 0x2cd   : > { %v5031_v36 = vpop.f32.mrb[4].mxu0 }
 0x2ce   : > { %v984_v37 = vpop.f32.mrb[5].mxu0 }
 0x2cf   : > { %1005 = vrot.lane.b32.xlu0 %v984_v37, %s6038_s27  ;;  %v481_v37 = vld [vmem:[%s7847_s4 + $0xb0] sm:$0xff] }
 0x2d1   : > { %v5034_v38 = vpop.f32.mrb[6].mxu0 }
 0x2d2   : > { %v994_v40 = vpop.f32.mrb[7].mxu0 }
 0x2d3   : > { %1007 = vrot.lane.b32.xlu0 %v5031_v36, %s6038_s27  ;;  %1013 = vrot.lane.b32.xlu1 %v994_v40, %s6039_s7  ;;  %v477_v36 = vld [vmem:[%s7847_s4 + $0x90] sm:$0xff]  ;;  %v486_v40 = vld [vmem:[%s7847_s4 + $0xd8] sm:$0xff] }
 0x2d7   : > { %1015 = vrot.lane.b32.xlu1 %v5034_v38, %s6039_s7  ;;  %1207 = vperm.xlu0 %5736, %v531_v43  }
 0x2db   : > { %1211 = vperm.xlu1 %5737, %v6578_v41   ;;  %5739 = vset.pattern.permute.xlu0 %v6041_v44 }
 0x2dc   : > { %1243 = vperm.xlu0 %5739, %v6578_v41  }
 0x2df   : > { %5738 = vset.pattern.permute.xlu1 %v6041_v44  ;;  %v6652_v44 = vpack.c.bf16 %v490_v42, %v486_v40 }
 0x2e0   : > { %1239 = vperm.xlu1 %5738, %v531_v43   ;;  %5741 = vset.pattern.permute.xlu0 %v6043_v46 }
 0x2e1   : > { %1303 = vperm.xlu0 %5741, %v531_v43   ;;  %7858 = vst [vmem:[#allocation30_spill] sm:$0xff] %v6652_v44 }
 0x2e4   : > { %5740 = vset.pattern.permute.xlu1 %v6042_v45  ;;  %v485_v45 = vld [vmem:[%s7847_s4 + $0xd0] sm:$0xff] }
 0x2e5   : > { %1271 = vperm.xlu1 %5740, %v531_v43   ;;  %5744 = vset.pattern.permute.xlu0 %v6044_v48 }
 0x2e6   : > { %1201 = vperm.xlu0 %5744, %v6578_v41  }
 0x2e9   : > { %1275 = vperm.xlu1 %5740, %v6578_v41  }
 0x2ea   : > { %5746 = vset.pattern.permute.xlu0 %v6045_v49 }
 0x2eb   : > { %1259 = vperm.xlu0 %5746, %v531_v43  }
 0x2ed   : > { %5742 = vset.pattern.permute.xlu1 %v6043_v46 }
 0x2ee   : > { %1307 = vperm.xlu1 %5742, %v6578_v41  }
 0x2ef   : > { %5749 = vset.pattern.permute.xlu0 %v6046_v50 }
 0x2f2   : > { %5743 = vset.pattern.permute.xlu1 %v6044_v48  ;;  %v489_v48 = vld [vmem:[%s7847_s4 + $0xf0] sm:$0xff] }
 0x2f3   : > { %1196 = vperm.xlu1 %5743, %v531_v43  }
 0x2f7   : > { %5745 = vset.pattern.permute.xlu1 %v6047_v53  ;;  %v6667_v53 = vpack.c.bf16 %v489_v48, %v485_v45 }
 0x2f8   : > { %1227 = vperm.xlu1 %5745, %v531_v43  }
 0x2f9   : > { %7859 = vst [vmem:[#allocation31_spill] sm:$0xff] %v6667_v53 }
 0x2fc   : > { %1231 = vperm.xlu1 %5745, %v6578_v41  }
 0x300   : > { %5747 = vset.pattern.permute.xlu1 %v6045_v49  ;;  %v494_v49 = vld [vmem:[%s7847_s4 + $0x118] sm:$0xff] }
 0x301   : > { %1263 = vperm.xlu1 %5747, %v6578_v41  }
 0x305   : > { %5748 = vset.pattern.permute.xlu1 %v6046_v50  ;;  %v498_v50 = vld [vmem:[%s7847_s4 + $0x138] sm:$0xff] }
 0x306   : > { %1291 = vperm.xlu1 %5748, %v531_v43   ;;  %v6648_v43 = vpack.c.bf16 %v481_v37, %v477_v36 }
 0x308   : > { %7857 = vst [vmem:[#allocation29_spill] sm:$0xff] %v6648_v43 }
 0x341   : > { %v1006_v54 = vpop.permute.xlu0 %1005 }
 0x342   : > { %v1020_v62 = vsel %vm1019_vm8, %v6400_v25, %v1006_v54  ;;  %v6670_v54 = vpack.c.bf16 %v498_v50, %v494_v49 }
 0x344   : > { %7860 = vst [vmem:[#allocation32_spill] sm:$0xff] %v6670_v54 }
 0x345   : > { %v1014_v1 = vpop.permute.xlu1 %1013  ;;  %v1008_v11 = vpop.permute.xlu0 %1007 }
 0x346   : > { %v1023_v13 = vsel %vm1022_vm9, %v1020_v62, %v1014_v1  ;;  %v1021_v24 = vsel %vm1019_vm8, %v6404_v27, %v1008_v11  ;;  %v6685_v62 = vpack.c.bf16 %v497_v56, %v493_v55  ;;  %v6688_v1 = vpack.c.bf16 %v506_v60, %v502_v59 }
 0x347   : > { %4814 = vmatmul.mubr.msk.f32.vlgmr.msra.gmra.mrb[4].mxu1 %vm1025_vm10, %v1023_v13  ;;  %v6697_v11 = vpack.c.bf16 %v505_v5, %v501_v3 }
 0x348   : > { %5188 = vmatpush1.bf16.msra.mxu1 %v6604_v61  ;;  %1102 = vmatprep.mubr.f32.mxu1 %v7733_v22  ;;  %7861 = vst [vmem:[#allocation33_spill] sm:$0xff] %v6685_v62  ;;  %7862 = vst [vmem:[#allocation34_spill] sm:$0xff] %v6688_v1 }
 0x349   : > { %v1016_v29 = vpop.permute.xlu1 %1015  ;;  %5190 = vmatprep.subr.bf16.mxu1 %v6608_v2  ;;  %7863 = vst [vmem:[#allocation35_spill] sm:$0xff] %v6697_v11 }
 0x34a   : > { %v1024_v38 = vsel %vm1022_vm9, %v1021_v24, %v1016_v29 }
 0x34b   : > { %4815 = vmatmul.mubr.msk.f32.gmra.mrb[6].mxu1 %vm1025_vm10, %v1024_v38 }
 0x34c   : > { %5192 = vmatpush1.bf16.msra.mxu1 %v6626_v23  ;;  %1173 = vmatprep.mubr.f32.mxu1 %v7733_v22 }
 0x34d   : > { %5194 = vmatprep.subr.bf16.mxu1 %v6631_v30 }
 0x350   : > { %5196 = vmatpush1.bf16.msra.mxu1 %v6648_v43 }
 0x351   : > { %5198 = vmatprep.subr.bf16.mxu1 %v6652_v44 }
 0x354   : > { %5200 = vmatpush1.bf16.msra.mxu1 %v6667_v53 }
 0x355   : > { %5202 = vmatprep.subr.bf16.mxu1 %v6670_v54 }
 0x356   : > { %v6708_v18 = vpop.permute.xlu0 %1207 }
 0x358   : > { %5204 = vmatpush1.bf16.msra.mxu1 %v6685_v62 }
 0x359   : > { %5206 = vmatprep.subr.bf16.mxu1 %v6688_v1 }
 0x35a   : > { %v6706_v15 = vpop.permute.xlu1 %1211 }
 0x35b   : > { %v6718_v45 = vpop.permute.xlu0 %1243 }
 0x35c   : > { %5208 = vmatpush1.bf16.msra.mxu1 %v6697_v11 }
 0x35f   : > { %4816 = vmatmul.mubr.msk.f32.vlgmr.msra.gmra.mrb[12].mxu1 %vm1025_vm10, %v1023_v13  ;;  %v6712_v37 = vpop.permute.xlu1 %1239 }
 0x360   : > { %1179 = vmatprep.mubr.f32.mxu1 %v7733_v22 }
 0x363   : > { %4817 = vmatmul.mubr.msk.f32.gmra.mrb[14].mxu1 %vm1025_vm10, %v1024_v38 }
 0x364   : > { %5039 = vmatprep.mubr.msk.f32.mxu1 %vm541_vm1, %v6348_v4  ;;  %v6724_v49 = vpop.permute.xlu1 %1271 }
 0x368   : > { %v6729_v3 = vpop.permute.xlu1 %1275 }
 0x41a   : > { %v1098_v24 = vpop.f32.mrb[4].mxu1 }
 0x41b   : > { %v1214_v29 = vmul.f32 %v6708_v18, %v1098_v24  ;;  %v1100_v36 = vpop.f32.mrb[5].mxu1 }
 0x41c   : > { %v1246_v40 = vmul.f32 %v6712_v37, %v1100_v36 }
 0x41d   : > { %1218 = vrot.lane.b32.xlu1 %v1214_v29, %s6039_s7 }
 0x41e   : > { %v1104_v13 = vpop.f32.mrb[6].mxu1 }
 0x41f   : > { %v1215_v38 = vmul.f32 %v6706_v15, %v1104_v13  ;;  %v1106_v42 = vpop.f32.mrb[7].mxu1 }
 0x420   : > { %v1247_v48 = vmul.f32 %v6718_v45, %v1106_v42 }
 0x421   : > { %1250 = vrot.lane.b32.xlu1 %v1246_v40, %s6039_s7  ;;  %1220 = vrot.lane.b32.xlu0 %v1215_v38, %s6039_s7  ;;  %v6733_v40 = vpop.permute.xlu0 %1303 }
 0x425   : > { %1295 = vperm.xlu0 %5749, %v6578_v41   ;;  %1252 = vrot.lane.b32.xlu1 %v1247_v48, %s6039_s7 }
 0x429   : > { %5750 = vset.pattern.permute.xlu0 %v6043_v46 }
 0x432   : > { %v1175_v50 = vpop.f32.mrb[12].mxu1 }
 0x433   : > { %v1188_v55 = vadd.f32 %v1175_v50, %v6562_v32  ;;  %v1177_v56 = vpop.f32.mrb[13].mxu1 }
 0x434   : > { %v1189_v59 = vadd.f32 %v1177_v56, %v6564_v33  ;;  %v6740_v33 = vpop.permute.xlu1 %1307 }
 0x435   : > { %v1278_v60 = vmul.f32 %v6724_v49, %v1188_v55 }
 0x436   : > { %v1181_v5 = vpop.f32.mrb[14].mxu1  ;;  %v1310_v38 = vmul.f32 %v6733_v40, %v1189_v59 }
 0x437   : > { %v1192_v29 = vadd.f32 %v1181_v5, %v6567_v34  ;;  %1282 = vrot.lane.b32.xlu0 %v1278_v60, %s6039_s7  ;;  %v1183_v41 = vpop.f32.mrb[15].mxu1  ;;  %v6756_v60 = vpop.permute.xlu0 %1201 }
 0x438   : > { %v1193_v46 = vadd.f32 %v1183_v41, %v6569_v35  ;;  %v6748_v34 = vpop.permute.xlu1 %1196  ;;  %7867 = vst [vmem:[#allocation39_spill] sm:$0xff] %v6756_v60  ;;  %v1205_v11 = vmul.f32 %v6756_v60, %v1104_v13 }
 0x439   : > { %v1279_v32 = vmul.f32 %v6729_v3, %v1192_v29  ;;  %7864 = vst [vmem:[#allocation36_spill] sm:$0xff] %v6748_v34  ;;  %v1204_v41 = vmul.f32 %v6748_v34, %v1098_v24 }
 0x43a   : > { %v1311_v48 = vmul.f32 %v6740_v33, %v1193_v46 }
 0x43b   : > { %1314 = vrot.lane.b32.xlu0 %v1310_v38, %s6039_s7  ;;  %1284 = vrot.lane.b32.xlu1 %v1279_v32, %s6039_s7  ;;  %v6761_v38 = vpop.permute.xlu0 %1259 }
 0x43c   : > { %v6750_v35 = vpop.permute.xlu1 %1227  ;;  %v1266_v30 = vmul.f32 %v6761_v38, %v1188_v55 }
 0x43d   : > { %7865 = vst [vmem:[#allocation37_spill] sm:$0xff] %v6750_v35 }
 0x43f   : > { %1316 = vrot.lane.b32.xlu1 %v1311_v48, %s6039_s7  ;;  %1338 = vrot.lane.b32.xlu0 %v6400_v25, %s6038_s27  ;;  %v1234_v48 = vmul.f32 %v6750_v35, %v1100_v36 }
 0x440   : > { %v6752_v50 = vpop.permute.xlu1 %1231 }
 0x441   : > { %7866 = vst [vmem:[#allocation38_spill] sm:$0xff] %v6752_v50  ;;  %v1235_v53 = vmul.f32 %v6752_v50, %v1106_v42 }
 0x443   : > { %1340 = vrot.lane.b32.xlu1 %v6404_v27, %s6038_s27 }
 0x444   : > { %v6754_v56 = vpop.permute.xlu1 %1263 }
 0x445   : > { %v1267_v61 = vmul.f32 %v6754_v56, %v1192_v29 }
 0x448   : > { %v6758_v5 = vpop.permute.xlu1 %1291 }
 0x449   : > { %7868 = vst [vmem:[#allocation40_spill] sm:$0xff] %v6758_v5 }
 0x48f   : > { %v1219_v32 = vpop.permute.xlu1 %1218 }
 0x490   : > { %v1224_v22 = vadd.f32 %v1219_v32, %v1204_v41 }
 0x492   : > { %v1236_v1 = vadd.f32 %v1234_v48, %v1224_v22  ;;  %v1298_v22 = vmul.f32 %v6758_v5, %v1189_v59 }
 0x493   : > { %v1251_v62 = vpop.permute.xlu1 %1250  ;;  %v1221_v54 = vpop.permute.xlu0 %1220 }
 0x494   : > { %v1256_v44 = vadd.f32 %v1251_v62, %v1236_v1  ;;  %v1225_v43 = vadd.f32 %v1221_v54, %v1205_v11  ;;  %v6774_v54 = vld [vmem:[%s7870_s22] sm:$0xff] }
 0x495   : > { %7871 = vst [vmem:[#allocation42_spill] sm:$0xff] %v6774_v54 }
 0x496   : > { %v1237_v23 = vadd.f32 %v1235_v53, %v1225_v43  ;;  %v1268_v2 = vadd.f32 %v1266_v30, %v1256_v44 }
 0x497   : > { %v1253_v24 = vpop.permute.xlu1 %1252 }
 0x498   : > { %v1257_v31 = vadd.f32 %v1253_v24, %v1237_v23 }
 0x49a   : > { %v1269_v28 = vadd.f32 %v1267_v61, %v1257_v31 }
 0x4a4   : > { %v6768_v36 = vpop.permute.xlu0 %1295 }
 0x4a5   : > { %7869 = vst [vmem:[#allocation41_spill] sm:$0xff] %v6768_v36  ;;  %v1299_v53 = vmul.f32 %v6768_v36, %v1193_v46 }
 0x4a9   : > { %v1283_v41 = vpop.permute.xlu0 %1282 }
 0x4aa   : > { %v1288_v13 = vadd.f32 %v1283_v41, %v1268_v2  ;;  %v6781_v2 = vld [vmem:[%s7870_s22 + $0x8] sm:$0xff] }
 0x4ab   : > { %7872 = vst [vmem:[#allocation43_spill] sm:$0xff] %v6781_v2 }
 0x4ac   : > { %v1300_v32 = vadd.f32 %v1298_v22, %v1288_v13 }
 0x4ad   : > { %v1315_v62 = vpop.permute.xlu0 %1314  ;;  %v1285_v43 = vpop.permute.xlu1 %1284 }
 0x4ae   : > { %v1320_v30 = vadd.f32 %v1315_v62, %v1300_v32  ;;  %v1289_v44 = vadd.f32 %v1285_v43, %v1269_v28 }
 0x4b0   : > { %v1322_v31 = vadd.f32 %v1320_v30, %v6774_v54  ;;  %v1301_v61 = vadd.f32 %v1299_v53, %v1289_v44  ;;  %v7873_v44 = vmov 0.0   ;;  %v508_v53 = vld [vmem:[#allocation8 + $0x8] sm:$0xff]  ;;  %v525_v54 = vld [vmem:[#allocation8 + $0x90] sm:$0xff] }
 0x4b1   : > { %v1317_v23 = vpop.permute.xlu1 %1316  ;;  %v1339_v48 = vpop.permute.xlu0 %1338 }
 0x4b2   : > { %v4818_v1 = vmul.f32 -1.442695, %v1322_v31  ;;  %v1321_v11 = vadd.f32 %v1317_v23, %v1301_v61  ;;  %v510_v31 = vld [vmem:[#allocation8 + $0x18] sm:$0xff]  ;;  %v507_v61 = vld [vmem:[#allocation8] sm:$0xff] }
 0x4b3   : > { %v6805_v23 = vpack.c.bf16 %v510_v31, %v508_v53  ;;  %v520_v53 = vld [vmem:[#allocation8 + $0x68] sm:$0xff]  ;;  %v522_v31 = vld [vmem:[#allocation8 + $0x78] sm:$0xff] }
 0x4b4   : > { %5751 = vpow2.f32 %v4818_v1  ;;  %v1323_v42 = vadd.f32 %v1321_v11, %v6781_v2  ;;  %v509_v1 = vld [vmem:[#allocation8 + $0x10] sm:$0xff]  ;;  %v512_v11 = vld [vmem:[#allocation8 + $0x28] sm:$0xff]  ;;  %v523_v2 = vld [vmem:[#allocation8 + $0x80] sm:$0xff] }
 0x4b5   : > { %v1341_v13 = vpop.permute.xlu1 %1340  ;;  %7874 = vst [vmem:[#allocation44_spill] sm:$0xff] %v6805_v23 }
 0x4b6   : > { %v4819_v55 = vmul.f32 -1.442695, %v1323_v42  ;;  %v514_v42 = vld [vmem:[#allocation8 + $0x38] sm:$0xff] }
 0x4b8   : > { %5753 = vpow2.f32 %v4819_v55  ;;  %v6807_v55 = vpack.c.bf16 %v509_v1, %v507_v61  ;;  %v6822_v1 = vpack.c.bf16 %v522_v31, %v520_v53  ;;  %v530_v53 = vld [vmem:[#allocation8 + $0xb8] sm:$0xff] }
 0x4ba   : > { %7875 = vst [vmem:[#allocation45_spill] sm:$0xff] %v6807_v55  ;;  %7880 = vst [vmem:[#allocation50_spill] sm:$0xff] %v6822_v1 }
 0x4be   : > { %v5752_v59 = vpop.eup %5751 }
 0x4bf   : > { %v1330_v28 = vadd.f32 1.0, %v5752_v59  ;;  %v6809_v59 = vpack.c.bf16 %v514_v42, %v512_v11  ;;  %v519_v11 = vld [vmem:[#allocation8 + $0x60] sm:$0xff]  ;;  %v521_v42 = vld [vmem:[#allocation8 + $0x70] sm:$0xff] }
 0x4c1   : > { %5755 = vrcp.f32 %v1330_v28  ;;  %7876 = vst [vmem:[#allocation46_spill] sm:$0xff] %v6809_v59  ;;  %v511_v28 = vld [vmem:[#allocation8 + $0x20] sm:$0xff] }
 0x4c2   : > { %v5754_v29 = vpop.eup %5753 }
 0x4c3   : > { %v1331_v46 = vadd.f32 1.0, %v5754_v29  ;;  %v513_v29 = vld [vmem:[#allocation8 + $0x30] sm:$0xff] }
 0x4c5   : > { %5757 = vrcp.f32 %v1331_v46  ;;  %v516_v46 = vld [vmem:[#allocation8 + $0x48] sm:$0xff] }
 0x4cb   : > { %v6784_v24 = vpop.eup %5755 }
 0x4cc   : > { %v1344_v41 = vmul.f32 %v6784_v24, %v1339_v48  ;;  %v518_v48 = vld [vmem:[#allocation8 + $0x58] sm:$0xff] }
 0x4ce   : > { %1348 = vrot.lane.b32.xlu0 %v1344_v41, %s6048_s12  ;;  %v6813_v41 = vpack.c.bf16 %v513_v29, %v511_v28  ;;  %v524_v28 = vld [vmem:[#allocation8 + $0x88] sm:$0xff]  ;;  %v526_v29 = vld [vmem:[#allocation8 + $0x98] sm:$0xff] }
 0x4cf   : > { %v6788_v22 = vpop.eup %5757 }
 0x4d0   : > { %v1345_v32 = vmul.f32 %v6788_v22, %v1341_v13  ;;  %7877 = vst [vmem:[#allocation47_spill] sm:$0xff] %v6813_v41  ;;  %v6816_v13 = vpack.c.bf16 %v518_v48, %v516_v46  ;;  %v6825_v46 = vpack.c.bf16 %v521_v42, %v519_v11  ;;  %v6828_v48 = vpack.c.bf16 %v526_v29, %v524_v28  ;;  %v527_v11 = vld [vmem:[#allocation8 + $0xa0] sm:$0xff]  ;;  %v529_v42 = vld [vmem:[#allocation8 + $0xb0] sm:$0xff] }
 0x4d2   : > { %1350 = vrot.lane.b32.xlu1 %v1345_v32, %s6048_s12  ;;  %7878 = vst [vmem:[#allocation48_spill] sm:$0xff] %v6816_v13  ;;  %v515_v32 = vld [vmem:[#allocation8 + $0x40] sm:$0xff]  ;;  %7881 = vst [vmem:[#allocation51_spill] sm:$0xff] %v6825_v46 }
 0x4d3   : > { %7882 = vst [vmem:[#allocation52_spill] sm:$0xff] %v6828_v48 }
 0x540   : > { %v6792_v62 = vpop.permute.xlu0 %1348 }
 0x544   : > { %v6794_v43 = vpop.permute.xlu1 %1350 }
 0x545   : > { %v5209_v30 = vpack.c.bf16 %v6794_v43, %v6792_v62 }
 0x547   : > { %5210 = vmatprep.subr.bf16.mxu1 %v5209_v30 }
 0x548   : > { %5212 = vmatpush3.bf16.msra.mxu1 %v5209_v30  ;;  %v517_v30 = vld [vmem:[#allocation8 + $0x50] sm:$0xff] }
 0x549   : > { %5214 = vmatprep.subr.bf16.mxu1 %v6805_v23  ;;  %v6819_v61 = vpack.c.bf16 %v517_v30, %v515_v32  ;;  %v6831_v32 = vpack.c.bf16 %v525_v54, %v523_v2  ;;  %v528_v30 = vld [vmem:[#allocation8 + $0xa8] sm:$0xff] }
 0x54a   : > { %v6835_v31 = vpack.c.bf16 %v530_v53, %v528_v30 }
 0x54b   : > { %5040 = vmatmul.mubr.msk.f32.vlgmr.msra.gmra.mrb[16].mxu1 %vm541_vm1, %v6356_v6  ;;  %7879 = vst [vmem:[#allocation49_spill] sm:$0xff] %v6819_v61  ;;  %7883 = vst [vmem:[#allocation53_spill] sm:$0xff] %v6831_v32 }
 0x54c   : > { %5042 = vmatprep.mubr.msk.f32.mxu1 %vm541_vm1, %v6361_v7  ;;  %5216 = vmatpush1.bf16.msra.mxu1 %v6807_v55  ;;  %7884 = vst [vmem:[#allocation54_spill] sm:$0xff] %v6835_v31 }
 0x54d   : > { %5218 = vmatprep.subr.bf16.mxu1 %v6809_v59 }
 0x54f   : > { %5043 = vmatmul.mubr.msk.f32.gmra.mrb[18].mxu1 %vm541_vm1, %v6370_v8 }
 0x550   : > { %1529 = vmatprep.mubr.f32.mxu1 %v7873_v44  ;;  %5220 = vmatpush1.bf16.msra.mxu1 %v6813_v41 }
 0x551   : > { %5222 = vmatprep.subr.bf16.mxu1 %v6816_v13 }
 0x554   : > { %5224 = vmatpush1.bf16.msra.mxu1 %v6819_v61  ;;  %v6837_v61 = vpack.c.bf16 %v529_v42, %v527_v11 }
 0x555   : > { %5226 = vmatprep.subr.bf16.mxu1 %v6822_v1 }
 0x556   : > { %7885 = vst [vmem:[#allocation55_spill] sm:$0xff] %v6837_v61 }
 0x558   : > { %5228 = vmatpush1.bf16.msra.mxu1 %v6825_v46 }
 0x559   : > { %5230 = vmatprep.subr.bf16.mxu1 %v6828_v48 }
 0x55c   : > { %5232 = vmatpush1.bf16.msra.mxu1 %v6831_v32 }
 0x55d   : > { %5234 = vmatprep.subr.bf16.mxu1 %v6835_v31 }
 0x560   : > { %5236 = vmatpush1.bf16.msra.mxu1 %v6837_v61 }
 0x61e   : > { %v5041_v28 = vpop.f32.mrb[16].mxu1 }
 0x61f   : > { %v1420_v29 = vpop.f32.mrb[17].mxu1 }
 0x620   : > { %1441 = vrot.lane.b32.xlu0 %v1420_v29, %s6038_s27 }
 0x622   : > { %v5044_v54 = vpop.f32.mrb[18].mxu1 }
 0x623   : > { %v1430_v2 = vpop.f32.mrb[19].mxu1 }
 0x624   : > { %1443 = vrot.lane.b32.xlu0 %v5041_v28, %s6038_s27  ;;  %1449 = vrot.lane.b32.xlu1 %v1430_v2, %s6039_s7 }
 0x628   : > { %1451 = vrot.lane.b32.xlu1 %v5044_v54, %s6039_s7  ;;  %v6860_v54 = vld [vmem:[%s6336_s6 + $0x18] sm:$0xff] }
 0x692   : > { %v1442_v30 = vpop.permute.xlu0 %1441 }
 0x693   : > { %v1455_v53 = vsel %vm1019_vm8, %v6792_v62, %v1442_v30  ;;  %v6857_v62 = vld [vmem:[%s6336_s6 + $0x10] sm:$0xff] }
 0x696   : > { %v1450_v11 = vpop.permute.xlu1 %1449  ;;  %v1444_v42 = vpop.permute.xlu0 %1443 }
 0x697   : > { %v1457_v61 = vsel %vm1022_vm9, %v1455_v53, %v1450_v11  ;;  %v1456_v28 = vsel %vm1019_vm8, %v6794_v43, %v1444_v42 }
 0x698   : > { %4824 = vmatmul.mubr.msk.f32.vlgmr.msra.gmra.mrb[8].mxu1 %vm1025_vm10, %v1457_v61  ;;  %v5237_v61 = vpack.c.bf16 %v6860_v54, %v6857_v62 }
 0x699   : > { %1535 = vmatprep.mubr.f32.mxu1 %v7873_v44 }
 0x69a   : > { %v1452_v29 = vpop.permute.xlu1 %1451  ;;  %5238 = vmatprep.subr.bf16.mxu0 %v5237_v61 }
 0x69b   : > { %v1458_v2 = vsel %vm1022_vm9, %v1456_v28, %v1452_v29  ;;  %5240 = vmatpush3.bf16.msra.mxu0 %v5237_v61 }
 0x69c   : > { %4825 = vmatmul.mubr.msk.f32.gmra.mrb[10].mxu1 %vm1025_vm10, %v1458_v2  ;;  %5243 = vmatprep.subr.msk.bf16.mxu0 %vm6376_vm4, %v6374_v12 }
 0x69d   : > { %5059 = vmatprep.mubr.msk.f32.mxu1 %vm541_vm1, %v6348_v4 }
 0x69e   : > { %5050 = vmatmul.mubr.msk.f32.vlgmr.msra.gmra.mrb[8].mxu0 %vm541_vm1, %v6356_v6 }
 0x69f   : > { %5052 = vmatprep.mubr.msk.f32.mxu0 %vm541_vm1, %v6361_v7  ;;  %5246 = vmatpush1.bf16.msk.msra.mxu0 %vm6376_vm4, %v6385_v20 }
 0x6a0   : > { %5249 = vmatprep.subr.msk.bf16.mxu0 %vm6376_vm4, %v6380_v17 }
 0x6a2   : > { %5053 = vmatmul.mubr.msk.f32.gmra.mrb[10].mxu0 %vm541_vm1, %v6370_v8 }
 0x6a3   : > { %1816 = vmatprep.mubr.f32.mxu0 %v7873_v44 }
 0x76b   : > { %v1531_v4 = vpop.f32.mrb[8].mxu1 }
 0x76c   : > { %v1533_v43 = vpop.f32.mrb[9].mxu1  ;;  %v1548_v6 = vmul.f32 %v1531_v4, %v6708_v18  ;;  %v1560_v53 = vmul.f32 %v1531_v4, %v6750_v35  ;;  %v1572_v8 = vmul.f32 %v1531_v4, %v6712_v37 }
 0x76d   : > { %v1588_v28 = vmul.f32 %v1533_v43, %v6724_v49  ;;  %v1600_v2 = vmul.f32 %v1533_v43, %v6758_v5 }
 0x76e   : > { %1552 = vrot.lane.b32.xlu0 %v1548_v6, %s6048_s12  ;;  %v1612_v6 = vmul.f32 %v1533_v43, %v6733_v40 }
 0x76f   : > { %v1537_v7 = vpop.f32.mrb[10].mxu1 }
 0x770   : > { %v1539_v30 = vpop.f32.mrb[11].mxu1  ;;  %v1549_v11 = vmul.f32 %v1537_v7, %v6706_v15  ;;  %v1561_v42 = vmul.f32 %v1537_v7, %v6752_v50  ;;  %v1573_v29 = vmul.f32 %v1537_v7, %v6718_v45 }
 0x771   : > { %v1589_v61 = vmul.f32 %v1539_v30, %v6729_v3 }
 0x772   : > { %1564 = vrot.lane.b32.xlu0 %v1560_v53, %s6039_s7  ;;  %1554 = vrot.lane.b32.xlu1 %v1549_v11, %s6048_s12  ;;  %v1601_v53 = vmul.f32 %v1539_v30, %v6768_v36  ;;  %v1613_v11 = vmul.f32 %v1539_v30, %v6740_v33 }
 0x776   : > { %1576 = vrot.lane.b32.xlu0 %v1572_v8, %s6038_s27  ;;  %1566 = vrot.lane.b32.xlu1 %v1561_v42, %s6039_s7  ;;  %v5051_v42 = vpop.f32.mrb[8].mxu0 }
 0x77a   : > { %1592 = vrot.lane.b32.xlu0 %v1588_v28, %s6048_s12  ;;  %1578 = vrot.lane.b32.xlu1 %v1573_v29, %s6038_s27  ;;  %v1707_v28 = vpop.f32.mrb[9].mxu0  ;;  %v1546_v29 = vmul.f32 %v1531_v4, %v6748_v34 }
 0x77b   : > { %v5054_v20 = vpop.f32.mrb[10].mxu0 }
 0x77c   : > { %v1717_v12 = vpop.f32.mrb[11].mxu0 }
 0x77e   : > { %1604 = vrot.lane.b32.xlu0 %v1600_v2, %s6039_s7  ;;  %1594 = vrot.lane.b32.xlu1 %v1589_v61, %s6048_s12 }
 0x782   : > { %1616 = vrot.lane.b32.xlu0 %v1612_v6, %s6038_s27  ;;  %1606 = vrot.lane.b32.xlu1 %v1601_v53, %s6039_s7  ;;  %v1547_v53 = vmul.f32 %v1537_v7, %v6756_v60 }
 0x786   : > { %1618 = vrot.lane.b32.xlu1 %v1613_v11, %s6038_s27  ;;  %1728 = vrot.lane.b32.xlu0 %v1707_v28, %s6036_s24  ;;  %v1584_v28 = vmul.f32 %v1533_v43, %v6761_v38 }
 0x78a   : > { %1730 = vrot.lane.b32.xlu0 %v5051_v42, %s6036_s24  ;;  %1736 = vrot.lane.b32.xlu1 %v1717_v12, %s6037_s26  ;;  %v1585_v42 = vmul.f32 %v1539_v30, %v6754_v56 }
 0x78e   : > { %1738 = vrot.lane.b32.xlu1 %v5054_v20, %s6037_s26 }
 0x7e0   : > { %v1553_v8 = vpop.permute.xlu0 %1552 }
 0x7e1   : > { %v1558_v17 = vadd.f32 %v1553_v8, %v1546_v29 }
 0x7e4   : > { %v1565_v2 = vpop.permute.xlu0 %1564  ;;  %v1555_v61 = vpop.permute.xlu1 %1554 }
 0x7e5   : > { %v1570_v6 = vadd.f32 %v1565_v2, %v1558_v17  ;;  %v1559_v5 = vadd.f32 %v1555_v61, %v1547_v53  ;;  %v6915_v61 = vld [vmem:[%s7886_s25] sm:$0xff]  ;;  %v1630_v53 = vsub.f32 1.0, %v6784_v24 }
 0x7e8   : > { %v1577_v11 = vpop.permute.xlu0 %1576  ;;  %v1567_v36 = vpop.permute.xlu1 %1566 }
 0x7e9   : > { %v1582_v50 = vadd.f32 %v1577_v11, %v1570_v6  ;;  %v1571_v35 = vadd.f32 %v1567_v36, %v1559_v5 }
 0x7eb   : > { %v1586_v4 = vadd.f32 %v1584_v28, %v1582_v50 }
 0x7ec   : > { %v1593_v8 = vpop.permute.xlu0 %1592  ;;  %v1579_v29 = vpop.permute.xlu1 %1578 }
 0x7ed   : > { %v1583_v34 = vadd.f32 %v1579_v29, %v1571_v35  ;;  %v1598_v60 = vadd.f32 %v1593_v8, %v1586_v4  ;;  %v1628_v4 = vmul.f32 %v6784_v24, %v6400_v25  ;;  %v1631_v8 = vsub.f32 1.0, %v6788_v22  ;;  %v6945_v24 = vld [vmem:[%s7709_s2 + $0x8] sm:$0xff] }
 0x7ef   : > { %v1587_v17 = vadd.f32 %v1585_v42, %v1583_v34  ;;  %v6921_v34 = vld [vmem:[%s7886_s25 + $0x8] sm:$0xff] }
 0x7f0   : > { %v1605_v2 = vpop.permute.xlu0 %1604  ;;  %v1595_v7 = vpop.permute.xlu1 %1594 }
 0x7f1   : > { %v1610_v12 = vadd.f32 %v1605_v2, %v1598_v60  ;;  %v1599_v50 = vadd.f32 %v1595_v7, %v1587_v17  ;;  %v1629_v2 = vmul.f32 %v6788_v22, %v6404_v27  ;;  %v6952_v27 = vld [vmem:[%s7709_s2 + $0x10] sm:$0xff]  ;;  %v6959_v22 = vld [vmem:[%s7709_s2 + $0x18] sm:$0xff] }
 0x7f4   : > { %v1617_v43 = vpop.permute.xlu0 %1616  ;;  %v1607_v5 = vpop.permute.xlu1 %1606 }
 0x7f5   : > { %v1622_v36 = vadd.f32 %v1617_v43, %v1610_v12  ;;  %v1611_v6 = vadd.f32 %v1607_v5, %v1599_v50  ;;  %v6966_v12 = vld [vmem:[%s7709_s2] sm:$0xff] }
 0x7f7   : > { %v1624_v20 = vadd.f32 %v1622_v36, %v6915_v61 }
 0x7f8   : > { %v1619_v35 = vpop.permute.xlu1 %1618  ;;  %v1729_v43 = vpop.permute.xlu0 %1728 }
 0x7f9   : > { %5759 = vtanh.f32 %v1624_v20  ;;  %v1623_v60 = vadd.f32 %v1619_v35, %v1611_v6  ;;  %v1742_v50 = vsel %vm655_vm5, %v6857_v62, %v1729_v43 }
 0x7fb   : > { %v1625_v30 = vadd.f32 %v1623_v60, %v6921_v34  ;;  %v7888_v60 = vld [vmem:[#allocation24_spill] sm:$0xff] }
 0x7fc   : > { %v1737_v5 = vpop.permute.xlu1 %1736  ;;  %v1731_v20 = vpop.permute.xlu0 %1730 }
 0x7fd   : > { %5761 = vtanh.f32 %v1625_v30  ;;  %v1744_v36 = vsel %vm658_vm6, %v1742_v50, %v1737_v5  ;;  %v1743_v35 = vsel %vm655_vm5, %v6860_v54, %v1731_v20  ;;  %v7887_v54 = vld [vmem:[#allocation23_spill] sm:$0xff]  ;;  %v7890_v50 = vld [vmem:[#allocation26_spill] sm:$0xff] }
 0x7fe   : > { %4834 = vmatmul.mubr.msk.f32.vlgmr.msra.gmra.mrb[12].mxu0 %vm661_vm7, %v1744_v36  ;;  %v7891_v20 = vld [vmem:[#allocation27_spill] sm:$0xff] }
 0x7ff   : > { %1822 = vmatprep.mubr.f32.mxu0 %v7873_v44  ;;  %5252 = vmatpush1.bf16.msk.msra.mxu0 %vm6376_vm4, %v6387_v21 }
 0x800   : > { %v1739_v6 = vpop.permute.xlu1 %1738  ;;  %5255 = vmatprep.subr.msk.bf16.mxu0 %vm6376_vm4, %v6402_v26 }
 0x801   : > { %v1745_v62 = vsel %vm658_vm6, %v1743_v35, %v1739_v6  ;;  %v7892_v6 = vld [vmem:[#allocation28_spill] sm:$0xff]  ;;  %v7893_v35 = vld [vmem:[#allocation29_spill] sm:$0xff] }
 0x802   : > { %4835 = vmatmul.mubr.msk.f32.gmra.mrb[14].mxu0 %vm661_vm7, %v1745_v62 }
 0x803   : > { %v5760_v11 = vpop.eup %5759  ;;  %1893 = vmatprep.mubr.f32.mxu0 %v7873_v44 }
 0x804   : > { %v1632_v28 = vmul.f32 %v5760_v11, %v1630_v53 }
 0x806   : > { %v6928_v29 = vadd.f32 %v1632_v28, %v1628_v4  ;;  %4838 = vmatmul.mubr.msk.f32.vlgmr.msra.gmra.mrb[16].mxu0 %vm661_vm7, %v1744_v36 }
 0x807   : > { %v5762_v42 = vpop.eup %5761  ;;  %1899 = vmatprep.mubr.f32.mxu0 %v7873_v44  ;;  %5258 = vmatpush1.bf16.msk.msra.mxu0 %vm6376_vm4, %v6416_v39 }
 0x808   : > { %v1633_v17 = vmul.f32 %v5762_v42, %v1631_v8  ;;  %1636 = vst.msk [vmem:[%s6338_s30] sm:$0xff] %vm1019_vm8, %v6928_v29  ;;  %5264 = vmatprep.subr.bf16.mxu0 %v6455_v47 }
 0x80a   : > { %v6935_v7 = vadd.f32 %v1633_v17, %v1629_v2  ;;  %4839 = vmatmul.mubr.msk.f32.gmra.mrb[18].mxu0 %vm661_vm7, %v1745_v62 }
 0x80b   : > { %1970 = vmatprep.mubr.f32.mxu0 %v7873_v44 }
 0x80c   : > { %1637 = vst.msk [vmem:[%s6338_s30 + $0x8] sm:$0xff] %vm1019_vm8, %v6935_v7  ;;  %v5259_v25 = vpack.c.bf16 %v6935_v7, %v6928_v29 }
 0x80e   : > { %5260 = vmatprep.subr.bf16.mxu1 %v5259_v25  ;;  %4842 = vmatmul.mubr.msk.f32.vlgmr.msra.gmra.mrb[20].mxu0 %vm661_vm7, %v1744_v36 }
 0x80f   : > { %5262 = vmatpush3.bf16.msra.mxu1 %v5259_v25  ;;  %1976 = vmatprep.mubr.f32.mxu0 %v7873_v44  ;;  %v7889_v25 = vld [vmem:[#allocation25_spill] sm:$0xff] }
 0x810   : > { %5266 = vmatpush1.bf16.msra.mxu0 %v6466_v51 }
 0x811   : > { %5268 = vmatprep.subr.bf16.mxu0 %v6468_v52 }
 0x812   : > { %5060 = vmatmul.mubr.msk.f32.vlgmr.msra.gmra.mrb[20].mxu1 %vm541_vm1, %v6945_v24  ;;  %4843 = vmatmul.mubr.msk.f32.gmra.mrb[22].mxu0 %vm661_vm7, %v1745_v62  ;;  %v7894_v62 = vld [vmem:[#allocation30_spill] sm:$0xff] }
 0x813   : > { %5062 = vmatprep.mubr.msk.f32.mxu1 %vm541_vm1, %v6952_v27  ;;  %2158 = vmatprep.mubr.f32.mxu0 %v7873_v44 }
 0x814   : > { %5270 = vmatpush1.bf16.msra.mxu0 %v6484_v57 }
 0x815   : > { %5272 = vmatprep.subr.bf16.mxu0 %v6487_v58 }
 0x816   : > { %5063 = vmatmul.mubr.msk.f32.gmra.mrb[22].mxu1 %vm541_vm1, %v6959_v22 }
 0x817   : > { %5069 = vmatprep.mubr.msk.f32.mxu1 %vm541_vm1, %v6966_v12 }
 0x818   : > { %5274 = vmatpush1.bf16.msra.mxu0 %v6502_v63 }
 0x819   : > { %5276 = vmatprep.subr.bf16.mxu0 %v6505_v0 }
 0x81c   : > { %5278 = vmatpush1.bf16.msra.mxu0 %v6520_v9 }
 0x81d   : > { %5280 = vmatprep.subr.bf16.mxu0 %v6523_v10 }
 0x820   : > { %5282 = vmatpush1.bf16.msra.mxu0 %v6532_v14 }
 0x821   : > { %5284 = vmatprep.subr.bf16.mxu0 %v6542_v19  ;;  %v7907_v19 = vld [vmem:[#allocation41_spill] sm:$0xff] }
 0x824   : > { %5286 = vmatpush1.bf16.msra.mxu0 %v7887_v54 }
 0x825   : > { %5288 = vmatprep.subr.bf16.mxu0 %v7888_v60 }
 0x8e5   : > { %v5061_v30 = vpop.f32.mrb[20].mxu1 }
 0x8e6   : > { %v2049_v53 = vpop.f32.mrb[21].mxu1 }
 0x8e7   : > { %2070 = vrot.lane.b32.xlu0 %v2049_v53, %s6038_s27  ;;  %v7896_v53 = vld [vmem:[#allocation32_spill] sm:$0xff] }
 0x8e9   : > { %v5064_v11 = vpop.f32.mrb[22].mxu1 }
 0x8ea   : > { %v2059_v28 = vpop.f32.mrb[23].mxu1 }
 0x8eb   : > { %2072 = vrot.lane.b32.xlu0 %v5061_v30, %s6038_s27  ;;  %2078 = vrot.lane.b32.xlu1 %v2059_v28, %s6039_s7  ;;  %v7895_v30 = vld [vmem:[#allocation31_spill] sm:$0xff]  ;;  %v7898_v28 = vld [vmem:[#allocation34_spill] sm:$0xff] }
 0x8ef   : > { %2080 = vrot.lane.b32.xlu1 %v5064_v11, %s6039_s7  ;;  %v7897_v11 = vld [vmem:[#allocation33_spill] sm:$0xff] }
 0x959   : > { %v2071_v4 = vpop.permute.xlu0 %2070 }
 0x95a   : > { %v2084_v8 = vsel %vm1019_vm8, %v6928_v29, %v2071_v4  ;;  %v7899_v4 = vld [vmem:[#allocation35_spill] sm:$0xff] }
 0x95d   : > { %v2079_v42 = vpop.permute.xlu1 %2078  ;;  %v2073_v17 = vpop.permute.xlu0 %2072 }
 0x95e   : > { %v2086_v2 = vsel %vm1022_vm9, %v2084_v8, %v2079_v42  ;;  %v2085_v43 = vsel %vm1019_vm8, %v6935_v7, %v2073_v17  ;;  %v7900_v8 = vld [vmem:[#allocation49_spill] sm:$0xff]  ;;  %v7901_v42 = vld [vmem:[#allocation55_spill] sm:$0xff] }
 0x95f   : > { %4848 = vmatmul.mubr.msk.f32.vlgmr.msra.gmra.mrb[12].mxu0 %vm1025_vm10, %v2086_v2 }
 0x960   : > { %5290 = vmatpush1.bf16.msra.mxu0 %v7889_v25  ;;  %2164 = vmatprep.mubr.f32.mxu0 %v7873_v44 }
 0x961   : > { %v2081_v5 = vpop.permute.xlu1 %2080  ;;  %5292 = vmatprep.subr.bf16.mxu0 %v7890_v50 }
 0x962   : > { %v2087_v36 = vsel %vm1022_vm9, %v2085_v43, %v2081_v5 }
 0x963   : > { %4849 = vmatmul.mubr.msk.f32.gmra.mrb[14].mxu0 %vm1025_vm10, %v2087_v36 }
 0x964   : > { %5294 = vmatpush1.bf16.msra.mxu0 %v7891_v20  ;;  %2235 = vmatprep.mubr.f32.mxu0 %v7873_v44 }
 0x965   : > { %5296 = vmatprep.subr.bf16.mxu0 %v7892_v6 }
 0x968   : > { %5298 = vmatpush1.bf16.msra.mxu0 %v7893_v35 }
 0x969   : > { %5300 = vmatprep.subr.bf16.mxu0 %v7894_v62 }
 0x96c   : > { %5302 = vmatpush1.bf16.msra.mxu0 %v7895_v30 }
 0x96d   : > { %5304 = vmatprep.subr.bf16.mxu0 %v7896_v53  ;;  %v7905_v53 = vld [vmem:[#allocation38_spill] sm:$0xff] }
 0x970   : > { %5306 = vmatpush1.bf16.msra.mxu0 %v7897_v11 }
 0x971   : > { %5308 = vmatprep.subr.bf16.mxu0 %v7898_v28 }
 0x974   : > { %5310 = vmatpush1.bf16.msra.mxu0 %v7899_v4  ;;  %v7904_v4 = vld [vmem:[#allocation39_spill] sm:$0xff] }
 0x975   : > { %5316 = vmatprep.subr.bf16.mxu0 %v6805_v23 }
 0x977   : > { %4850 = vmatmul.mubr.msk.f32.vlgmr.msra.gmra.mrb[16].mxu0 %vm1025_vm10, %v2086_v2 }
 0x978   : > { %2241 = vmatprep.mubr.f32.mxu0 %v7873_v44  ;;  %5318 = vmatpush1.bf16.msra.mxu0 %v6807_v55 }
 0x979   : > { %5320 = vmatprep.subr.bf16.mxu0 %v6809_v59  ;;  %v7903_v59 = vld [vmem:[#allocation37_spill] sm:$0xff] }
 0x97b   : > { %4851 = vmatmul.mubr.msk.f32.gmra.mrb[18].mxu0 %vm1025_vm10, %v2087_v36 }
 0x97c   : > { %5322 = vmatpush1.bf16.msra.mxu0 %v6813_v41  ;;  %2525 = vmatprep.mubr.f32.mxu0 %v7873_v44 }
 0x97d   : > { %5324 = vmatprep.subr.bf16.mxu0 %v6816_v13 }
 0x980   : > { %5326 = vmatpush1.bf16.msra.mxu0 %v7900_v8 }
 0x981   : > { %5328 = vmatprep.subr.bf16.mxu0 %v6822_v1 }
 0x984   : > { %5330 = vmatpush1.bf16.msra.mxu0 %v6825_v46 }
 0x985   : > { %5332 = vmatprep.subr.bf16.mxu0 %v6828_v48 }
 0x988   : > { %5334 = vmatpush1.bf16.msra.mxu0 %v6831_v32 }
 0x989   : > { %5336 = vmatprep.subr.bf16.mxu0 %v6835_v31 }
 0x98c   : > { %5338 = vmatpush1.bf16.msra.mxu0 %v7901_v42 }
 0xa32   : > { %v2160_v17 = vpop.f32.mrb[12].mxu0 }
 0xa33   : > { %v2258_v2 = vmul.f32 %v2160_v17, %v6708_v18  ;;  %v2162_v43 = vpop.f32.mrb[13].mxu0 }
 0xa34   : > { %v2274_v36 = vmul.f32 %v2162_v43, %v6712_v37  ;;  %v2270_v55 = vmul.f32 %v2162_v43, %v7903_v59 }
 0xa35   : > { %2262 = vrot.lane.b32.xlu0 %v2258_v2, %s6039_s7 }
 0xa36   : > { %v2166_v5 = vpop.f32.mrb[14].mxu0 }
 0xa37   : > { %v2259_v1 = vmul.f32 %v2166_v5, %v6706_v15  ;;  %v2168_v46 = vpop.f32.mrb[15].mxu0 }
 0xa38   : > { %v2275_v31 = vmul.f32 %v2168_v46, %v6718_v45  ;;  %v2271_v30 = vmul.f32 %v2168_v46, %v7905_v53 }
 0xa39   : > { %2278 = vrot.lane.b32.xlu0 %v2274_v36, %s6039_s7  ;;  %2264 = vrot.lane.b32.xlu1 %v2259_v1, %s6039_s7 }
 0xa3d   : > { %2280 = vrot.lane.b32.xlu1 %v2275_v31, %s6039_s7 }
 0xa4a   : > { %v2237_v42 = vpop.f32.mrb[16].mxu0 }
 0xa4b   : > { %v2290_v32 = vmul.f32 %v2237_v42, %v6724_v49  ;;  %v2239_v48 = vpop.f32.mrb[17].mxu0  ;;  %v2286_v62 = vmul.f32 %v2237_v42, %v6761_v38 }
 0xa4c   : > { %v2306_v8 = vmul.f32 %v2239_v48, %v6733_v40 }
 0xa4d   : > { %2294 = vrot.lane.b32.xlu0 %v2290_v32, %s6039_s7  ;;  %v7902_v32 = vld [vmem:[#allocation36_spill] sm:$0xff] }
 0xa4e   : > { %v2243_v2 = vpop.f32.mrb[18].mxu0  ;;  %v2256_v31 = vmul.f32 %v2160_v17, %v7902_v32 }
 0xa4f   : > { %v2291_v13 = vmul.f32 %v2243_v2, %v6729_v3  ;;  %v2245_v41 = vpop.f32.mrb[19].mxu0  ;;  %v2287_v17 = vmul.f32 %v2243_v2, %v6754_v56 }
 0xa50   : > { %v2307_v1 = vmul.f32 %v2245_v41, %v6740_v33  ;;  %v2303_v46 = vmul.f32 %v2245_v41, %v7907_v19 }
 0xa51   : > { %2310 = vrot.lane.b32.xlu0 %v2306_v8, %s6039_s7  ;;  %2296 = vrot.lane.b32.xlu1 %v2291_v13, %s6039_s7  ;;  %v2257_v8 = vmul.f32 %v2166_v5, %v7904_v4 }
 0xa55   : > { %2334 = vrot.lane.b32.xlu0 %v6928_v29, %s6038_s27  ;;  %2312 = vrot.lane.b32.xlu1 %v2307_v1, %s6039_s7 }
 0xa59   : > { %2336 = vrot.lane.b32.xlu1 %v6935_v7, %s6038_s27 }
 0xaa7   : > { %v2263_v36 = vpop.permute.xlu0 %2262 }
 0xaa8   : > { %v2268_v23 = vadd.f32 %v2263_v36, %v2256_v31  ;;  %v7906_v31 = vld [vmem:[#allocation40_spill] sm:$0xff] }
 0xaa9   : > { %v2302_v36 = vmul.f32 %v2239_v48, %v7906_v31 }
 0xaaa   : > { %v2272_v28 = vadd.f32 %v2270_v55, %v2268_v23 }
 0xaab   : > { %v2279_v13 = vpop.permute.xlu0 %2278  ;;  %v2265_v11 = vpop.permute.xlu1 %2264 }
 0xaac   : > { %v2284_v35 = vadd.f32 %v2279_v13, %v2272_v28  ;;  %v2269_v1 = vadd.f32 %v2265_v11, %v2257_v8  ;;  %v7908_v28 = vld [vmem:[#allocation42_spill] sm:$0xff] }
 0xaae   : > { %v2273_v6 = vadd.f32 %v2271_v30, %v2269_v1  ;;  %v2288_v20 = vadd.f32 %v2286_v62, %v2284_v35 }
 0xaaf   : > { %v2281_v50 = vpop.permute.xlu1 %2280 }
 0xab0   : > { %v2285_v25 = vadd.f32 %v2281_v50, %v2273_v6  ;;  %v7909_v50 = vld [vmem:[#allocation43_spill] sm:$0xff] }
 0xab2   : > { %v2289_v60 = vadd.f32 %v2287_v17, %v2285_v25 }
 0xabf   : > { %v2295_v43 = vpop.permute.xlu0 %2294 }
 0xac0   : > { %v2300_v5 = vadd.f32 %v2295_v43, %v2288_v20 }
 0xac2   : > { %v2304_v23 = vadd.f32 %v2302_v36, %v2300_v5 }
 0xac3   : > { %v2311_v55 = vpop.permute.xlu0 %2310  ;;  %v2297_v54 = vpop.permute.xlu1 %2296 }
 0xac4   : > { %v2316_v14 = vadd.f32 %v2311_v55, %v2304_v23  ;;  %v2301_v42 = vadd.f32 %v2297_v54, %v2289_v60  ;;  %v7098_v23 = vld [vmem:[%s6336_s6 + $0x20] sm:$0xff]  ;;  %v7101_v55 = vld [vmem:[%s6336_s6 + $0x28] sm:$0xff] }
 0xac6   : > { %v2318_v11 = vadd.f32 %v2316_v14, %v7908_v28  ;;  %v2305_v30 = vadd.f32 %v2303_v46, %v2301_v42  ;;  %v5339_v46 = vpack.c.bf16 %v7101_v55, %v7098_v23  ;;  %v7910_v42 = vld [vmem:[#allocation18_spill] sm:$0xff]  ;;  %v7911_v28 = vld [vmem:[#allocation20_spill] sm:$0xff] }
 0xac7   : > { %v2313_v35 = vpop.permute.xlu1 %2312  ;;  %v2335_v54 = vpop.permute.xlu0 %2334 }
 0xac8   : > { %v4852_v62 = vmul.f32 -1.442695, %v2318_v11  ;;  %v2317_v8 = vadd.f32 %v2313_v35, %v2305_v30  ;;  %v7912_v11 = vld [vmem:[#allocation19_spill] sm:$0xff] }
 0xaca   : > { %5763 = vpow2.f32 %v4852_v62  ;;  %v2319_v25 = vadd.f32 %v2317_v8, %v7909_v50 }
 0xacb   : > { %v2337_v1 = vpop.permute.xlu1 %2336 }
 0xacc   : > { %v4853_v6 = vmul.f32 -1.442695, %v2319_v25 }
 0xace   : > { %5765 = vpow2.f32 %v4853_v6 }
 0xad4   : > { %v5764_v48 = vpop.eup %5763 }
 0xad5   : > { %v2326_v20 = vadd.f32 1.0, %v5764_v48 }
 0xad7   : > { %5767 = vrcp.f32 %v2326_v20 }
 0xad8   : > { %v5766_v2 = vpop.eup %5765 }
 0xad9   : > { %v2327_v13 = vadd.f32 1.0, %v5766_v2 }
 0xadb   : > { %5769 = vrcp.f32 %v2327_v13 }
 0xae1   : > { %v7081_v41 = vpop.eup %5767 }
 0xae2   : > { %v2340_v14 = vmul.f32 %v7081_v41, %v2335_v54 }
 0xae4   : > { %2344 = vrot.lane.b32.xlu0 %v2340_v14, %s6048_s12 }
 0xae5   : > { %v7085_v60 = vpop.eup %5769 }
 0xae6   : > { %v2341_v17 = vmul.f32 %v7085_v60, %v2337_v1 }
 0xae8   : > { %2346 = vrot.lane.b32.xlu1 %v2341_v17, %s6048_s12 }
 0xb56   : > { %v2345_v43 = vpop.permute.xlu0 %2344 }
 0xb5a   : > { %v2347_v36 = vpop.permute.xlu1 %2346 }
 0xb5b   : > { %v5311_v5 = vpack.c.bf16 %v2347_v36, %v2345_v43 }
 0xb5d   : > { %5312 = vmatprep.subr.bf16.mxu1 %v5311_v5 }
 0xb5e   : > { %5314 = vmatpush3.bf16.msra.mxu1 %v5311_v5 }
 0xb5f   : > { %5340 = vmatprep.subr.bf16.mxu1 %v5339_v46 }
 0xb61   : > { %5070 = vmatmul.mubr.msk.f32.vlgmr.msra.gmra.mrb[24].mxu1 %vm541_vm1, %v6945_v24 }
 0xb62   : > { %5072 = vmatprep.mubr.msk.f32.mxu1 %vm541_vm1, %v6952_v27  ;;  %5342 = vmatpush3.bf16.msra.mxu1 %v5339_v46 }
 0xb63   : > { %5345 = vmatprep.subr.msk.bf16.mxu1 %vm6376_vm4, %v7910_v42 }
 0xb65   : > { %5073 = vmatmul.mubr.msk.f32.gmra.mrb[26].mxu1 %vm541_vm1, %v6959_v22 }
 0xb66   : > { %5079 = vmatprep.mubr.msk.f32.mxu1 %vm541_vm1, %v6966_v12 }
 0xb69   : > { %5080 = vmatmul.mubr.msk.f32.vlgmr.msra.gmra.mrb[28].mxu1 %vm541_vm1, %v6945_v24 }
 0xb6a   : > { %5082 = vmatprep.mubr.msk.f32.mxu1 %vm541_vm1, %v6952_v27  ;;  %5348 = vmatpush1.bf16.msk.msra.mxu1 %vm6376_vm4, %v7911_v28 }
 0xb6b   : > { %5351 = vmatprep.subr.msk.bf16.mxu1 %vm6376_vm4, %v7912_v11 }
 0xb6d   : > { %5083 = vmatmul.mubr.msk.f32.gmra.mrb[30].mxu1 %vm541_vm1, %v6959_v22 }
 0xb6e   : > { %2813 = vmatprep.mubr.f32.mxu1 %v7873_v44 }
 0xc34   : > { %v5071_v30 = vpop.f32.mrb[24].mxu1 }
 0xc35   : > { %v2416_v35 = vpop.f32.mrb[25].mxu1 }
 0xc36   : > { %2437 = vrot.lane.b32.xlu0 %v2416_v35, %s6038_s27 }
 0xc38   : > { %v5074_v62 = vpop.f32.mrb[26].mxu1 }
 0xc39   : > { %v2426_v8 = vpop.f32.mrb[27].mxu1 }
 0xc3a   : > { %2439 = vrot.lane.b32.xlu0 %v5071_v30, %s6038_s27  ;;  %2445 = vrot.lane.b32.xlu1 %v2426_v8, %s6039_s7 }
 0xc3c   : > { %v5081_v50 = vpop.f32.mrb[28].mxu1 }
 0xc3d   : > { %v2704_v25 = vpop.f32.mrb[29].mxu1 }
 0xc3e   : > { %2447 = vrot.lane.b32.xlu1 %v5074_v62, %s6039_s7  ;;  %2725 = vrot.lane.b32.xlu0 %v2704_v25, %s6036_s24 }
 0xc40   : > { %v5084_v17 = vpop.f32.mrb[30].mxu1 }
 0xca8   : > { %v2438_v6 = vpop.permute.xlu0 %2437 }
 0xca9   : > { %v2451_v48 = vsel %vm1019_vm8, %v2345_v43, %v2438_v6  ;;  %v2714_v43 = vpop.f32.mrb[31].mxu1 }
 0xcac   : > { %v2446_v20 = vpop.permute.xlu1 %2445  ;;  %v2440_v2 = vpop.permute.xlu0 %2439 }
 0xcad   : > { %v2453_v13 = vsel %vm1022_vm9, %v2451_v48, %v2446_v20  ;;  %v2452_v54 = vsel %vm1019_vm8, %v2347_v36, %v2440_v2 }
 0xcae   : > { %4858 = vmatmul.mubr.msk.f32.vlgmr.msra.gmra.mrb[20].mxu0 %vm1025_vm10, %v2453_v13 }
 0xcaf   : > { %2531 = vmatprep.mubr.f32.mxu0 %v7873_v44 }
 0xcb0   : > { %v2448_v14 = vpop.permute.xlu1 %2447 }
 0xcb1   : > { %v2454_v1 = vsel %vm1022_vm9, %v2452_v54, %v2448_v14 }
 0xcb2   : > { %4859 = vmatmul.mubr.msk.f32.gmra.mrb[22].mxu0 %vm1025_vm10, %v2454_v1 }
 0xcb3   : > { %5099 = vmatprep.mubr.msk.f32.mxu0 %vm541_vm1, %v6966_v12 }
 0xd81   : > { %v2527_v5 = vpop.f32.mrb[20].mxu0 }
 0xd82   : > { %v2529_v46 = vpop.f32.mrb[21].mxu0  ;;  %v2544_v30 = vmul.f32 %v2527_v5, %v6708_v18  ;;  %v2556_v8 = vmul.f32 %v2527_v5, %v7903_v59  ;;  %v2568_v6 = vmul.f32 %v2527_v5, %v6712_v37 }
 0xd83   : > { %v2608_v35 = vmul.f32 %v2529_v46, %v6733_v40  ;;  %v2584_v20 = vmul.f32 %v2529_v46, %v6724_v49  ;;  %v2596_v13 = vmul.f32 %v2529_v46, %v7906_v31 }
 0xd84   : > { %2548 = vrot.lane.b32.xlu0 %v2544_v30, %s6048_s12  ;;  %v2726_v30 = vpop.permute.xlu0 %2725 }
 0xd85   : > { %2612 = vrot.lane.b32.xlu1 %v2608_v35, %s6038_s27  ;;  %v2533_v36 = vpop.f32.mrb[22].mxu0 }
 0xd86   : > { %v2535_v62 = vpop.f32.mrb[23].mxu0  ;;  %v2545_v25 = vmul.f32 %v2533_v36, %v6706_v15  ;;  %v2557_v48 = vmul.f32 %v2533_v36, %v7905_v53  ;;  %v2569_v2 = vmul.f32 %v2533_v36, %v6718_v45 }
 0xd87   : > { %v2585_v54 = vmul.f32 %v2535_v62, %v6729_v3  ;;  %v2609_v14 = vmul.f32 %v2535_v62, %v6740_v33  ;;  %v2597_v1 = vmul.f32 %v2535_v62, %v7907_v19  ;;  %v2581_v31 = vmul.f32 %v2535_v62, %v6754_v56 }
 0xd88   : > { %2560 = vrot.lane.b32.xlu0 %v2556_v8, %s6039_s7 }
 0xd89   : > { %2550 = vrot.lane.b32.xlu1 %v2545_v25, %s6048_s12  ;;  %v2542_v25 = vmul.f32 %v2527_v5, %v7902_v32 }
 0xd8c   : > { %2572 = vrot.lane.b32.xlu0 %v2568_v6, %s6038_s27 }
 0xd8d   : > { %2562 = vrot.lane.b32.xlu1 %v2557_v48, %s6039_s7 }
 0xd90   : > { %2588 = vrot.lane.b32.xlu0 %v2584_v20, %s6048_s12 }
 0xd91   : > { %2574 = vrot.lane.b32.xlu1 %v2569_v2, %s6038_s27 }
 0xd94   : > { %2600 = vrot.lane.b32.xlu0 %v2596_v13, %s6039_s7  ;;  %v2543_v13 = vmul.f32 %v2533_v36, %v7904_v4 }
 0xd95   : > { %2590 = vrot.lane.b32.xlu1 %v2585_v54, %s6048_s12 }
 0xd98   : > { %2614 = vrot.lane.b32.xlu0 %v2609_v14, %s6038_s27 }
 0xd99   : > { %2602 = vrot.lane.b32.xlu1 %v2597_v1, %s6039_s7 }
 0xd9c   : > { %2727 = vrot.lane.b32.xlu0 %v5081_v50, %s6036_s24  ;;  %v2580_v50 = vmul.f32 %v2529_v46, %v6761_v38 }
 0xd9d   : > { %2733 = vrot.lane.b32.xlu1 %v2714_v43, %s6037_s26 }
 0xda1   : > { %2735 = vrot.lane.b32.xlu1 %v5084_v17, %s6037_s26 }
 0xdf6   : > { %v2549_v35 = vpop.permute.xlu0 %2548 }
 0xdf7   : > { %v2613_v8 = vpop.permute.xlu1 %2612  ;;  %v2554_v48 = vadd.f32 %v2549_v35, %v2542_v25 }
 0xdfa   : > { %v2561_v6 = vpop.permute.xlu0 %2560 }
 0xdfb   : > { %v2551_v20 = vpop.permute.xlu1 %2550  ;;  %v2566_v2 = vadd.f32 %v2561_v6, %v2554_v48 }
 0xdfc   : > { %v2555_v11 = vadd.f32 %v2551_v20, %v2543_v13 }
 0xdfe   : > { %v2573_v54 = vpop.permute.xlu0 %2572 }
 0xdff   : > { %v2578_v14 = vadd.f32 %v2573_v54, %v2566_v2  ;;  %v2563_v1 = vpop.permute.xlu1 %2562 }
 0xe00   : > { %v2567_v28 = vadd.f32 %v2563_v1, %v2555_v11  ;;  %v2739_v11 = vsel %vm655_vm5, %v7098_v23, %v2726_v30 }
 0xe01   : > { %v2582_v43 = vadd.f32 %v2580_v50, %v2578_v14  ;;  %v7915_v50 = vld [vmem:[#allocation23_spill] sm:$0xff] }
 0xe02   : > { %v2589_v17 = vpop.permute.xlu0 %2588 }
 0xe03   : > { %v2575_v42 = vpop.permute.xlu1 %2574  ;;  %v2594_v5 = vadd.f32 %v2589_v17, %v2582_v43  ;;  %v7916_v43 = vld [vmem:[#allocation24_spill] sm:$0xff] }
 0xe04   : > { %v2579_v19 = vadd.f32 %v2575_v42, %v2567_v28 }
 0xe06   : > { %v2601_v53 = vpop.permute.xlu0 %2600  ;;  %v2583_v35 = vadd.f32 %v2581_v31, %v2579_v19 }
 0xe07   : > { %v2606_v25 = vadd.f32 %v2601_v53, %v2594_v5  ;;  %v2591_v6 = vpop.permute.xlu1 %2590 }
 0xe08   : > { %v2595_v36 = vadd.f32 %v2591_v6, %v2583_v35 }
 0xe09   : > { %v2618_v48 = vadd.f32 %v2613_v8, %v2606_v25  ;;  %v2627_v8 = vsub.f32 1.0, %v7085_v60 }
 0xe0a   : > { %v2615_v4 = vpop.permute.xlu0 %2614 }
 0xe0b   : > { %v2620_v2 = vadd.f32 %v2618_v48, %v6915_v61  ;;  %v2603_v54 = vpop.permute.xlu1 %2602 }
 0xe0c   : > { %v2607_v46 = vadd.f32 %v2603_v54, %v2595_v36 }
 0xe0d   : > { %5771 = vtanh.f32 %v2620_v2 }
 0xe0e   : > { %v2619_v20 = vadd.f32 %v2615_v4, %v2607_v46  ;;  %v2728_v62 = vpop.permute.xlu0 %2727  ;;  %v2626_v4 = vsub.f32 1.0, %v7081_v41  ;;  %v7917_v46 = vld [vmem:[#allocation25_spill] sm:$0xff] }
 0xe0f   : > { %v2734_v42 = vpop.permute.xlu1 %2733  ;;  %v2740_v61 = vsel %vm655_vm5, %v7101_v55, %v2728_v62  ;;  %v2624_v55 = vmul.f32 %v7081_v41, %v6928_v29  ;;  %v2625_v29 = vmul.f32 %v7085_v60, %v6935_v7  ;;  %v7913_v7 = vld [vmem:[#allocation21_spill] sm:$0xff]  ;;  %v7914_v60 = vld [vmem:[#allocation22_spill] sm:$0xff]  ;;  %v7919_v62 = vld [vmem:[#allocation27_spill] sm:$0xff] }
 0xe10   : > { %v2621_v28 = vadd.f32 %v2619_v20, %v6921_v34  ;;  %v2741_v19 = vsel %vm658_vm6, %v2739_v11, %v2734_v42  ;;  %v7918_v42 = vld [vmem:[#allocation26_spill] sm:$0xff] }
 0xe11   : > { %4870 = vmatmul.mubr.msk.f32.vlgmr.msra.gmra.mrb[32].mxu1 %vm661_vm7, %v2741_v19 }
 0xe12   : > { %5773 = vtanh.f32 %v2621_v28  ;;  %2819 = vmatprep.mubr.f32.mxu1 %v7873_v44  ;;  %5354 = vmatpush1.bf16.msk.msra.mxu1 %vm6376_vm4, %v6387_v21 }
 0xe13   : > { %v2736_v53 = vpop.permute.xlu1 %2735  ;;  %5357 = vmatprep.subr.msk.bf16.mxu1 %vm6376_vm4, %v6402_v26 }
 0xe14   : > { %v2742_v34 = vsel %vm658_vm6, %v2740_v61, %v2736_v53  ;;  %v7921_v61 = vld [vmem:[#allocation29_spill] sm:$0xff]  ;;  %v7922_v53 = vld [vmem:[#allocation30_spill] sm:$0xff] }
 0xe15   : > { %4871 = vmatmul.mubr.msk.f32.gmra.mrb[34].mxu1 %vm661_vm7, %v2742_v34 }
 0xe16   : > { %2890 = vmatprep.mubr.f32.mxu1 %v7873_v44 }
 0xe17   : > { %v5772_v31 = vpop.eup %5771 }
 0xe18   : > { %v2628_v23 = vmul.f32 %v5772_v31, %v2626_v4  ;;  %v7924_v4 = vld [vmem:[#allocation32_spill] sm:$0xff]  ;;  %v7925_v31 = vld [vmem:[#allocation33_spill] sm:$0xff] }
 0xe19   : > { %4874 = vmatmul.mubr.msk.f32.vlgmr.msra.gmra.mrb[36].mxu1 %vm661_vm7, %v2741_v19 }
 0xe1a   : > { %2896 = vmatprep.mubr.f32.mxu1 %v7873_v44  ;;  %5360 = vmatpush1.bf16.msk.msra.mxu1 %vm6376_vm4, %v6416_v39  ;;  %v7192_v30 = vadd.f32 %v2628_v23, %v2624_v55  ;;  %v7926_v23 = vld [vmem:[#allocation34_spill] sm:$0xff]  ;;  %v7927_v55 = vld [vmem:[#allocation35_spill] sm:$0xff] }
 0xe1c   : > { %v5774_v13 = vpop.eup %5773  ;;  %4860 = vst.msk [vmem:[%s6338_s30 + $0x10] sm:$0xff] %vm1019_vm8, %v7192_v30 }
 0xe1d   : > { %v2629_v14 = vmul.f32 %v5774_v13, %v2627_v8  ;;  %4875 = vmatmul.mubr.msk.f32.gmra.mrb[38].mxu1 %vm661_vm7, %v2742_v34  ;;  %v7928_v8 = vld [vmem:[#allocation44_spill] sm:$0xff]  ;;  %v7929_v13 = vld [vmem:[#allocation45_spill] sm:$0xff] }
 0xe1e   : > { %2967 = vmatprep.mubr.f32.mxu1 %v7873_v44 }
 0xe1f   : > { %v7202_v41 = vadd.f32 %v2629_v14, %v2625_v29  ;;  %v7930_v14 = vld [vmem:[#allocation46_spill] sm:$0xff]  ;;  %v7931_v29 = vld [vmem:[#allocation47_spill] sm:$0xff] }
 0xe21   : > { %4878 = vmatmul.mubr.msk.f32.vlgmr.msra.gmra.mrb[40].mxu1 %vm661_vm7, %v2741_v19  ;;  %4861 = vst.msk [vmem:[%s6338_s30 + $0x18] sm:$0xff] %vm1019_vm8, %v7202_v41  ;;  %v5361_v1 = vpack.c.bf16 %v7202_v41, %v7192_v30  ;;  %v7920_v19 = vld [vmem:[#allocation28_spill] sm:$0xff] }
 0xe22   : > { %2973 = vmatprep.mubr.f32.mxu1 %v7873_v44 }
 0xe23   : > { %5362 = vmatprep.subr.bf16.mxu1 %v5361_v1 }
 0xe24   : > { %5364 = vmatpush3.bf16.msra.mxu1 %v5361_v1  ;;  %v7932_v1 = vld [vmem:[#allocation48_spill] sm:$0xff] }
 0xe25   : > { %4879 = vmatmul.mubr.msk.f32.gmra.mrb[42].mxu1 %vm661_vm7, %v2742_v34  ;;  %5366 = vmatprep.subr.bf16.mxu1 %v6455_v47  ;;  %v7923_v34 = vld [vmem:[#allocation31_spill] sm:$0xff] }
 0xe26   : > { %5089 = vmatprep.mubr.msk.f32.mxu1 %vm541_vm1, %v6966_v12 }
 0xe29   : > { %5090 = vmatmul.mubr.msk.f32.vlgmr.msra.gmra.mrb[44].mxu1 %vm541_vm1, %v6945_v24 }
 0xe2a   : > { %5092 = vmatprep.mubr.msk.f32.mxu1 %vm541_vm1, %v6952_v27  ;;  %5368 = vmatpush1.bf16.msra.mxu1 %v6466_v51 }
 0xe2b   : > { %5370 = vmatprep.subr.bf16.mxu1 %v6468_v52 }
 0xe2d   : > { %5093 = vmatmul.mubr.msk.f32.gmra.mrb[46].mxu1 %vm541_vm1, %v6959_v22 }
 0xe2e   : > { %5372 = vmatpush1.bf16.msra.mxu1 %v6484_v57  ;;  %3155 = vmatprep.mubr.f32.mxu1 %v7873_v44 }
 0xe2f   : > { %5374 = vmatprep.subr.bf16.mxu1 %v6487_v58 }
 0xe32   : > { %5376 = vmatpush1.bf16.msra.mxu1 %v6502_v63 }
 0xe33   : > { %5378 = vmatprep.subr.bf16.mxu1 %v6505_v0 }
 0xe36   : > { %5380 = vmatpush1.bf16.msra.mxu1 %v6520_v9 }
 0xe37   : > { %5382 = vmatprep.subr.bf16.mxu1 %v6523_v10 }
 0xe3a   : > { %5384 = vmatpush1.bf16.msra.mxu1 %v7913_v7 }
 0xe3b   : > { %5386 = vmatprep.subr.bf16.mxu1 %v7914_v60 }
 0xe3e   : > { %5388 = vmatpush1.bf16.msra.mxu1 %v7915_v50 }
 0xe3f   : > { %5390 = vmatprep.subr.bf16.mxu1 %v7916_v43  ;;  %v7943_v43 = vld [vmem:[#allocation41_spill] sm:$0xff] }
 0xefc   : > { %v5091_v17 = vpop.f32.mrb[44].mxu1 }
 0xefd   : > { %v3046_v5 = vpop.f32.mrb[45].mxu1 }
 0xefe   : > { %3067 = vrot.lane.b32.xlu0 %v3046_v5, %s6038_s27  ;;  %v7934_v5 = vld [vmem:[#allocation50_spill] sm:$0xff] }
 0xf00   : > { %v5094_v35 = vpop.f32.mrb[46].mxu1 }
 0xf01   : > { %v3056_v25 = vpop.f32.mrb[47].mxu1 }
 0xf02   : > { %3069 = vrot.lane.b32.xlu0 %v5091_v17, %s6038_s27  ;;  %3075 = vrot.lane.b32.xlu1 %v3056_v25, %s6039_s7  ;;  %v7933_v17 = vld [vmem:[#allocation49_spill] sm:$0xff]  ;;  %v7936_v25 = vld [vmem:[#allocation52_spill] sm:$0xff] }
 0xf06   : > { %3077 = vrot.lane.b32.xlu1 %v5094_v35, %s6039_s7  ;;  %v7935_v35 = vld [vmem:[#allocation51_spill] sm:$0xff] }
 0xf70   : > { %v3068_v6 = vpop.permute.xlu0 %3067 }
 0xf71   : > { %v3081_v48 = vsel %vm1019_vm8, %v7192_v30, %v3068_v6  ;;  %v7937_v6 = vld [vmem:[#allocation53_spill] sm:$0xff] }
 0xf74   : > { %v3076_v36 = vpop.permute.xlu1 %3075  ;;  %v3070_v2 = vpop.permute.xlu0 %3069 }
 0xf75   : > { %v3083_v54 = vsel %vm1022_vm9, %v3081_v48, %v3076_v36  ;;  %v3082_v20 = vsel %vm1019_vm8, %v7202_v41, %v3070_v2  ;;  %v7938_v48 = vld [vmem:[#allocation54_spill] sm:$0xff]  ;;  %v7939_v36 = vld [vmem:[#allocation55_spill] sm:$0xff] }
 0xf76   : > { %4884 = vmatmul.mubr.msk.f32.vlgmr.msra.gmra.mrb[32].mxu1 %vm1025_vm10, %v3083_v54 }
 0xf77   : > { %5392 = vmatpush1.bf16.msra.mxu1 %v7917_v46  ;;  %3161 = vmatprep.mubr.f32.mxu1 %v7873_v44 }
 0xf78   : > { %v3078_v11 = vpop.permute.xlu1 %3077  ;;  %5394 = vmatprep.subr.bf16.mxu1 %v7918_v42 }
 0xf79   : > { %v3084_v28 = vsel %vm1022_vm9, %v3082_v20, %v3078_v11 }
 0xf7a   : > { %4885 = vmatmul.mubr.msk.f32.gmra.mrb[34].mxu1 %vm1025_vm10, %v3084_v28 }
 0xf7b   : > { %5396 = vmatpush1.bf16.msra.mxu1 %v7919_v62  ;;  %3232 = vmatprep.mubr.f32.mxu1 %v7873_v44 }
 0xf7c   : > { %5398 = vmatprep.subr.bf16.mxu1 %v7920_v19 }
 0xf7f   : > { %5400 = vmatpush1.bf16.msra.mxu1 %v7921_v61 }
 0xf80   : > { %5402 = vmatprep.subr.bf16.mxu1 %v7922_v53 }
 0xf83   : > { %5404 = vmatpush1.bf16.msra.mxu1 %v7923_v34 }
 0xf84   : > { %5406 = vmatprep.subr.bf16.mxu1 %v7924_v4 }
 0xf87   : > { %5408 = vmatpush1.bf16.msra.mxu1 %v7925_v31 }
 0xf88   : > { %5410 = vmatprep.subr.bf16.mxu1 %v7926_v23  ;;  %v7941_v23 = vld [vmem:[#allocation38_spill] sm:$0xff] }
 0xf8b   : > { %5412 = vmatpush1.bf16.msra.mxu1 %v7927_v55 }
 0xf8c   : > { %5418 = vmatprep.subr.bf16.mxu1 %v7928_v8 }
 0xf8e   : > { %4886 = vmatmul.mubr.msk.f32.vlgmr.msra.gmra.mrb[36].mxu1 %vm1025_vm10, %v3083_v54 }
 0xf8f   : > { %3238 = vmatprep.mubr.f32.mxu1 %v7873_v44  ;;  %5420 = vmatpush1.bf16.msra.mxu1 %v7929_v13  ;;  %v7940_v13 = vld [vmem:[#allocation39_spill] sm:$0xff] }
 0xf90   : > { %5422 = vmatprep.subr.bf16.mxu1 %v7930_v14 }
 0xf92   : > { %4887 = vmatmul.mubr.msk.f32.gmra.mrb[38].mxu1 %vm1025_vm10, %v3084_v28 }
 0xf93   : > { %5424 = vmatpush1.bf16.msra.mxu1 %v7931_v29  ;;  %3522 = vmatprep.mubr.f32.mxu1 %v7873_v44 }
 0xf94   : > { %5426 = vmatprep.subr.bf16.mxu1 %v7932_v1 }
 0xf97   : > { %5428 = vmatpush1.bf16.msra.mxu1 %v7933_v17 }
 0xf98   : > { %5430 = vmatprep.subr.bf16.mxu1 %v7934_v5 }
 0xf9b   : > { %5432 = vmatpush1.bf16.msra.mxu1 %v7935_v35 }
 0xf9c   : > { %5434 = vmatprep.subr.bf16.mxu1 %v7936_v25 }
 0xf9f   : > { %5436 = vmatpush1.bf16.msra.mxu1 %v7937_v6 }
 0xfa0   : > { %5438 = vmatprep.subr.bf16.mxu1 %v7938_v48 }
 0xfa3   : > { %5440 = vmatpush1.bf16.msra.mxu1 %v7939_v36 }
0x1049   : > { %v3157_v2 = vpop.f32.mrb[32].mxu1 }
0x104a   : > { %v3255_v54 = vmul.f32 %v3157_v2, %v6708_v18  ;;  %v3159_v20 = vpop.f32.mrb[33].mxu1 }
0x104b   : > { %v3271_v28 = vmul.f32 %v3159_v20, %v6712_v37 }
0x104c   : > { %3259 = vrot.lane.b32.xlu0 %v3255_v54, %s6039_s7 }
0x104d   : > { %v3163_v11 = vpop.f32.mrb[34].mxu1 }
0x104e   : > { %v3256_v5 = vmul.f32 %v3163_v11, %v6706_v15  ;;  %v3165_v35 = vpop.f32.mrb[35].mxu1 }
0x104f   : > { %v3272_v48 = vmul.f32 %v3165_v35, %v6718_v45  ;;  %v3268_v31 = vmul.f32 %v3165_v35, %v7941_v23 }
0x1050   : > { %3275 = vrot.lane.b32.xlu0 %v3271_v28, %s6039_s7  ;;  %3261 = vrot.lane.b32.xlu1 %v3256_v5, %s6039_s7  ;;  %v3267_v28 = vmul.f32 %v3159_v20, %v7903_v59 }
0x1054   : > { %3277 = vrot.lane.b32.xlu1 %v3272_v48, %s6039_s7 }
0x1061   : > { %v3234_v36 = vpop.f32.mrb[36].mxu1 }
0x1062   : > { %v3287_v6 = vmul.f32 %v3234_v36, %v6724_v49  ;;  %v3236_v25 = vpop.f32.mrb[37].mxu1  ;;  %v3283_v4 = vmul.f32 %v3234_v36, %v6761_v38 }
0x1063   : > { %v3303_v17 = vmul.f32 %v3236_v25, %v6733_v40 }
0x1064   : > { %3291 = vrot.lane.b32.xlu0 %v3287_v6, %s6039_s7  ;;  %v3253_v6 = vmul.f32 %v3157_v2, %v7902_v32 }
0x1065   : > { %v3240_v54 = vpop.f32.mrb[38].mxu1 }
0x1066   : > { %v3288_v1 = vmul.f32 %v3240_v54, %v6729_v3  ;;  %v3242_v29 = vpop.f32.mrb[39].mxu1  ;;  %v3284_v2 = vmul.f32 %v3240_v54, %v6754_v56 }
0x1067   : > { %v3304_v5 = vmul.f32 %v3242_v29, %v6740_v33  ;;  %v3300_v35 = vmul.f32 %v3242_v29, %v7943_v43 }
0x1068   : > { %3307 = vrot.lane.b32.xlu0 %v3303_v17, %s6039_s7  ;;  %3293 = vrot.lane.b32.xlu1 %v3288_v1, %s6039_s7  ;;  %v3254_v17 = vmul.f32 %v3163_v11, %v7940_v13 }
0x106c   : > { %3331 = vrot.lane.b32.xlu0 %v7192_v30, %s6038_s27  ;;  %3309 = vrot.lane.b32.xlu1 %v3304_v5, %s6039_s7 }
0x1070   : > { %3333 = vrot.lane.b32.xlu1 %v7202_v41, %s6038_s27 }
0x10be   : > { %v3260_v48 = vpop.permute.xlu0 %3259 }
0x10bf   : > { %v3265_v14 = vadd.f32 %v3260_v48, %v3253_v6  ;;  %v7942_v6 = vld [vmem:[#allocation40_spill] sm:$0xff] }
0x10c0   : > { %v3299_v48 = vmul.f32 %v3236_v25, %v7942_v6 }
0x10c1   : > { %v3269_v8 = vadd.f32 %v3267_v28, %v3265_v14 }
0x10c2   : > { %v3276_v1 = vpop.permute.xlu0 %3275  ;;  %v3262_v55 = vpop.permute.xlu1 %3261 }
0x10c3   : > { %v3281_v34 = vadd.f32 %v3276_v1, %v3269_v8  ;;  %v3266_v5 = vadd.f32 %v3262_v55, %v3254_v17 }
0x10c5   : > { %v3270_v53 = vadd.f32 %v3268_v31, %v3266_v5  ;;  %v3285_v61 = vadd.f32 %v3283_v4, %v3281_v34  ;;  %v7306_v34 = vld [vmem:[%s7870_s22] sm:$0xff] }
0x10c6   : > { %v3278_v19 = vpop.permute.xlu1 %3277  ;;  %7944 = vst [vmem:[#allocation36_spill] sm:$0xff] %v7306_v34 }
0x10c7   : > { %v3282_v62 = vadd.f32 %v3278_v19, %v3270_v53 }
0x10c9   : > { %v3286_v42 = vadd.f32 %v3284_v2, %v3282_v62 }
0x10d6   : > { %v3292_v20 = vpop.permute.xlu0 %3291 }
0x10d7   : > { %v3297_v11 = vadd.f32 %v3292_v20, %v3285_v61  ;;  %v7312_v61 = vld [vmem:[%s7870_s22 + $0x8] sm:$0xff] }
0x10d8   : > { %7945 = vst [vmem:[#allocation37_spill] sm:$0xff] %v7312_v61 }
0x10d9   : > { %v3301_v14 = vadd.f32 %v3299_v48, %v3297_v11 }
0x10da   : > { %v3308_v28 = vpop.permute.xlu0 %3307  ;;  %v3294_v46 = vpop.permute.xlu1 %3293 }
0x10db   : > { %v3313_v50 = vadd.f32 %v3308_v28, %v3301_v14  ;;  %v3298_v36 = vadd.f32 %v3294_v46, %v3286_v42  ;;  %v7332_v14 = vld [vmem:[%s6336_s6 + $0x30] sm:$0xff]  ;;  %v7335_v28 = vld [vmem:[%s6336_s6 + $0x38] sm:$0xff] }
0x10dd   : > { %v3315_v4 = vadd.f32 %v7306_v34, %v3313_v50  ;;  %v3302_v19 = vadd.f32 %v3300_v35, %v3298_v36  ;;  %v5441_v35 = vpack.c.bf16 %v7335_v28, %v7332_v14  ;;  %v7946_v36 = vld [vmem:[#allocation18_spill] sm:$0xff] }
0x10de   : > { %v3310_v62 = vpop.permute.xlu1 %3309  ;;  %v3332_v54 = vpop.permute.xlu0 %3331 }
0x10df   : > { %v4888_v53 = vmul.f32 -1.442695, %v3315_v4  ;;  %v3314_v31 = vadd.f32 %v3310_v62, %v3302_v19  ;;  %v7947_v4 = vld [vmem:[#allocation20_spill] sm:$0xff]  ;;  %v7948_v19 = vld [vmem:[#allocation19_spill] sm:$0xff] }
0x10e1   : > { %5775 = vpow2.f32 %v4888_v53  ;;  %v3316_v55 = vadd.f32 %v7312_v61, %v3314_v31 }
0x10e2   : > { %v3334_v5 = vpop.permute.xlu1 %3333 }
0x10e3   : > { %v4889_v46 = vmul.f32 -1.442695, %v3316_v55 }
0x10e5   : > { %5777 = vpow2.f32 %v4889_v46 }
0x10eb   : > { %v5776_v42 = vpop.eup %5775 }
0x10ec   : > { %v3323_v8 = vadd.f32 1.0, %v5776_v42 }
0x10ee   : > { %5779 = vrcp.f32 %v3323_v8 }
0x10ef   : > { %v5778_v29 = vpop.eup %5777 }
0x10f0   : > { %v3324_v25 = vadd.f32 1.0, %v5778_v29 }
0x10f2   : > { %5781 = vrcp.f32 %v3324_v25 }
0x10f8   : > { %v7315_v50 = vpop.eup %5779 }
0x10f9   : > { %v3337_v17 = vmul.f32 %v7315_v50, %v3332_v54 }
0x10fb   : > { %3341 = vrot.lane.b32.xlu0 %v3337_v17, %s6048_s12 }
0x10fc   : > { %v7319_v1 = vpop.eup %5781 }
0x10fd   : > { %v3338_v2 = vmul.f32 %v7319_v1, %v3334_v5 }
0x10ff   : > { %3343 = vrot.lane.b32.xlu1 %v3338_v2, %s6048_s12 }
0x116d   : > { %v3342_v20 = vpop.permute.xlu0 %3341 }
0x1171   : > { %v3344_v48 = vpop.permute.xlu1 %3343 }
0x1172   : > { %v5413_v11 = vpack.c.bf16 %v3344_v48, %v3342_v20 }
0x1174   : > { %5414 = vmatprep.subr.bf16.mxu0 %v5413_v11 }
0x1175   : > { %5416 = vmatpush3.bf16.msra.mxu0 %v5413_v11 }
0x1176   : > { %5442 = vmatprep.subr.bf16.mxu0 %v5441_v35 }
0x1178   : > { %5100 = vmatmul.mubr.msk.f32.vlgmr.msra.gmra.mrb[24].mxu0 %vm541_vm1, %v6945_v24 }
0x1179   : > { %5102 = vmatprep.mubr.msk.f32.mxu0 %vm541_vm1, %v6952_v27  ;;  %5444 = vmatpush3.bf16.msra.mxu0 %v5441_v35 }
0x117a   : > { %5447 = vmatprep.subr.msk.bf16.mxu0 %vm6376_vm4, %v7946_v36 }
0x117c   : > { %5103 = vmatmul.mubr.msk.f32.gmra.mrb[26].mxu0 %vm541_vm1, %v6959_v22 }
0x117d   : > { %5109 = vmatprep.mubr.msk.f32.mxu0 %vm541_vm1, %v6966_v12 }
0x1180   : > { %5110 = vmatmul.mubr.msk.f32.vlgmr.msra.gmra.mrb[28].mxu0 %vm541_vm1, %v6945_v24 }
0x1181   : > { %5112 = vmatprep.mubr.msk.f32.mxu0 %vm541_vm1, %v6952_v27  ;;  %5450 = vmatpush1.bf16.msk.msra.mxu0 %vm6376_vm4, %v7947_v4 }
0x1182   : > { %5453 = vmatprep.subr.msk.bf16.mxu0 %vm6376_vm4, %v7948_v19 }
0x1184   : > { %5113 = vmatmul.mubr.msk.f32.gmra.mrb[30].mxu0 %vm541_vm1, %v6959_v22 }
0x1185   : > { %3810 = vmatprep.mubr.f32.mxu0 %v7873_v44 }
0x124b   : > { %v5101_v62 = vpop.f32.mrb[24].mxu0 }
0x124c   : > { %v3413_v53 = vpop.f32.mrb[25].mxu0 }
0x124d   : > { %3434 = vrot.lane.b32.xlu0 %v3413_v53, %s6038_s27 }
0x124f   : > { %v5104_v24 = vpop.f32.mrb[26].mxu0 }
0x1250   : > { %v3423_v31 = vpop.f32.mrb[27].mxu0 }
0x1251   : > { %3436 = vrot.lane.b32.xlu0 %v5101_v62, %s6038_s27  ;;  %3442 = vrot.lane.b32.xlu1 %v3423_v31, %s6039_s7 }
0x1253   : > { %v5111_v27 = vpop.f32.mrb[28].mxu0 }
0x1254   : > { %v3701_v55 = vpop.f32.mrb[29].mxu0 }
0x1255   : > { %3444 = vrot.lane.b32.xlu1 %v5104_v24, %s6039_s7  ;;  %3722 = vrot.lane.b32.xlu0 %v3701_v55, %s6036_s24 }
0x1257   : > { %v5114_v5 = vpop.f32.mrb[30].mxu0 }
0x1258   : > { %v3711_v2 = vpop.f32.mrb[31].mxu0 }
0x12bf   : > { %v3435_v46 = vpop.permute.xlu0 %3434 }
0x12c0   : > { %v3448_v22 = vsel %vm1019_vm8, %v3342_v20, %v3435_v46 }
0x12c3   : > { %v3443_v42 = vpop.permute.xlu1 %3442  ;;  %v3437_v8 = vpop.permute.xlu0 %3436 }
0x12c4   : > { %v3450_v29 = vsel %vm1022_vm9, %v3448_v22, %v3443_v42  ;;  %v3449_v25 = vsel %vm1019_vm8, %v3344_v48, %v3437_v8 }
0x12c5   : > { %4894 = vmatmul.mubr.msk.f32.vlgmr.msra.gmra.mrb[40].mxu1 %vm1025_vm10, %v3450_v29 }
0x12c6   : > { %3528 = vmatprep.mubr.f32.mxu1 %v7873_v44 }
0x12c7   : > { %v3445_v54 = vpop.permute.xlu1 %3444  ;;  %v3723_v8 = vpop.permute.xlu0 %3722 }
0x12c8   : > { %v3451_v17 = vsel %vm1022_vm9, %v3449_v25, %v3445_v54 }
0x12c9   : > { %4895 = vmatmul.mubr.msk.f32.gmra.mrb[42].mxu1 %vm1025_vm10, %v3451_v17 }
0x12ca   : > { %5129 = vmatprep.mubr.msk.f32.mxu1 %vm541_vm1, %v6966_v12 }
0x1398   : > { %v3524_v20 = vpop.f32.mrb[40].mxu1 }
0x1399   : > { %v3541_v11 = vmul.f32 %v3524_v20, %v6708_v18  ;;  %v3526_v35 = vpop.f32.mrb[41].mxu1  ;;  %v3553_v4 = vmul.f32 %v3524_v20, %v7903_v59  ;;  %v3565_v12 = vmul.f32 %v3524_v20, %v6712_v37  ;;  %v3539_v54 = vmul.f32 %v3524_v20, %v7902_v32 }
0x139a   : > { %v3605_v36 = vmul.f32 %v3526_v35, %v6733_v40  ;;  %v3581_v24 = vmul.f32 %v3526_v35, %v6724_v49  ;;  %v3593_v55 = vmul.f32 %v3526_v35, %v7942_v6 }
0x139b   : > { %3545 = vrot.lane.b32.xlu0 %v3541_v11, %s6048_s12 }
0x139c   : > { %3609 = vrot.lane.b32.xlu1 %v3605_v36, %s6038_s27  ;;  %v3530_v48 = vpop.f32.mrb[42].mxu1 }
0x139d   : > { %v3542_v19 = vmul.f32 %v3530_v48, %v6706_v15  ;;  %v3532_v62 = vpop.f32.mrb[43].mxu1  ;;  %v3554_v53 = vmul.f32 %v3530_v48, %v7941_v23  ;;  %v3566_v31 = vmul.f32 %v3530_v48, %v6718_v45 }
0x139e   : > { %v3582_v46 = vmul.f32 %v3532_v62, %v6729_v3  ;;  %v3606_v22 = vmul.f32 %v3532_v62, %v6740_v33  ;;  %v3594_v42 = vmul.f32 %v3532_v62, %v7943_v43 }
0x139f   : > { %3557 = vrot.lane.b32.xlu0 %v3553_v4, %s6039_s7 }
0x13a0   : > { %3547 = vrot.lane.b32.xlu1 %v3542_v19, %s6048_s12  ;;  %v3540_v19 = vmul.f32 %v3530_v48, %v7940_v13 }
0x13a3   : > { %3569 = vrot.lane.b32.xlu0 %v3565_v12, %s6038_s27 }
0x13a4   : > { %3559 = vrot.lane.b32.xlu1 %v3554_v53, %s6039_s7 }
0x13a7   : > { %3585 = vrot.lane.b32.xlu0 %v3581_v24, %s6048_s12 }
0x13a8   : > { %3571 = vrot.lane.b32.xlu1 %v3566_v31, %s6038_s27 }
0x13ab   : > { %3597 = vrot.lane.b32.xlu0 %v3593_v55, %s6039_s7 }
0x13ac   : > { %3587 = vrot.lane.b32.xlu1 %v3582_v46, %s6048_s12 }
0x13af   : > { %3611 = vrot.lane.b32.xlu0 %v3606_v22, %s6038_s27 }
0x13b0   : > { %3599 = vrot.lane.b32.xlu1 %v3594_v42, %s6039_s7  ;;  %v3578_v42 = vmul.f32 %v3532_v62, %v6754_v56  ;;  %v3736_v62 = vsel %vm655_vm5, %v7332_v14, %v3723_v8 }
0x13b3   : > { %3724 = vrot.lane.b32.xlu0 %v5111_v27, %s6036_s24  ;;  %v3577_v27 = vmul.f32 %v3526_v35, %v6761_v38  ;;  %v7403_v35 = vld [vmem:[%s7886_s25] sm:$0xff]  ;;  %s7978_s24 = sand.u32 1, %s5987_s10  }
0x13b4   : > { %3730 = vrot.lane.b32.xlu1 %v3711_v2, %s6037_s26  ;;  %s7645_s23 = scalar_lea.sflag [#allocation5], %s7978_s24 }
0x13b8   : > { %3732 = vrot.lane.b32.xlu1 %v5114_v5, %s6037_s26 }
0x140d   : > { %v3546_v29 = vpop.permute.xlu0 %3545 }
0x140e   : > { %v3610_v25 = vpop.permute.xlu1 %3609  ;;  %v3551_v11 = vadd.f32 %v3546_v29, %v3539_v54 }
0x1411   : > { %v3558_v17 = vpop.permute.xlu0 %3557 }
0x1412   : > { %v3548_v36 = vpop.permute.xlu1 %3547  ;;  %v3563_v4 = vadd.f32 %v3558_v17, %v3551_v11 }
0x1413   : > { %v3552_v31 = vadd.f32 %v3548_v36, %v3540_v19 }
0x1415   : > { %v3570_v12 = vpop.permute.xlu0 %3569 }
0x1416   : > { %v3575_v53 = vadd.f32 %v3570_v12, %v3563_v4  ;;  %v3560_v24 = vpop.permute.xlu1 %3559 }
0x1417   : > { %v3564_v55 = vadd.f32 %v3560_v24, %v3552_v31  ;;  %v3623_v31 = vsub.f32 1.0, %v7315_v50 }
0x1418   : > { %v3579_v2 = vadd.f32 %v3577_v27, %v3575_v53 }
0x1419   : > { %v3586_v5 = vpop.permute.xlu0 %3585 }
0x141a   : > { %v3572_v46 = vpop.permute.xlu1 %3571  ;;  %v3591_v20 = vadd.f32 %v3586_v5, %v3579_v2 }
0x141b   : > { %v3576_v22 = vadd.f32 %v3572_v46, %v3564_v55  ;;  %v3624_v55 = vsub.f32 1.0, %v7319_v1 }
0x141d   : > { %v3598_v61 = vpop.permute.xlu0 %3597  ;;  %v3580_v29 = vadd.f32 %v3578_v42, %v3576_v22  ;;  %v7951_v42 = vld [vmem:[#allocation25_spill] sm:$0xff] }
0x141e   : > { %v3603_v54 = vadd.f32 %v3598_v61, %v3591_v20  ;;  %v3588_v17 = vpop.permute.xlu1 %3587  ;;  %v7411_v61 = vld [vmem:[%s7886_s25 + $0x8] sm:$0xff] }
0x141f   : > { %v3592_v48 = vadd.f32 %v3588_v17, %v3580_v29 }
0x1420   : > { %v3615_v11 = vadd.f32 %v3610_v25, %v3603_v54  ;;  %v7952_v54 = vld [vmem:[#allocation26_spill] sm:$0xff] }
0x1421   : > { %v3612_v34 = vpop.permute.xlu0 %3611 }
0x1422   : > { %v3617_v36 = vadd.f32 %v7403_v35, %v3615_v11  ;;  %v3600_v4 = vpop.permute.xlu1 %3599  ;;  %v7953_v11 = vld [vmem:[#allocation27_spill] sm:$0xff] }
0x1423   : > { %v3604_v19 = vadd.f32 %v3600_v4, %v3592_v48  ;;  %v7954_v48 = vld [vmem:[#allocation28_spill] sm:$0xff]  ;;  %v7956_v4 = vld [vmem:[#allocation30_spill] sm:$0xff] }
0x1424   : > { %5783 = vtanh.f32 %v3617_v36  ;;  %v7955_v36 = vld [vmem:[#allocation29_spill] sm:$0xff] }
0x1425   : > { %v3616_v12 = vadd.f32 %v3612_v34, %v3604_v19  ;;  %v3725_v24 = vpop.permute.xlu0 %3724  ;;  %v7957_v19 = vld [vmem:[#allocation31_spill] sm:$0xff] }
0x1426   : > { %v3731_v53 = vpop.permute.xlu1 %3730  ;;  %v3737_v34 = vsel %vm655_vm5, %v7335_v28, %v3725_v24  ;;  %v3621_v28 = vmul.f32 %v7315_v50, %v7192_v30  ;;  %v3622_v30 = vmul.f32 %v7319_v1, %v7202_v41  ;;  %v7464_v41 = vld [vmem:[%s7709_s2 + $0x8] sm:$0xff]  ;;  %v7471_v1 = vld [vmem:[%s7709_s2 + $0x10] sm:$0xff]  ;;  %v7962_v24 = vld [vmem:[#allocation44_spill] sm:$0xff] }
0x1427   : > { %v3618_v25 = vadd.f32 %v7411_v61, %v3616_v12  ;;  %v3738_v27 = vsel %vm658_vm6, %v3736_v62, %v3731_v53  ;;  %v7958_v12 = vld [vmem:[#allocation32_spill] sm:$0xff]  ;;  %v7959_v62 = vld [vmem:[#allocation33_spill] sm:$0xff]  ;;  %v7960_v53 = vld [vmem:[#allocation34_spill] sm:$0xff] }
0x1428   : > { %4906 = vmatmul.mubr.msk.f32.vlgmr.msra.gmra.mrb[32].mxu0 %vm661_vm7, %v3738_v27 }
0x1429   : > { %5785 = vtanh.f32 %v3618_v25  ;;  %3816 = vmatprep.mubr.f32.mxu0 %v7873_v44  ;;  %5456 = vmatpush1.bf16.msk.msra.mxu0 %vm6376_vm4, %v6387_v21  ;;  %v7961_v25 = vld [vmem:[#allocation35_spill] sm:$0xff] }
0x142a   : > { %v3733_v14 = vpop.permute.xlu1 %3732  ;;  %5459 = vmatprep.subr.msk.bf16.mxu0 %vm6376_vm4, %v6402_v26 }
0x142b   : > { %v3739_v8 = vsel %vm658_vm6, %v3737_v34, %v3733_v14  ;;  %v7964_v34 = vld [vmem:[#allocation46_spill] sm:$0xff]  ;;  %v7965_v14 = vld [vmem:[#allocation47_spill] sm:$0xff] }
0x142c   : > { %4907 = vmatmul.mubr.msk.f32.gmra.mrb[34].mxu0 %vm661_vm7, %v3739_v8 }
0x142d   : > { %3887 = vmatprep.mubr.f32.mxu0 %v7873_v44 }
0x142e   : > { %v5784_v2 = vpop.eup %5783 }
0x142f   : > { %v3625_v21 = vmul.f32 %v5784_v2, %v3623_v31  ;;  %v7967_v31 = vld [vmem:[#allocation49_spill] sm:$0xff]  ;;  %v7968_v2 = vld [vmem:[#allocation50_spill] sm:$0xff] }
0x1430   : > { %4910 = vmatmul.mubr.msk.f32.vlgmr.msra.gmra.mrb[36].mxu0 %vm661_vm7, %v3738_v27 }
0x1431   : > { %3893 = vmatprep.mubr.f32.mxu0 %v7873_v44  ;;  %5462 = vmatpush1.bf16.msk.msra.mxu0 %vm6376_vm4, %v6416_v39  ;;  %v7436_v26 = vadd.f32 %v3625_v21, %v3621_v28  ;;  %v5807_v39 = vld [vmem:[%s7709_s2] sm:$0xff]  ;;  %v7969_v21 = vld [vmem:[#allocation51_spill] sm:$0xff] }
0x1432   : > { %v7970_v28 = vld [vmem:[#allocation52_spill] sm:$0xff] }
0x1433   : > { %v5786_v5 = vpop.eup %5785  ;;  %4896 = vst.msk [vmem:[%s6338_s30 + $0x20] sm:$0xff] %vm1019_vm8, %v7436_v26 }
0x1434   : > { %v3626_v46 = vmul.f32 %v5786_v5, %v3624_v55  ;;  %4911 = vmatmul.mubr.msk.f32.gmra.mrb[38].mxu0 %vm661_vm7, %v3739_v8  ;;  %v7971_v55 = vld [vmem:[#allocation53_spill] sm:$0xff]  ;;  %v7972_v5 = vld [vmem:[#allocation54_spill] sm:$0xff] }
0x1435   : > { %3964 = vmatprep.mubr.f32.mxu0 %v7873_v44 }
0x1436   : > { %v7446_v50 = vadd.f32 %v3626_v46, %v3622_v30  ;;  %v7973_v46 = vld [vmem:[#allocation55_spill] sm:$0xff] }
0x1438   : > { %4914 = vmatmul.mubr.msk.f32.vlgmr.msra.gmra.mrb[40].mxu0 %vm661_vm7, %v3738_v27  ;;  %4897 = vst.msk [vmem:[%s6338_s30 + $0x28] sm:$0xff] %vm1019_vm8, %v7446_v50  ;;  %v5463_v16 = vpack.c.bf16 %v7446_v50, %v7436_v26  ;;  %v7963_v27 = vld [vmem:[#allocation45_spill] sm:$0xff] }
0x1439   : > { %3970 = vmatprep.mubr.f32.mxu0 %v7873_v44 }
0x143a   : > { %5464 = vmatprep.subr.bf16.mxu0 %v5463_v16 }
0x143b   : > { %5466 = vmatpush3.bf16.msra.mxu0 %v5463_v16 }
0x143c   : > { %4915 = vmatmul.mubr.msk.f32.gmra.mrb[42].mxu0 %vm661_vm7, %v3739_v8  ;;  %5468 = vmatprep.subr.bf16.mxu0 %v6455_v47  ;;  %v7480_v47 = vld [vmem:[%s7709_s2 + $0x18] sm:$0xff]  ;;  %v7966_v8 = vld [vmem:[#allocation48_spill] sm:$0xff] }
0x143d   : > { %5119 = vmatprep.mubr.msk.f32.mxu0 %vm541_vm1, %v5807_v39 }
0x1440   : > { %5120 = vmatmul.mubr.msk.f32.vlgmr.msra.gmra.mrb[44].mxu0 %vm541_vm1, %v7464_v41 }
0x1441   : > { %5122 = vmatprep.mubr.msk.f32.mxu0 %vm541_vm1, %v7471_v1  ;;  %5470 = vmatpush1.bf16.msra.mxu0 %v6466_v51  ;;  %v7949_v51 = vld [vmem:[#allocation23_spill] sm:$0xff] }
0x1442   : > { %5472 = vmatprep.subr.bf16.mxu0 %v6468_v52  ;;  %v7950_v52 = vld [vmem:[#allocation24_spill] sm:$0xff] }
0x1444   : > { %5123 = vmatmul.mubr.msk.f32.gmra.mrb[46].mxu0 %vm541_vm1, %v7480_v47 }
0x1445   : > { %5474 = vmatpush1.bf16.msra.mxu0 %v6484_v57  ;;  %4152 = vmatprep.mubr.f32.mxu0 %v7873_v44 }
0x1446   : > { %5476 = vmatprep.subr.bf16.mxu0 %v6487_v58 }
0x1449   : > { %5478 = vmatpush1.bf16.msra.mxu0 %v6502_v63 }
0x144a   : > { %5480 = vmatprep.subr.bf16.mxu0 %v6505_v0 }
0x144d   : > { %5482 = vmatpush1.bf16.msra.mxu0 %v6520_v9 }
0x144e   : > { %5484 = vmatprep.subr.bf16.mxu0 %v6523_v10 }
0x1451   : > { %5486 = vmatpush1.bf16.msra.mxu0 %v7913_v7 }
0x1452   : > { %5488 = vmatprep.subr.bf16.mxu0 %v7914_v60 }
0x1455   : > { %5490 = vmatpush1.bf16.msra.mxu0 %v7949_v51 }
0x1456   : > { %5492 = vmatprep.subr.bf16.mxu0 %v7950_v52 }
0x1513   : > { %v5121_v57 = vpop.f32.mrb[44].mxu0 }
0x1514   : > { %v4043_v22 = vpop.f32.mrb[45].mxu0 }
0x1515   : > { %4064 = vrot.lane.b32.xlu0 %v4043_v22, %s6038_s27 }
0x1517   : > { %v5124_v58 = vpop.f32.mrb[46].mxu0 }
0x1518   : > { %v4053_v63 = vpop.f32.mrb[47].mxu0 }
0x1519   : > { %4066 = vrot.lane.b32.xlu0 %v5121_v57, %s6038_s27  ;;  %4072 = vrot.lane.b32.xlu1 %v4053_v63, %s6039_s7 }
0x151d   : > { %4074 = vrot.lane.b32.xlu1 %v5124_v58, %s6039_s7 }
0x1587   : > { %v4065_v0 = vpop.permute.xlu0 %4064 }
0x1588   : > { %v4078_v9 = vsel %vm1019_vm8, %v7436_v26, %v4065_v0 }
0x158b   : > { %v4073_v10 = vpop.permute.xlu1 %4072  ;;  %v4067_v7 = vpop.permute.xlu0 %4066 }
0x158c   : > { %v4080_v60 = vsel %vm1022_vm9, %v4078_v9, %v4073_v10  ;;  %v4079_v20 = vsel %vm1019_vm8, %v7446_v50, %v4067_v7 }
0x158d   : > { %4920 = vmatmul.mubr.msk.f32.vlgmr.msra.gmra.mrb[32].mxu0 %vm1025_vm10, %v4080_v60 }
0x158e   : > { %5494 = vmatpush1.bf16.msra.mxu0 %v7951_v42  ;;  %4158 = vmatprep.mubr.f32.mxu0 %v7873_v44 }
0x158f   : > { %v4075_v29 = vpop.permute.xlu1 %4074  ;;  %5496 = vmatprep.subr.bf16.mxu0 %v7952_v54 }
0x1590   : > { %v4081_v17 = vsel %vm1022_vm9, %v4079_v20, %v4075_v29 }
0x1591   : > { %4921 = vmatmul.mubr.msk.f32.gmra.mrb[34].mxu0 %vm1025_vm10, %v4081_v17 }
0x1592   : > { %5498 = vmatpush1.bf16.msra.mxu0 %v7953_v11  ;;  %4229 = vmatprep.mubr.f32.mxu0 %v7873_v44 }
0x1593   : > { %5500 = vmatprep.subr.bf16.mxu0 %v7954_v48 }
0x1596   : > { %5502 = vmatpush1.bf16.msra.mxu0 %v7955_v36 }
0x1597   : > { %5504 = vmatprep.subr.bf16.mxu0 %v7956_v4 }
0x159a   : > { %5506 = vmatpush1.bf16.msra.mxu0 %v7957_v19 }
0x159b   : > { %5508 = vmatprep.subr.bf16.mxu0 %v7958_v12 }
0x159e   : > { %5510 = vmatpush1.bf16.msra.mxu0 %v7959_v62 }
0x159f   : > { %5512 = vmatprep.subr.bf16.mxu0 %v7960_v53 }
0x15a2   : > { %5514 = vmatpush1.bf16.msra.mxu0 %v7961_v25 }
0x15a3   : > { %5520 = vmatprep.subr.bf16.mxu0 %v7962_v24 }
0x15a5   : > { %4922 = vmatmul.mubr.msk.f32.vlgmr.msra.gmra.mrb[36].mxu0 %vm1025_vm10, %v4080_v60 }
0x15a6   : > { %4235 = vmatprep.mubr.f32.mxu0 %v7873_v44  ;;  %5522 = vmatpush1.bf16.msra.mxu0 %v7963_v27 }
0x15a7   : > { %5524 = vmatprep.subr.bf16.mxu0 %v7964_v34 }
0x15a9   : > { %4923 = vmatmul.mubr.msk.f32.gmra.mrb[38].mxu0 %vm1025_vm10, %v4081_v17 }
0x15aa   : > { %5526 = vmatpush1.bf16.msra.mxu0 %v7965_v14  ;;  %4519 = vmatprep.mubr.f32.mxu0 %v7873_v44 }
0x15ab   : > { %5528 = vmatprep.subr.bf16.mxu0 %v7966_v8 }
0x15ae   : > { %5530 = vmatpush1.bf16.msra.mxu0 %v7967_v31 }
0x15af   : > { %5532 = vmatprep.subr.bf16.mxu0 %v7968_v2 }
0x15b2   : > { %5534 = vmatpush1.bf16.msra.mxu0 %v7969_v21 }
0x15b3   : > { %5536 = vmatprep.subr.bf16.mxu0 %v7970_v28 }
0x15b6   : > { %5538 = vmatpush1.bf16.msra.mxu0 %v7971_v55 }
0x15b7   : > { %5540 = vmatprep.subr.bf16.mxu0 %v7972_v5 }
0x15ba   : > { %5542 = vmatpush1.bf16.msra.mxu0 %v7973_v46 }
0x1660   : > { %v4154_v30 = vpop.f32.mrb[32].mxu0 }
0x1661   : > { %v4252_v16 = vmul.f32 %v4154_v30, %v6708_v18  ;;  %v4156_v39 = vpop.f32.mrb[33].mxu0  ;;  %v4250_v29 = vmul.f32 %v4154_v30, %v7902_v32 }
0x1662   : > { %v4268_v52 = vmul.f32 %v4156_v39, %v6712_v37  ;;  %v4264_v17 = vmul.f32 %v4156_v39, %v7903_v59 }
0x1663   : > { %4256 = vrot.lane.b32.xlu0 %v4252_v16, %s6039_s7 }
0x1664   : > { %v4160_v51 = vpop.f32.mrb[34].mxu0 }
0x1665   : > { %v4253_v57 = vmul.f32 %v4160_v51, %v6706_v15  ;;  %v4162_v22 = vpop.f32.mrb[35].mxu0  ;;  %v4251_v48 = vmul.f32 %v4160_v51, %v7940_v13  ;;  %v7974_v51 = vld [vmem:[#allocation36_spill] sm:$0xff] }
0x1666   : > { %v4269_v58 = vmul.f32 %v4162_v22, %v6718_v45  ;;  %v4265_v12 = vmul.f32 %v4162_v22, %v7941_v23 }
0x1667   : > { %4272 = vrot.lane.b32.xlu0 %v4268_v52, %s6039_s7  ;;  %4258 = vrot.lane.b32.xlu1 %v4253_v57, %s6039_s7 }
0x166b   : > { %4274 = vrot.lane.b32.xlu1 %v4269_v58, %s6039_s7 }
0x1678   : > { %v4231_v63 = vpop.f32.mrb[36].mxu0 }
0x1679   : > { %v4284_v0 = vmul.f32 %v4231_v63, %v6724_v49  ;;  %v4233_v9 = vpop.f32.mrb[37].mxu0  ;;  %v4280_v62 = vmul.f32 %v4231_v63, %v6761_v38 }
0x167a   : > { %v4300_v7 = vmul.f32 %v4233_v9, %v6733_v40  ;;  %v4296_v21 = vmul.f32 %v4233_v9, %v7942_v6 }
0x167b   : > { %4288 = vrot.lane.b32.xlu0 %v4284_v0, %s6039_s7  ;;  %v7975_v0 = vld [vmem:[#allocation37_spill] sm:$0xff] }
0x167c   : > { %v4237_v10 = vpop.f32.mrb[38].mxu0 }
0x167d   : > { %v4285_v60 = vmul.f32 %v4237_v10, %v6729_v3  ;;  %v4239_v42 = vpop.f32.mrb[39].mxu0  ;;  %v4281_v14 = vmul.f32 %v4237_v10, %v6754_v56 }
0x167e   : > { %v4301_v20 = vmul.f32 %v4239_v42, %v6740_v33  ;;  %v4297_v30 = vmul.f32 %v4239_v42, %v7943_v43 }
0x167f   : > { %4304 = vrot.lane.b32.xlu0 %v4300_v7, %s6039_s7  ;;  %4290 = vrot.lane.b32.xlu1 %v4285_v60, %s6039_s7 }
0x1683   : > { %4328 = vrot.lane.b32.xlu0 %v7436_v26, %s6038_s27  ;;  %4306 = vrot.lane.b32.xlu1 %v4301_v20, %s6039_s7 }
0x1687   : > { %4330 = vrot.lane.b32.xlu1 %v7446_v50, %s6038_s27 }
0x16d5   : > { %v4257_v54 = vpop.permute.xlu0 %4256 }
0x16d6   : > { %v4262_v11 = vadd.f32 %v4257_v54, %v4250_v29 }
0x16d8   : > { %v4266_v36 = vadd.f32 %v4264_v17, %v4262_v11 }
0x16d9   : > { %v4273_v4 = vpop.permute.xlu0 %4272  ;;  %v4259_v19 = vpop.permute.xlu1 %4258 }
0x16da   : > { %v4278_v53 = vadd.f32 %v4273_v4, %v4266_v36  ;;  %v4263_v25 = vadd.f32 %v4259_v19, %v4251_v48 }
0x16dc   : > { %v4267_v24 = vadd.f32 %v4265_v12, %v4263_v25  ;;  %v4282_v27 = vadd.f32 %v4280_v62, %v4278_v53 }
0x16dd   : > { %v4275_v34 = vpop.permute.xlu1 %4274 }
0x16de   : > { %v4279_v8 = vadd.f32 %v4275_v34, %v4267_v24 }
0x16e0   : > { %v4283_v31 = vadd.f32 %v4281_v14, %v4279_v8 }
0x16ed   : > { %v4289_v2 = vpop.permute.xlu0 %4288 }
0x16ee   : > { %v4294_v28 = vadd.f32 %v4289_v2, %v4282_v27 }
0x16f0   : > { %v4298_v55 = vadd.f32 %v4296_v21, %v4294_v28 }
0x16f1   : > { %v4305_v5 = vpop.permute.xlu0 %4304  ;;  %v4291_v46 = vpop.permute.xlu1 %4290 }
0x16f2   : > { %v4310_v16 = vadd.f32 %v4305_v5, %v4298_v55  ;;  %v4295_v39 = vadd.f32 %v4291_v46, %v4283_v31 }
0x16f4   : > { %v4312_v52 = vadd.f32 %v7974_v51, %v4310_v16  ;;  %v4299_v57 = vadd.f32 %v4297_v30, %v4295_v39 }
0x16f5   : > { %v4307_v22 = vpop.permute.xlu1 %4306  ;;  %v4329_v54 = vpop.permute.xlu0 %4328 }
0x16f6   : > { %v4924_v58 = vmul.f32 -1.442695, %v4312_v52  ;;  %v4311_v63 = vadd.f32 %v4307_v22, %v4299_v57 }
0x16f8   : > { %5787 = vpow2.f32 %v4924_v58  ;;  %v4313_v10 = vadd.f32 %v7975_v0, %v4311_v63 }
0x16f9   : > { %v4331_v48 = vpop.permute.xlu1 %4330 }
0x16fa   : > { %v4925_v7 = vmul.f32 -1.442695, %v4313_v10 }
0x16fc   : > { %5789 = vpow2.f32 %v4925_v7 }
0x1702   : > { %v5788_v9 = vpop.eup %5787 }
0x1703   : > { %v4320_v60 = vadd.f32 1.0, %v5788_v9 }
0x1705   : > { %5791 = vrcp.f32 %v4320_v60 }
0x1706   : > { %v5790_v20 = vpop.eup %5789 }
0x1707   : > { %v4321_v29 = vadd.f32 1.0, %v5790_v20 }
0x1709   : > { %5793 = vrcp.f32 %v4321_v29 }
0x170f   : > { %v7566_v42 = vpop.eup %5791 }
0x1710   : > { %v4334_v17 = vmul.f32 %v7566_v42, %v4329_v54 }
0x1712   : > { %4338 = vrot.lane.b32.xlu0 %v4334_v17, %s6048_s12 }
0x1713   : > { %v7570_v11 = vpop.eup %5793 }
0x1714   : > { %v4335_v36 = vmul.f32 %v7570_v11, %v4331_v48 }
0x1716   : > { %4340 = vrot.lane.b32.xlu1 %v4335_v36, %s6048_s12 }
0x1784   : > { %v4339_v4 = vpop.permute.xlu0 %4338 }
0x1788   : > { %v4341_v19 = vpop.permute.xlu1 %4340 }
0x1789   : > { %v5515_v12 = vpack.c.bf16 %v4341_v19, %v4339_v4 }
0x178b   : > { %5516 = vmatprep.subr.bf16.mxu1 %v5515_v12 }
0x178c   : > { %5518 = vmatpush3.bf16.msra.mxu1 %v5515_v12 }
0x178f   : > { %5130 = vmatmul.mubr.msk.f32.vlgmr.msra.gmra.mrb[48].mxu1 %vm541_vm1, %v7464_v41 }
0x1790   : > { %5132 = vmatprep.mubr.msk.f32.mxu1 %vm541_vm1, %v7471_v1 }
0x1793   : > { %5133 = vmatmul.mubr.msk.f32.gmra.mrb[50].mxu1 %vm541_vm1, %v7480_v47 }
0x1862   : > { %v5131_v62 = vpop.f32.mrb[48].mxu1 }
0x1863   : > { %v4410_v53 = vpop.f32.mrb[49].mxu1 }
0x1864   : > { %4431 = vrot.lane.b32.xlu0 %v4410_v53, %s6038_s27 }
0x1866   : > { %v5134_v25 = vpop.f32.mrb[50].mxu1 }
0x1867   : > { %v4420_v24 = vpop.f32.mrb[51].mxu1 }
0x1868   : > { %4433 = vrot.lane.b32.xlu0 %v5131_v62, %s6038_s27  ;;  %4439 = vrot.lane.b32.xlu1 %v4420_v24, %s6039_s7 }
0x186c   : > { %4441 = vrot.lane.b32.xlu1 %v5134_v25, %s6039_s7  ;;  %v4620_v25 = vsub.f32 1.0, %v7566_v42 }
0x18d6   : > { %v4432_v27 = vpop.permute.xlu0 %4431 }
0x18d7   : > { %v4445_v41 = vsel %vm1019_vm8, %v4339_v4, %v4432_v27  ;;  %v4618_v27 = vmul.f32 %v7566_v42, %v7436_v26 }
0x18da   : > { %v4440_v34 = vpop.permute.xlu1 %4439  ;;  %v4434_v1 = vpop.permute.xlu0 %4433 }
0x18db   : > { %v4447_v14 = vsel %vm1022_vm9, %v4445_v41, %v4440_v34  ;;  %v4446_v47 = vsel %vm1019_vm8, %v4341_v19, %v4434_v1  ;;  %v4621_v34 = vsub.f32 1.0, %v7570_v11 }
0x18dc   : > { %4930 = vmatmul.mubr.msk.f32.vlgmr.msra.gmra.mrb[40].mxu0 %vm1025_vm10, %v4447_v14 }
0x18dd   : > { %4525 = vmatprep.mubr.f32.mxu0 %v7873_v44 }
0x18de   : > { %v4442_v8 = vpop.permute.xlu1 %4441 }
0x18df   : > { %v4448_v31 = vsel %vm1022_vm9, %v4446_v47, %v4442_v8 }
0x18e0   : > { %4931 = vmatmul.mubr.msk.f32.gmra.mrb[42].mxu0 %vm1025_vm10, %v4448_v31 }
0x19af   : > { %v4521_v2 = vpop.f32.mrb[40].mxu0 }
0x19b0   : > { %v4538_v21 = vmul.f32 %v4521_v2, %v6708_v18  ;;  %v4523_v28 = vpop.f32.mrb[41].mxu0  ;;  %v4550_v5 = vmul.f32 %v4521_v2, %v7903_v59  ;;  %v4562_v44 = vmul.f32 %v4521_v2, %v6712_v37 }
0x19b1   : > { %v4578_v18 = vmul.f32 %v4523_v28, %v6724_v49  ;;  %v4602_v37 = vmul.f32 %v4523_v28, %v6733_v40  ;;  %v4574_v0 = vmul.f32 %v4523_v28, %v6761_v38 }
0x19b2   : > { %4542 = vrot.lane.b32.xlu0 %v4538_v21, %s6048_s12 }
0x19b3   : > { %v4527_v55 = vpop.f32.mrb[42].mxu0 }
0x19b4   : > { %v4539_v46 = vmul.f32 %v4527_v55, %v6706_v15  ;;  %v4529_v30 = vpop.f32.mrb[43].mxu0  ;;  %v4551_v16 = vmul.f32 %v4527_v55, %v7941_v23  ;;  %v4563_v39 = vmul.f32 %v4527_v55, %v6718_v45  ;;  %v4590_v15 = vmul.f32 %v4523_v28, %v7942_v6 }
0x19b5   : > { %v4579_v59 = vmul.f32 %v4529_v30, %v6729_v3  ;;  %v4591_v23 = vmul.f32 %v4529_v30, %v7943_v43  ;;  %v4603_v45 = vmul.f32 %v4529_v30, %v6740_v33  ;;  %v4536_v6 = vmul.f32 %v4521_v2, %v7902_v32 }
0x19b6   : > { %4554 = vrot.lane.b32.xlu0 %v4550_v5, %s6039_s7  ;;  %4544 = vrot.lane.b32.xlu1 %v4539_v46, %s6048_s12  ;;  %v4537_v22 = vmul.f32 %v4527_v55, %v7940_v13  ;;  %v4575_v60 = vmul.f32 %v4529_v30, %v6754_v56 }
0x19ba   : > { %4566 = vrot.lane.b32.xlu0 %v4562_v44, %s6038_s27  ;;  %4556 = vrot.lane.b32.xlu1 %v4551_v16, %s6039_s7 }
0x19be   : > { %4582 = vrot.lane.b32.xlu0 %v4578_v18, %s6048_s12  ;;  %4568 = vrot.lane.b32.xlu1 %v4563_v39, %s6038_s27 }
0x19c2   : > { %4594 = vrot.lane.b32.xlu0 %v4590_v15, %s6039_s7  ;;  %4584 = vrot.lane.b32.xlu1 %v4579_v59, %s6048_s12 }
0x19c6   : > { %4606 = vrot.lane.b32.xlu0 %v4602_v37, %s6038_s27  ;;  %4596 = vrot.lane.b32.xlu1 %v4591_v23, %s6039_s7  ;;  %s4937_s7 = sshll.u32 %s6011_s16, 4 }
0x19ca   : > { %4608 = vrot.lane.b32.xlu1 %v4603_v45, %s6038_s27  ;;  %s4942_s27 = sshll.u32 %s6007_s15, 3 }
0x19cb   : > { %s4645_s12 = sadd.s32 %s4942_s27, %s4937_s7  ;;  %s6049_s27 = smov [#allocation9]  }
0x19cc   : > { %s4938_s20 = sshll.u32 %s4645_s12, 7  ;;  %s5901_s7 = sshll.u32 %s6049_s27, 4  ;;  %s5902_s7 = int_to_ptr.vmem [resolvable:$false] %s5901_s7 }
0x19cd   : > { %s7636_s6 = scalar_lea.hbm %s7977_s3, %s4938_s20  ;;  %s5903_s12 = scalar_lea.vmem %s5902_s7, 2048 }
0x19ce   : > { %p5904_p5 = scmp.lt.s32.totalorder %s7638_s21, %s5902_s7  ;;  %p5905_p8 = scmp.lt.s32.totalorder %s5903_s12, %s5897_s28 }
0x19d0   : > { %p5906_p12 = por %p5905_p8, %p5904_p5 }
0x19d2   : > { %p5907_p2 = pnand %p5906_p12, %p5900_p11 }
0x1a24   : > { %v4543_v49 = vpop.permute.xlu0 %4542 }
0x1a25   : > { %v4548_v52 = vadd.f32 %v4543_v49, %v4536_v6 }
0x1a28   : > { %v4555_v3 = vpop.permute.xlu0 %4554  ;;  %v4545_v51 = vpop.permute.xlu1 %4544 }
0x1a29   : > { %v4560_v57 = vadd.f32 %v4555_v3, %v4548_v52  ;;  %v4549_v43 = vadd.f32 %v4545_v51, %v4537_v22 }
0x1a2c   : > { %v4567_v40 = vpop.permute.xlu0 %4566  ;;  %v4557_v58 = vpop.permute.xlu1 %4556 }
0x1a2d   : > { %v4572_v63 = vadd.f32 %v4567_v40, %v4560_v57  ;;  %v4561_v10 = vadd.f32 %v4557_v58, %v4549_v43 }
0x1a2f   : > { %v4576_v7 = vadd.f32 %v4574_v0, %v4572_v63 }
0x1a30   : > { %v4583_v33 = vpop.permute.xlu0 %4582  ;;  %v4569_v9 = vpop.permute.xlu1 %4568 }
0x1a31   : > { %v4573_v20 = vadd.f32 %v4569_v9, %v4561_v10  ;;  %v4588_v17 = vadd.f32 %v4583_v33, %v4576_v7 }
0x1a33   : > { %v4577_v32 = vadd.f32 %v4575_v60, %v4573_v20 }
0x1a34   : > { %v4595_v29 = vpop.permute.xlu0 %4594  ;;  %v4585_v54 = vpop.permute.xlu1 %4584 }
0x1a35   : > { %v4600_v13 = vadd.f32 %v4595_v29, %v4588_v17  ;;  %v4589_v4 = vadd.f32 %v4585_v54, %v4577_v32 }
0x1a38   : > { %v4607_v48 = vpop.permute.xlu0 %4606  ;;  %v4597_v36 = vpop.permute.xlu1 %4596 }
0x1a39   : > { %v4612_v19 = vadd.f32 %v4607_v48, %v4600_v13  ;;  %v4601_v12 = vadd.f32 %v4597_v36, %v4589_v4 }
0x1a3b   : > { %v4614_v38 = vadd.f32 %v7403_v35, %v4612_v19 }
0x1a3c   : > { %v4609_v62 = vpop.permute.xlu1 %4608 }
0x1a3d   : > { %5795 = vtanh.f32 %v4614_v38  ;;  %v4613_v56 = vadd.f32 %v4609_v62, %v4601_v12 }
0x1a3f   : > { %v4615_v53 = vadd.f32 %v7411_v61, %v4613_v56  ;;  %v4619_v61 = vmul.f32 %v7570_v11, %v7446_v50 }
0x1a41   : > { %5797 = vtanh.f32 %v4615_v53 }
0x1a47   : > { %v5796_v24 = vpop.eup %5795 }
0x1a48   : > { %v4622_v35 = vmul.f32 %v5796_v24, %v4620_v25 }
0x1a4a   : > { %v4624_v41 = vadd.f32 %v4622_v35, %v4618_v27 }
0x1a4b   : > { %v5798_v1 = vpop.eup %5797 }
0x1a4c   : > { %4932 = vst.msk [vmem:[%s6338_s30 + $0x30] sm:$0xff] %vm1019_vm8, %v4624_v41  ;;  %4629 = vst.msk [vmem:[#allocation2] sm:$0xff] %vm1019_vm8, %v4624_v41  ;;  %v4623_v14 = vmul.f32 %v5798_v1, %v4621_v34 }
0x1a4e   : > { %v4625_v26 = vadd.f32 %v4623_v14, %v4619_v61 }
0x1a50   : > { %4933 = vst.msk [vmem:[%s6338_s30 + $0x38] sm:$0xff] %vm1019_vm8, %v4625_v26  ;;  %4630 = vst.msk [vmem:[#allocation2 + $0x8] sm:$0xff] %vm1019_vm8, %v4625_v26 }
0x1a51   : > { %5910 = shalt.err (!%p5907_p2)
}
0x1a52   : > { %s5911_s30 = scalar_lea.hbm %s7636_s6, 1024  ;;  %s5915_s16 = scalar_lea.hbm %s7977_s3, 4096 }
0x1a53   : > { %p5912_p6 = scmp.ne.s32.totalorder %s7636_s6, %s5911_s30  ;;  %p5916_p4 = scmp.lt.u32.totalorder %s7636_s6, %s7977_s3 }
0x1a54   : > { %p5917_p1 = scmp.lt.u32.totalorder %s5915_s16, %s5911_s30  ;;  %p5919_p13 = scmp.lt.u32.totalorder %s5911_s30, %s7636_s6 }
0x1a55   : > { %p5913_p10 = pnand %p5912_p6, %p7979_p7 }
0x1a56   : > { %p5918_p3 = por %p5917_p1, %p5916_p4 }
0x1a57   : > { %p5914_p0 = pneg %p5913_p10 }
0x1a58   : > { %p5920_p9 = por %p5919_p13, %p5918_p3 }
0x1a5a   : > { %p5921_p11 = pnand %p5920_p9, %p5914_p0 }
0x1a5c   : > { %5924 = shalt.err (!%p5921_p11)
}
0x1a5d   : > { %s6050_s28 = smov 128  }
0x1a5e   : > { %5601 = dma.vmem_to_hbm [thread:$0]  (%p7979_p7), %s7638_s21, 1024, %s7636_s6, %s7645_s23, %s6050_s28, %s6050_s28, %s6037_s26  }
0x1a5f PF: > { %s7980_s7 = sld [smem:[#allocation13_spill]]  ;;  %s7981_s12 = sld [smem:[#allocation16_spill]] }
0x1a60   : > { %p5623_p5 = scmp.ge.s32.totalorder %s6023_s19, 2 }
0x1a65   : > { %s4663_s20 = sand.u32 1, %s7980_s7   ;;  %p7982_p8 = scmp.ne.s32.totalorder %s7981_s12, 0 }
0x1a66   : > { %s4664_s30 = scalar_lea.sflag [#allocation5], %s4663_s20 }
0x1a67   : > { %p5615_p12 = pnand %p5623_p5, %p7982_p8 }
0x1a69   : > { %5978 = dma.done.wait (!%p5615_p12), %s4664_s30, 1024  }
0x1a6a   : > { %5980 = vsyncadd (!%p5615_p12), %s4664_s30, 4294966272  ;;  %s26_s19 = sadd.s32 1, %s6023_s19   ;;  %s7983_s15 = sld [smem:[#allocation14_spill]] }
0x1a6b   : > { %p23_p2 = scmp.ge.s32.totalorder %s26_s19, 6   ;;  %s7984_s17 = sld [smem:[#allocation17_spill]] }
0x1a6c   : > { %s7985_s30 = smov %s5987_s10  ;;  %s7986_s10 = smov %s5991_s11 }
0x1a6d   : > { %s7987_s11 = smov %s6276_s5  ;;  %s7988_s12 = smov %s5999_s13 }
0x1a6e   : > { %s7989_s13 = smov %s6003_s14  ;;  %s7990_s14 = smov %s6271_s9 }
0x1a6f   : > { %s7991_s16 = smov %s6019_s18  ;;  %s7992_s18 = smov %s7998_s8 }
0x1a70   :  { %25 = sbr.rel (!%p23_p2) target bundleno = 18 (0x12), region = 122 }
0x1a77   :  { %4669 = vsyncpa [#allocation4], 1 }
0x1a78   :  { %4671 = vsyncpa [#allocation4 + $0x1], 1 }
0x1a79   :  { %4672 = vsyncpa [#allocation7], 1 }
0x1a7a   :  { %4673 = vsyncpa [#allocation5], 1 }
0x1a7b   :  { %4675 = vsyncpa [#allocation5 + $0x1], 1 }

</bundles_post_ra>
